<compile_context>
chip_gen: v6e
topology: v6e:2x2x1
jax: 0.10.0
libtpu: 0.0.40
codegen_flags: <defaults>
</compile_context>

<pallas_src>
import math

import jax
import jax.numpy as jnp
from jax.experimental import pallas as pl
from jax.experimental.pallas import tpu as pltpu

BF16 = jnp.bfloat16
F32 = jnp.float32


def _round_up(n, m):
    return ((n + m - 1) // m) * m


def _vmem_limit_bytes():
    # VMEM-aware scoped limit: v5e/v6e have 128 MiB physical, v7x only 64 MiB.
    try:
        cap = int(pltpu.get_tpu_info().vmem_capacity_bytes)
    except Exception:
        cap = 128 * 1024 * 1024
    return max(32 * 1024 * 1024, min(cap - 16 * 1024 * 1024, 100 * 1024 * 1024))


_VMEM_LIMIT = _vmem_limit_bytes()


def _pick_tile(n, candidates):
    for c in candidates:
        if c <= n and n % c == 0:
            return c
    return n


def _graph_tiles(U, D, itemsize=2):
    # Row tile rt / contraction tile kt for the (rt, kt)x(kt, D) streaming
    # matmuls, sized so double-buffered adj stripe + xw K-tile + resident
    # output stay well within the scoped VMEM budget.
    budget = _VMEM_LIMIT // 2
    kt = _pick_tile(U, (2048, 1024, 512, 256, 128))
    rt = _pick_tile(U, (8,))
    for cand in (1024, 512, 256, 128, 64, 32, 16, 8):
        if cand > U or U % cand:
            continue
        need = 2 * (cand * kt * itemsize) + 2 * (kt * D * itemsize) + 2 * cand * D * 4
        if need <= budget:
            rt = cand
            break
    return rt, kt


# ----------------------------- Pallas kernels ------------------------------

def _xw_kernel(x_ref, w_ref, out_ref):
    # One-time projection X @ W for the hypergraph stage (hoisted out of the
    # per-graph loop), row-tiled so it pipelines and scales with U.
    out_ref[...] = jnp.dot(x_ref[...], w_ref[...],
                           preferred_element_type=jnp.float32).astype(out_ref.dtype)


def _graph_fuse_kernel(adj_ref, xw_ref, hb_ref, w1_ref, b1_ref, w2_ref, b2_ref,
                       out_ref, acc_ref):
    # TODO(synk): HypergraphConv is not defined in the source module; it is
    # implemented as dense propagation  cur = A_g @ (X W) + b  (eval dropout).
    # The Fusion (2-way softmax attention) with the previous graph's result is
    # applied at the last K-tile; the running embedding lives in the resident
    # output block (row axis parallel, graph & K axes arbitrary).
    g = pl.program_id(1)
    k = pl.program_id(2)
    last_k = pl.num_programs(2) - 1

    @pl.when(k == 0)
    def _():
        acc_ref[...] = jnp.zeros_like(acc_ref)

    acc_ref[...] += jnp.dot(adj_ref[...], xw_ref[...],
                            preferred_element_type=jnp.float32)

    @pl.when(jnp.logical_and(k == last_k, g == 0))
    def _():
        out_ref[...] = acc_ref[...] + hb_ref[...]

    @pl.when(jnp.logical_and(k == last_k, g > 0))
    def _():
        cur = acc_ref[...] + hb_ref[...]
        prev = out_ref[...]
        th = jnp.tanh(jnp.dot(prev.astype(BF16), w1_ref[...],
                              preferred_element_type=jnp.float32) + b1_ref[...])
        td = jnp.tanh(jnp.dot(cur.astype(BF16), w1_ref[...],
                              preferred_element_type=jnp.float32) + b1_ref[...])
        sh = jnp.sum(th * w2_ref[...], axis=1, keepdims=True) + b2_ref[...]
        sd = jnp.sum(td * w2_ref[...], axis=1, keepdims=True) + b2_ref[...]
        m = jnp.maximum(sh, sd)
        eh = jnp.exp(sh - m)
        ed = jnp.exp(sd - m)
        inv = pl.reciprocal(eh + ed, approx=True)
        out_ref[...] = (eh * prev + ed * cur) * inv


def _sage_kernel(adj_ref, xk_ref, xs_ref, ws_ref, wn_ref, b_ref, out_ref, acc_ref):
    # TODO(synk): GraphSAGEConv is not defined in the source module; it is
    # implemented as mean-aggregate SAGE: out = X Wself + (A X) Wneigh + b.
    # A@X is accumulated over K-tiles in f32 scratch; combine at k == last.
    k = pl.program_id(1)
    last_k = pl.num_programs(1) - 1

    @pl.when(k == 0)
    def _():
        acc_ref[...] = jnp.zeros_like(acc_ref)

    acc_ref[...] += jnp.dot(adj_ref[...], xk_ref[...],
                            preferred_element_type=jnp.float32)

    @pl.when(k == last_k)
    def _():
        out_ref[...] = (jnp.dot(xs_ref[...], ws_ref[...],
                                preferred_element_type=jnp.float32)
                        + jnp.dot(acc_ref[...].astype(BF16), wn_ref[...],
                                  preferred_element_type=jnp.float32)
                        + b_ref[...])


def _make_lstm3_kernel(S, Bc, D, Dp):
    # Merged RelationLSTM + CascadeLSTM + SharedLSTM for one batch chunk.
    # Input projections sharing an operand are merged: one (S*Bc, D)@(D, 8*Dp)
    # matmul per stream; columns [0,4Dp) are the task-LSTM gate pre-acts,
    # columns [4Dp,8Dp) are that stream's SharedLSTM contribution.
    D4 = 4 * Dp

    def kernel(cas_ref, soc_ref,
               cas_w_ref, soc_w_ref, cas_b_ref, soc_b_ref,
               rel_whh_ref, cas_whh_ref, sh_v_ref,
               rel_out_ref, cas_out_ref, sh_out_ref,
               g_cas, g_soc):
        g_cas[...] = (jnp.dot(cas_ref[...], cas_w_ref[...],
                              preferred_element_type=jnp.float32) + cas_b_ref[...])
        g_soc[...] = (jnp.dot(soc_ref[...], soc_w_ref[...],
                              preferred_element_type=jnp.float32) + soc_b_ref[...])

        def cell(pre, h, c, whh_ref):
            # bf16 recurrent matmul with f32 accumulate; gate slices are
            # lane-aligned because the hidden dim is padded to Dp (128k).
            gates = pre + jnp.dot(h.astype(BF16), whh_ref[...],
                                  preferred_element_type=jnp.float32)
            i = jax.nn.sigmoid(gates[:, 0:Dp])
            f = jax.nn.sigmoid(gates[:, Dp:2 * Dp])
            gg = jnp.tanh(gates[:, 2 * Dp:3 * Dp])
            o = jax.nn.sigmoid(gates[:, 3 * Dp:4 * Dp])
            c = f * c + i * gg
            h = o * jnp.tanh(c)
            return h, c

        def step(t, carry):
            h_r, c_r, h_c, c_c, h_s, c_s = carry
            r0 = pl.multiple_of(t * Bc, Bc)
            pre_cas = g_cas[pl.ds(r0, Bc), :]
            pre_soc = g_soc[pl.ds(r0, Bc), :]
            h_r, c_r = cell(pre_soc[:, 0:D4], h_r, c_r, rel_whh_ref)
            h_c, c_c = cell(pre_cas[:, 0:D4], h_c, c_c, cas_whh_ref)
            h_s, c_s = cell(pre_cas[:, D4:] + pre_soc[:, D4:], h_s, c_s, sh_v_ref)
            rel_out_ref[pl.ds(r0, Bc), :] = h_r
            cas_out_ref[pl.ds(r0, Bc), :] = h_c
            sh_out_ref[pl.ds(r0, Bc), :] = h_s
            return (h_r, c_r, h_c, c_c, h_s, c_s)

        z = jnp.zeros((Bc, Dp), jnp.float32)
        jax.lax.fori_loop(0, S, step, (z, z, z, z, z, z))

    return kernel


def _mlp2_kernel(xa_ref, xb_ref, w1a_ref, w1b_ref, b1_ref, w2_ref, b2_ref,
                 w3_ref, b3_ref, out_ref, h2_ref):
    # MLP over concat(xa, xb) with w1 split in two row-halves.  Layers 1-2 are
    # computed once per row-tile (at j == 0) and cached as bf16 in VMEM
    # scratch; only the layer-3 matmul runs per output-column tile.
    @pl.when(pl.program_id(1) == 0)
    def _():
        h1 = (jnp.dot(xa_ref[...], w1a_ref[...], preferred_element_type=jnp.float32)
              + jnp.dot(xb_ref[...], w1b_ref[...], preferred_element_type=jnp.float32)
              + b1_ref[...])
        h1 = jnp.maximum(h1, 0.0)
        h2 = jnp.maximum(
            jnp.dot(h1.astype(BF16), w2_ref[...], preferred_element_type=jnp.float32)
            + b2_ref[...], 0.0)
        h2_ref[...] = h2.astype(BF16)

    out_ref[...] = (jnp.dot(h2_ref[...], w3_ref[...],
                            preferred_element_type=jnp.float32) + b3_ref[...])


# ------------------------------ kernel wrappers -----------------------------

def project_embeddings(x_bf16, w_bf16):
    U, D = x_bf16.shape
    rt = _pick_tile(U, (2048, 1024, 512, 256, 128, 64, 32, 16, 8))
    return pl.pallas_call(
        _xw_kernel,
        out_shape=jax.ShapeDtypeStruct((U, D), BF16),
        grid=(U // rt,),
        in_specs=[pl.BlockSpec((rt, D), lambda i: (i, 0)),
                  pl.BlockSpec((D, D), lambda i: (0, 0))],
        out_specs=pl.BlockSpec((rt, D), lambda i: (i, 0)),
        compiler_params=pltpu.CompilerParams(
            dimension_semantics=("parallel",),
            vmem_limit_bytes=_VMEM_LIMIT),
    )(x_bf16, w_bf16)


def dynamic_cas_hgnn(adj_stack, xw, hgnn_b, fus_w1, fus_b1, fus_w2, fus_b2):
    G, U, _ = adj_stack.shape
    D = xw.shape[1]
    rt, kt = _graph_tiles(U, D)
    return pl.pallas_call(
        _graph_fuse_kernel,
        out_shape=jax.ShapeDtypeStruct((U, D), F32),
        grid=(U // rt, G, U // kt),
        in_specs=[
            pl.BlockSpec((None, rt, kt), lambda i, g, k: (g, i, k)),
            pl.BlockSpec((kt, D), lambda i, g, k: (k, 0)),
            pl.BlockSpec((1, D), lambda i, g, k: (0, 0)),
            pl.BlockSpec((D, D), lambda i, g, k: (0, 0)),
            pl.BlockSpec((1, D), lambda i, g, k: (0, 0)),
            pl.BlockSpec((1, D), lambda i, g, k: (0, 0)),
            pl.BlockSpec((1, 1), lambda i, g, k: (0, 0)),
        ],
        out_specs=pl.BlockSpec((rt, D), lambda i, g, k: (i, 0)),
        scratch_shapes=[pltpu.VMEM((rt, D), F32)],
        compiler_params=pltpu.CompilerParams(
            dimension_semantics=("parallel", "arbitrary", "arbitrary"),
            vmem_limit_bytes=_VMEM_LIMIT),
    )(adj_stack, xw, hgnn_b, fus_w1, fus_b1, fus_w2, fus_b2)


def relation_gnn(adj, x, ws, wn, b):
    U, D = x.shape
    rt, kt = _graph_tiles(U, D)
    return pl.pallas_call(
        _sage_kernel,
        out_shape=jax.ShapeDtypeStruct((U, D), F32),
        grid=(U // rt, U // kt),
        in_specs=[
            pl.BlockSpec((rt, kt), lambda i, k: (i, k)),
            pl.BlockSpec((kt, D), lambda i, k: (k, 0)),
            pl.BlockSpec((rt, D), lambda i, k: (i, 0)),   # row-tiled self term
            pl.BlockSpec((D, D), lambda i, k: (0, 0)),
            pl.BlockSpec((D, D), lambda i, k: (0, 0)),
            pl.BlockSpec((1, D), lambda i, k: (0, 0)),
        ],
        out_specs=pl.BlockSpec((rt, D), lambda i, k: (i, 0)),
        scratch_shapes=[pltpu.VMEM((rt, D), F32)],
        compiler_params=pltpu.CompilerParams(
            dimension_semantics=("parallel", "arbitrary"),
            vmem_limit_bytes=_VMEM_LIMIT),
    )(adj, x, x, ws, wn, b)


def _pick_batch_chunk(S, Bp, Dp):
    # Bound the two f32 gate scratch buffers (S*Bc, 8*Dp) to ~1/3 of VMEM.
    budget = _VMEM_LIMIT // 3
    per_row = 2 * 8 * Dp * 4
    max_rows = max(budget // per_row, 8)
    bc = min(Bp, max(8, (max_rows // S) // 8 * 8))
    while Bp % bc:
        bc -= 8
    return max(bc, 8)


def run_three_lstms(cas_chunks, soc_chunks, S, Bc, D, Dp, pp):
    C = cas_chunks.shape[0]
    N = S * Bc
    kernel = _make_lstm3_kernel(S, Bc, D, Dp)
    args = (
        cas_chunks, soc_chunks,
        pp["lstm_cas_w"], pp["lstm_soc_w"], pp["lstm_cas_b"], pp["lstm_soc_b"],
        pp["lstm_rel_whh"], pp["lstm_cas_whh"], pp["lstm_sh_v"],
    )
    seq_spec = pl.BlockSpec((None, N, D), lambda c: (c, 0, 0))

    def full_spec(a):
        return pl.BlockSpec(a.shape, lambda c, _nd=a.ndim: (0,) * _nd)

    in_specs = [seq_spec, seq_spec] + [full_spec(a) for a in args[2:]]
    out_spec = pl.BlockSpec((None, N, Dp), lambda c: (c, 0, 0))
    out_shape = tuple(jax.ShapeDtypeStruct((C, N, Dp), F32) for _ in range(3))
    return pl.pallas_call(
        kernel,
        out_shape=out_shape,
        grid=(C,),
        in_specs=in_specs,
        out_specs=(out_spec, out_spec, out_spec),
        scratch_shapes=[pltpu.VMEM((N, 8 * Dp), F32) for _ in range(2)],
        compiler_params=pltpu.CompilerParams(
            dimension_semantics=("parallel",),
            vmem_limit_bytes=_VMEM_LIMIT),
    )(*args)


def run_mlp2(xa, xb, w1a, w1b, b1, w2, b2, w3p, b3p, out_dim):
    rows, da = xa.shape
    db = xb.shape[1]
    hid = w1a.shape[1]
    out_p = w3p.shape[1]

    rows_p = _round_up(rows, 8)
    if rows_p != rows:
        xa = jnp.pad(xa, ((0, rows_p - rows), (0, 0)))
        xb = jnp.pad(xb, ((0, rows_p - rows), (0, 0)))
    rt = _pick_tile(rows_p, (512, 256, 128, 64, 32, 16, 8))
    ct = _pick_tile(out_p, (512, 256, 128))

    out = pl.pallas_call(
        _mlp2_kernel,
        out_shape=jax.ShapeDtypeStruct((rows_p, out_p), F32),
        grid=(rows_p // rt, out_p // ct),
        in_specs=[
            pl.BlockSpec((rt, da), lambda i, j: (i, 0)),
            pl.BlockSpec((rt, db), lambda i, j: (i, 0)),
            pl.BlockSpec((da, hid), lambda i, j: (0, 0)),
            pl.BlockSpec((db, hid), lambda i, j: (0, 0)),
            pl.BlockSpec((1, hid), lambda i, j: (0, 0)),
            pl.BlockSpec((hid, hid), lambda i, j: (0, 0)),
            pl.BlockSpec((1, hid), lambda i, j: (0, 0)),
            pl.BlockSpec((hid, ct), lambda i, j: (0, j)),
            pl.BlockSpec((1, ct), lambda i, j: (0, j)),
        ],
        out_specs=pl.BlockSpec((rt, ct), lambda i, j: (i, j)),
        scratch_shapes=[pltpu.VMEM((rt, hid), BF16)],
        compiler_params=pltpu.CompilerParams(
            dimension_semantics=("parallel", "arbitrary"),
            vmem_limit_bytes=_VMEM_LIMIT),
    )(xa, xb, w1a, w1b, b1, w2, b2, w3p, b3p)
    return out[:rows, :out_dim]


# ------------------------------ parameters ----------------------------------

def _uniform(key, shape, stdv):
    return jax.random.uniform(key, shape, jnp.float32, minval=-stdv, maxval=stdv)


def init_params(key, user_size, emb_dim, task_num):
    # Module.init_weights() overwrites ALL parameters with U(-1/sqrt(D), 1/sqrt(D)).
    stdv = 1.0 / math.sqrt(emb_dim)
    keys = iter(jax.random.split(key, 40))
    D = emb_dim
    p = {}
    # DynamicCasHGNN (user table + HypergraphConv + Fusion)
    p["cas_user_emb"] = _uniform(next(keys), (user_size, D), stdv)
    p["hgnn_w"] = _uniform(next(keys), (D, D), stdv)
    p["hgnn_b"] = _uniform(next(keys), (1, D), stdv)
    p["fus_w1"] = _uniform(next(keys), (D, D), stdv)
    p["fus_b1"] = _uniform(next(keys), (1, D), stdv)
    p["fus_w2"] = _uniform(next(keys), (1, D), stdv)     # linear2 weight (out=1)
    p["fus_b2"] = _uniform(next(keys), (1, 1), stdv)
    # RelationGNN (user table + GraphSAGEConv)
    p["rel_user_emb"] = _uniform(next(keys), (user_size, D), stdv)
    p["sage_wself"] = _uniform(next(keys), (D, D), stdv)
    p["sage_wneigh"] = _uniform(next(keys), (D, D), stdv)
    p["sage_b"] = _uniform(next(keys), (1, D), stdv)
    # RelationLSTM / CascadeLSTM (nn.LSTM weights, stored transposed, gates i,f,g,o)
    for name in ("rel", "cas"):
        p[f"{name}_wih"] = _uniform(next(keys), (D, 4 * D), stdv)
        p[f"{name}_whh"] = _uniform(next(keys), (D, 4 * D), stdv)
        p[f"{name}_b"] = (_uniform(next(keys), (1, 4 * D), stdv)
                          + _uniform(next(keys), (1, 4 * D), stdv))       # b_ih + b_hh
    # SharedLSTM: per-gate (D, D) weights packed along columns -> (D, 4D)
    p["sh_W"] = _uniform(next(keys), (D, 4 * D), stdv)
    p["sh_U"] = _uniform(next(keys), (D, 4 * D), stdv)
    p["sh_V"] = _uniform(next(keys), (D, 4 * D), stdv)
    p["sh_b"] = _uniform(next(keys), (1, 4 * D), stdv)
    # shared_linear (LinearLayer not defined -> logits = X @ W + b)
    p["sl_w"] = _uniform(next(keys), (D, task_num), stdv)
    p["sl_b"] = _uniform(next(keys), (1, task_num), stdv)
    # micro MLP: 2D -> 4D -> 4D -> user_size
    p["mi_w1"] = _uniform(next(keys), (2 * D, 4 * D), stdv)
    p["mi_b1"] = _uniform(next(keys), (1, 4 * D), stdv)
    p["mi_w2"] = _uniform(next(keys), (4 * D, 4 * D), stdv)
    p["mi_b2"] = _uniform(next(keys), (1, 4 * D), stdv)
    p["mi_w3"] = _uniform(next(keys), (4 * D, user_size), stdv)
    p["mi_b3"] = _uniform(next(keys), (1, user_size), stdv)
    # macro MLP: 2D -> 4D -> 4D -> 1
    p["ma_w1"] = _uniform(next(keys), (2 * D, 4 * D), stdv)
    p["ma_b1"] = _uniform(next(keys), (1, 4 * D), stdv)
    p["ma_w2"] = _uniform(next(keys), (4 * D, 4 * D), stdv)
    p["ma_b2"] = _uniform(next(keys), (1, 4 * D), stdv)
    p["ma_w3"] = _uniform(next(keys), (4 * D, 1), stdv)
    p["ma_b3"] = _uniform(next(keys), (1, 1), stdv)
    return p


def _pad_gate_cols(w, D, Dp):
    # (rows, 4*D) with gates [i,f,g,o] packed along columns -> (rows, 4*Dp)
    # with each gate block placed at column g*Dp (lane-aligned gate slices).
    rows = w.shape[0]
    w = w.reshape(rows, 4, D)
    w = jnp.pad(w, ((0, 0), (0, 0), (0, Dp - D)))
    return w.reshape(rows, 4 * Dp)


def preprocess_params(p, D):
    # One-time weight prep (bf16 casts, LSTM weight merge + gate padding,
    # MLP w1 split and w3/b3 lane padding) so the forward pass has zero
    # per-call cast / concat HLOs.
    Dp = _round_up(D, 128)
    pp = {}
    pp["cas_user_emb"] = p["cas_user_emb"].astype(BF16)
    pp["rel_user_emb"] = p["rel_user_emb"].astype(BF16)
    pp["hgnn_w"] = p["hgnn_w"].astype(BF16)
    pp["hgnn_b"] = p["hgnn_b"]
    pp["fus_w1"] = p["fus_w1"].astype(BF16)
    pp["fus_b1"] = p["fus_b1"]
    pp["fus_w2"] = p["fus_w2"]
    pp["fus_b2"] = p["fus_b2"]
    pp["sage_wself"] = p["sage_wself"].astype(BF16)
    pp["sage_wneigh"] = p["sage_wneigh"].astype(BF16)
    pp["sage_b"] = p["sage_b"]

    # Merged + gate-padded LSTM weights: columns [0,4Dp) task gates,
    # [4Dp,8Dp) SharedLSTM contribution of that stream.
    pp["lstm_cas_w"] = jnp.concatenate(
        [_pad_gate_cols(p["cas_wih"], D, Dp), _pad_gate_cols(p["sh_W"], D, Dp)],
        axis=1).astype(BF16)
    pp["lstm_soc_w"] = jnp.concatenate(
        [_pad_gate_cols(p["rel_wih"], D, Dp), _pad_gate_cols(p["sh_U"], D, Dp)],
        axis=1).astype(BF16)
    pp["lstm_cas_b"] = jnp.concatenate(
        [_pad_gate_cols(p["cas_b"], D, Dp), jnp.zeros((1, 4 * Dp), F32)], axis=1)
    pp["lstm_soc_b"] = jnp.concatenate(
        [_pad_gate_cols(p["rel_b"], D, Dp), _pad_gate_cols(p["sh_b"], D, Dp)], axis=1)

    def pad_rec(w):  # recurrent weights: (D, 4D) -> (Dp, 4Dp), bf16
        w = _pad_gate_cols(w, D, Dp)
        return jnp.pad(w, ((0, Dp - D), (0, 0))).astype(BF16)

    pp["lstm_rel_whh"] = pad_rec(p["rel_whh"])
    pp["lstm_cas_whh"] = pad_rec(p["cas_whh"])
    pp["lstm_sh_v"] = pad_rec(p["sh_V"])

    pp["sl_w"] = p["sl_w"]
    pp["sl_b"] = p["sl_b"]

    for name in ("mi", "ma"):
        w1 = p[f"{name}_w1"]
        pp[f"{name}_w1a"] = w1[:D].astype(BF16)
        pp[f"{name}_w1b"] = w1[D:].astype(BF16)
        pp[f"{name}_b1"] = p[f"{name}_b1"]
        pp[f"{name}_w2"] = p[f"{name}_w2"].astype(BF16)
        pp[f"{name}_b2"] = p[f"{name}_b2"]
        w3, b3 = p[f"{name}_w3"], p[f"{name}_b3"]
        out_p = _round_up(w3.shape[1], 128)               # lane-dense head output
        pp[f"{name}_w3"] = jnp.pad(w3, ((0, 0), (0, out_p - w3.shape[1]))).astype(BF16)
        pp[f"{name}_b3"] = jnp.pad(b3, ((0, 0), (0, out_p - b3.shape[1])))
    return pp


# ------------------------------ forward pass ---------------------------------

def module_forward(pp, graph_stack, relation_graph, examples, *, user_size, task_num):
    D = pp["hgnn_w"].shape[1]
    Dp = _round_up(D, 128)
    B, S = examples.shape

    # --- DynamicCasHGNN: X@W once, then fused per-graph conv + Fusion chain ---
    xw = project_embeddings(pp["cas_user_emb"], pp["hgnn_w"])
    user_cas_embedding = dynamic_cas_hgnn(
        graph_stack, xw, pp["hgnn_b"], pp["fus_w1"], pp["fus_b1"],
        pp["fus_w2"], pp["fus_b2"])                                       # (U, D)

    # --- RelationGNN (dropout in eval mode -> identity, is_norm=False) ---
    user_social_embedding = relation_gnn(
        relation_graph, pp["rel_user_emb"], pp["sage_wself"],
        pp["sage_wneigh"], pp["sage_b"])                                  # (U, D)

    # --- embedding lookups, time-major, batch padded + chunked ---
    Bp = _round_up(B, 8)
    Bc = _pick_batch_chunk(S, Bp, Dp)
    C = Bp // Bc
    ex_t = jnp.pad(examples.T, ((0, 0), (0, Bp - B)))                     # (S, Bp)
    ex_c = ex_t.reshape(S, C, Bc).transpose(1, 0, 2)                      # (C, S, Bc)
    cas_seq = user_cas_embedding.astype(BF16)[ex_c].reshape(C, S * Bc, D)
    soc_seq = user_social_embedding.astype(BF16)[ex_c].reshape(C, S * Bc, D)

    rel_o, cas_o, sh_o = run_three_lstms(cas_seq, soc_seq, S, Bc, D, Dp, pp)

    def unchunk(o):
        o = o.reshape(C, S, Bc, Dp).transpose(1, 0, 2, 3).reshape(S, Bp, Dp)
        return o[:, :B, :D]

    rel_tm = unchunk(rel_o)                                               # (S, B, D)
    cas_tm = unchunk(cas_o)
    sh_tm = unchunk(sh_o)

    # --- gather last valid timestep (negative index wraps like torch) ---
    example_len = jnp.count_nonzero(examples, axis=1)
    idx = jnp.where(example_len > 0, example_len - 1, S - 1)
    bidx = jnp.arange(B)
    H_user = rel_tm[idx, bidx]                                            # (B, D)
    H_cas = cas_tm[idx, bidx]
    H_share = sh_tm[idx, bidx]

    # --- prediction heads (Pallas MLP kernels, concat done via split w1) ---
    rel_bm = jnp.transpose(rel_tm, (1, 0, 2)).reshape(B * S, D).astype(BF16)
    sh_bm = jnp.transpose(sh_tm, (1, 0, 2)).reshape(B * S, D).astype(BF16)
    pred_micro = run_mlp2(rel_bm, sh_bm,
                          pp["mi_w1a"], pp["mi_w1b"], pp["mi_b1"],
                          pp["mi_w2"], pp["mi_b2"], pp["mi_w3"], pp["mi_b3"],
                          user_size).reshape(B, S, user_size)
    pred_macro = run_mlp2(H_cas.astype(BF16), H_share.astype(BF16),
                          pp["ma_w1a"], pp["ma_w1b"], pp["ma_b1"],
                          pp["ma_w2"], pp["ma_b2"], pp["ma_w3"], pp["ma_b3"],
                          1)                                              # (B, 1)

    # --- adversarial loss (tiny; plain JAX glue) ---
    # TODO(synk): LinearLayer is not defined in the source; logits = X @ W + b,
    # its L2 term is dropped (Module.forward discards it anyway).
    logits = H_share @ pp["sl_w"] + pp["sl_b"]                            # (B, task_num)
    log_z = jax.scipy.special.logsumexp(logits, axis=1)
    loss_adv = jnp.mean(task_num * log_z - jnp.sum(logits, axis=1))

    # --- diff losses (tiny; plain JAX glue) ---
    def diff_loss(shared, task):
        s = shared - jnp.mean(shared, axis=0)
        t = task - jnp.mean(task, axis=0)
        s = s / jnp.maximum(jnp.linalg.norm(s, axis=1, keepdims=True), 1e-12)
        t = t / jnp.maximum(jnp.linalg.norm(t, axis=1, keepdims=True), 1e-12)
        corr = t.T @ s
        return jnp.maximum(jnp.mean(jnp.square(corr)) * 0.01, 0.0)

    loss_diff = diff_loss(H_share, H_user) + diff_loss(H_share, H_cas)

    return pred_micro, pred_macro, loss_adv, loss_diff


# --------------------------------- main --------------------------------------

if __name__ == "__main__":
    user_size = 16
    emb_dim = 32
    step_split = 3
    batch = 2
    seq_len = 8
    task_num = 2

    key = jax.random.PRNGKey(0)
    k_ex, k_g, k_r, k_p = jax.random.split(key, 4)

    # user sequences; row 1 has trailing zero padding so example_len varies
    examples = jax.random.randint(k_ex, (batch, seq_len), 1, user_size, dtype=jnp.int32)
    examples = examples.at[1, seq_len - 2:].set(0)

    # dense row-normalized hypergraph propagation matrices (stacked) + relation graph
    graphs = []
    for i in range(step_split):
        a = jax.random.uniform(jax.random.fold_in(k_g, i), (user_size, user_size),
                               jnp.float32)
        graphs.append(a / jnp.sum(a, axis=1, keepdims=True))
    graph_stack = jnp.stack(graphs, axis=0).astype(BF16)                  # (G, U, U)
    rel = jax.random.uniform(k_r, (user_size, user_size), jnp.float32)
    relation_graph = (rel / jnp.sum(rel, axis=1, keepdims=True)).astype(BF16)

    params = init_params(k_p, user_size, emb_dim, task_num)
    pp = preprocess_params(params, emb_dim)

    fwd = jax.jit(module_forward, static_argnames=("user_size", "task_num"))
    pred_micro, pred_macro, loss_adv, loss_diff = fwd(
        pp, graph_stack, relation_graph, examples,
        user_size=user_size, task_num=task_num)

    jax.block_until_ready((pred_micro, pred_macro, loss_adv, loss_diff))
    assert pred_micro.shape == (batch, seq_len, user_size)
    assert pred_macro.shape == (batch, 1)
    assert bool(jnp.isfinite(loss_adv)) and bool(jnp.isfinite(loss_diff))
    print("KERNEL_OK")
</pallas_src>

<mosaic_0001>
module attributes {stable_mosaic.version = 11 : i64} {
  func.func @_sage_kernel(%arg0: i32, %arg1: i32, %arg2: memref<16x16xbf16, #tpu.memory_space<vmem>>, %arg3: memref<16x32xbf16, #tpu.memory_space<vmem>>, %arg4: memref<16x32xbf16, #tpu.memory_space<vmem>>, %arg5: memref<32x32xbf16, #tpu.memory_space<vmem>>, %arg6: memref<32x32xbf16, #tpu.memory_space<vmem>>, %arg7: memref<1x32xf32, #tpu.memory_space<vmem>>, %arg8: memref<16x32xf32, #tpu.memory_space<vmem>>, %arg9: memref<16x32xf32, #tpu.memory_space<vmem>>) attributes {dimension_semantics = [#tpu.dimension_semantics<parallel>, #tpu.dimension_semantics<arbitrary>], iteration_bounds = array<i64: 1, 1>, scalar_prefetch = 0 : i64, scratch_operands = 1 : i64, tpu.core_type = #tpu.core_type<tc>, window_params = [{transform_indices = @transform_0, window_bounds = array<i64: 16, 16>}, {transform_indices = @transform_1, window_bounds = array<i64: 16, 32>}, {transform_indices = @transform_2, window_bounds = array<i64: 16, 32>}, {pipeline_mode = #tpu.pipeline_mode<synchronous>, transform_indices = @transform_3, window_bounds = array<i64: 32, 32>}, {pipeline_mode = #tpu.pipeline_mode<synchronous>, transform_indices = @transform_4, window_bounds = array<i64: 32, 32>}, {pipeline_mode = #tpu.pipeline_mode<synchronous>, transform_indices = @transform_5, window_bounds = array<i64: 1, 32>}, {transform_indices = @transform_6, window_bounds = array<i64: 16, 32>}]} {
    %c0_i32 = arith.constant 0 : i32
    %0 = arith.cmpi eq, %arg1, %c0_i32 : i32
    %1 = arith.extui %0 : i1 to i32
    %c0_i32_0 = arith.constant 0 : i32
    %2 = arith.cmpi ne, %1, %c0_i32_0 : i32
    scf.if %2 {
      %cst_10 = arith.constant 0.000000e+00 : f32
      %12 = vector.broadcast %cst_10 : f32 to vector<16x32xf32>
      %c0_11 = arith.constant 0 : index
      %c0_12 = arith.constant 0 : index
      %13 = vector.load %arg9[%c0_11, %c0_12] : memref<16x32xf32, #tpu.memory_space<vmem>>, vector<16x32xf32>
      tpu.vector_store %arg9[%c0_11, %c0_12], %12 {strides = array<i32>} : memref<16x32xf32, #tpu.memory_space<vmem>>, vector<16x32xf32>,
    } else {
    }
    %c0 = arith.constant 0 : index
    %c0_1 = arith.constant 0 : index
    %3 = vector.load %arg9[%c0, %c0_1] : memref<16x32xf32, #tpu.memory_space<vmem>>, vector<16x32xf32>
    %c0_2 = arith.constant 0 : index
    %c0_3 = arith.constant 0 : index
    %4 = vector.load %arg2[%c0_2, %c0_3] : memref<16x16xbf16, #tpu.memory_space<vmem>>, vector<16x16xbf16>
    %c0_4 = arith.constant 0 : index
    %c0_5 = arith.constant 0 : index
    %5 = vector.load %arg3[%c0_4, %c0_5] : memref<16x32xbf16, #tpu.memory_space<vmem>>, vector<16x32xbf16>
    %cst = arith.constant dense<0.000000e+00> : vector<16x32xf32>
    %6 = tpu.matmul %4, %5, %cst {dimension_numbers = #tpu.dot_dimension_numbers<[1], [0], [0], [1], [0, 0, 1, 1], [], []>} : vector<16x16xbf16>, vector<16x32xbf16>, vector<16x32xf32> -> vector<16x32xf32>
    %7 = arith.addf %3, %6 : vector<16x32xf32>
    %c0_6 = arith.constant 0 : index
    %c0_7 = arith.constant 0 : index
    %8 = vector.load %arg9[%c0_6, %c0_7] : memref<16x32xf32, #tpu.memory_space<vmem>>, vector<16x32xf32>
    tpu.vector_store %arg9[%c0_6, %c0_7], %7 {strides = array<i32>} : memref<16x32xf32, #tpu.memory_space<vmem>>, vector<16x32xf32>,
    %c0_i32_8 = arith.constant 0 : i32
    %9 = arith.cmpi eq, %arg1, %c0_i32_8 : i32
    %10 = arith.extui %9 : i1 to i32
    %c0_i32_9 = arith.constant 0 : i32
    %11 = arith.cmpi ne, %10, %c0_i32_9 : i32
    scf.if %11 {
      %c0_10 = arith.constant 0 : index
      %c0_11 = arith.constant 0 : index
      %12 = vector.load %arg4[%c0_10, %c0_11] : memref<16x32xbf16, #tpu.memory_space<vmem>>, vector<16x32xbf16>
      %c0_12 = arith.constant 0 : index
      %c0_13 = arith.constant 0 : index
      %13 = vector.load %arg5[%c0_12, %c0_13] : memref<32x32xbf16, #tpu.memory_space<vmem>>, vector<32x32xbf16>
      %cst_14 = arith.constant dense<0.000000e+00> : vector<16x32xf32>
      %14 = tpu.matmul %12, %13, %cst_14 {dimension_numbers = #tpu.dot_dimension_numbers<[1], [0], [0], [1], [0, 0, 1, 1], [], []>} : vector<16x32xbf16>, vector<32x32xbf16>, vector<16x32xf32> -> vector<16x32xf32>
      %c0_15 = arith.constant 0 : index
      %c0_16 = arith.constant 0 : index
      %15 = vector.load %arg9[%c0_15, %c0_16] : memref<16x32xf32, #tpu.memory_space<vmem>>, vector<16x32xf32>
      %16 = arith.truncf %15 : vector<16x32xf32> to vector<16x32xbf16>
      %c0_17 = arith.constant 0 : index
      %c0_18 = arith.constant 0 : index
      %17 = vector.load %arg6[%c0_17, %c0_18] : memref<32x32xbf16, #tpu.memory_space<vmem>>, vector<32x32xbf16>
      %cst_19 = arith.constant dense<0.000000e+00> : vector<16x32xf32>
      %18 = tpu.matmul %16, %17, %cst_19 {dimension_numbers = #tpu.dot_dimension_numbers<[1], [0], [0], [1], [0, 0, 1, 1], [], []>} : vector<16x32xbf16>, vector<32x32xbf16>, vector<16x32xf32> -> vector<16x32xf32>
      %19 = arith.addf %14, %18 : vector<16x32xf32>
      %c0_20 = arith.constant 0 : index
      %c0_21 = arith.constant 0 : index
      %20 = vector.load %arg7[%c0_20, %c0_21] : memref<1x32xf32, #tpu.memory_space<vmem>>, vector<1x32xf32>
      %21 = vector.broadcast %20 : vector<1x32xf32> to vector<16x32xf32>
      %22 = arith.addf %19, %21 : vector<16x32xf32>
      %c0_22 = arith.constant 0 : index
      %c0_23 = arith.constant 0 : index
      %23 = vector.load %arg8[%c0_22, %c0_23] : memref<16x32xf32, #tpu.memory_space<vmem>>, vector<16x32xf32>
      tpu.vector_store %arg8[%c0_22, %c0_23], %22 {strides = array<i32>} : memref<16x32xf32, #tpu.memory_space<vmem>>, vector<16x32xf32>,
    } else {
    }
    return
  }
  func.func @transform_0(%arg0: i32, %arg1: i32) -> (i32, i32) {
    %c0_i32 = arith.constant 0 : i32
    return %arg0, %arg1 : i32, i32
  }
  func.func @transform_1(%arg0: i32, %arg1: i32) -> (i32, i32) {
    %c0_i32 = arith.constant 0 : i32
    %c0_i32_0 = arith.constant 0 : i32
    return %arg1, %c0_i32 : i32, i32
  }
  func.func @transform_2(%arg0: i32, %arg1: i32) -> (i32, i32) {
    %c0_i32 = arith.constant 0 : i32
    %c0_i32_0 = arith.constant 0 : i32
    return %arg0, %c0_i32 : i32, i32
  }
  func.func @transform_3(%arg0: i32, %arg1: i32) -> (i32, i32) {
    %c0_i32 = arith.constant 0 : i32
    %c0_i32_0 = arith.constant 0 : i32
    %c0_i32_1 = arith.constant 0 : i32
    return %c0_i32, %c0_i32_0 : i32, i32
  }
  func.func @transform_4(%arg0: i32, %arg1: i32) -> (i32, i32) {
    %c0_i32 = arith.constant 0 : i32
    %c0_i32_0 = arith.constant 0 : i32
    %c0_i32_1 = arith.constant 0 : i32
    return %c0_i32, %c0_i32_0 : i32, i32
  }
  func.func @transform_5(%arg0: i32, %arg1: i32) -> (i32, i32) {
    %c0_i32 = arith.constant 0 : i32
    %c0_i32_0 = arith.constant 0 : i32
    %c0_i32_1 = arith.constant 0 : i32
    return %c0_i32, %c0_i32_0 : i32, i32
  }
  func.func @transform_6(%arg0: i32, %arg1: i32) -> (i32, i32) {
    %c0_i32 = arith.constant 0 : i32
    %c0_i32_0 = arith.constant 0 : i32
    return %arg0, %c0_i32 : i32, i32
  }
}

module attributes {stable_mosaic.version = 11 : i64} {
  func.func @_graph_fuse_kernel(%arg0: i32, %arg1: i32, %arg2: i32, %arg3: memref<1x16x16xbf16, #tpu.memory_space<vmem>>, %arg4: memref<16x32xbf16, #tpu.memory_space<vmem>>, %arg5: memref<1x32xf32, #tpu.memory_space<vmem>>, %arg6: memref<32x32xbf16, #tpu.memory_space<vmem>>, %arg7: memref<1x32xf32, #tpu.memory_space<vmem>>, %arg8: memref<1x32xf32, #tpu.memory_space<vmem>>, %arg9: memref<1x1xf32, #tpu.memory_space<vmem>>, %arg10: memref<16x32xf32, #tpu.memory_space<vmem>>, %arg11: memref<16x32xf32, #tpu.memory_space<vmem>>) attributes {dimension_semantics = [#tpu.dimension_semantics<parallel>, #tpu.dimension_semantics<arbitrary>, #tpu.dimension_semantics<arbitrary>], iteration_bounds = array<i64: 1, 3, 1>, scalar_prefetch = 0 : i64, scratch_operands = 1 : i64, tpu.core_type = #tpu.core_type<tc>, window_params = [{transform_indices = @transform_0, window_bounds = array<i64: 1, 16, 16>}, {transform_indices = @transform_1, window_bounds = array<i64: 16, 32>}, {pipeline_mode = #tpu.pipeline_mode<synchronous>, transform_indices = @transform_2, window_bounds = array<i64: 1, 32>}, {pipeline_mode = #tpu.pipeline_mode<synchronous>, transform_indices = @transform_3, window_bounds = array<i64: 32, 32>}, {pipeline_mode = #tpu.pipeline_mode<synchronous>, transform_indices = @transform_4, window_bounds = array<i64: 1, 32>}, {pipeline_mode = #tpu.pipeline_mode<synchronous>, transform_indices = @transform_5, window_bounds = array<i64: 1, 32>}, {pipeline_mode = #tpu.pipeline_mode<synchronous>, transform_indices = @transform_6, window_bounds = array<i64: 1, 1>}, {transform_indices = @transform_7, window_bounds = array<i64: 16, 32>}]} {
    %c0_i32 = arith.constant 0 : i32
    %0 = arith.cmpi eq, %arg2, %c0_i32 : i32
    %1 = arith.extui %0 : i1 to i32
    %c0_i32_0 = arith.constant 0 : i32
    %2 = arith.cmpi ne, %1, %c0_i32_0 : i32
    scf.if %2 {
      %cst_15 = arith.constant 0.000000e+00 : f32
      %20 = vector.broadcast %cst_15 : f32 to vector<16x32xf32>
      %c0_16 = arith.constant 0 : index
      %c0_17 = arith.constant 0 : index
      %21 = vector.load %arg11[%c0_16, %c0_17] : memref<16x32xf32, #tpu.memory_space<vmem>>, vector<16x32xf32>
      tpu.vector_store %arg11[%c0_16, %c0_17], %20 {strides = array<i32>} : memref<16x32xf32, #tpu.memory_space<vmem>>, vector<16x32xf32>,
    } else {
    }
    %c0 = arith.constant 0 : index
    %c0_1 = arith.constant 0 : index
    %3 = vector.load %arg11[%c0, %c0_1] : memref<16x32xf32, #tpu.memory_space<vmem>>, vector<16x32xf32>
    %c0_2 = arith.constant 0 : index
    %c0_3 = arith.constant 0 : index
    %c0_4 = arith.constant 0 : index
    %4 = vector.load %arg3[%c0_2, %c0_3, %c0_4] : memref<1x16x16xbf16, #tpu.memory_space<vmem>>, vector<1x16x16xbf16>
    %5 = vector.shape_cast %4 : vector<1x16x16xbf16> to vector<16x16xbf16>
    %c0_5 = arith.constant 0 : index
    %c0_6 = arith.constant 0 : index
    %6 = vector.load %arg4[%c0_5, %c0_6] : memref<16x32xbf16, #tpu.memory_space<vmem>>, vector<16x32xbf16>
    %cst = arith.constant dense<0.000000e+00> : vector<16x32xf32>
    %7 = tpu.matmul %5, %6, %cst {dimension_numbers = #tpu.dot_dimension_numbers<[1], [0], [0], [1], [0, 0, 1, 1], [], []>} : vector<16x16xbf16>, vector<16x32xbf16>, vector<16x32xf32> -> vector<16x32xf32>
    %8 = arith.addf %3, %7 : vector<16x32xf32>
    %c0_7 = arith.constant 0 : index
    %c0_8 = arith.constant 0 : index
    %9 = vector.load %arg11[%c0_7, %c0_8] : memref<16x32xf32, #tpu.memory_space<vmem>>, vector<16x32xf32>
    tpu.vector_store %arg11[%c0_7, %c0_8], %8 {strides = array<i32>} : memref<16x32xf32, #tpu.memory_space<vmem>>, vector<16x32xf32>,
    %c0_i32_9 = arith.constant 0 : i32
    %10 = arith.cmpi eq, %arg2, %c0_i32_9 : i32
    %c0_i32_10 = arith.constant 0 : i32
    %11 = arith.cmpi eq, %arg1, %c0_i32_10 : i32
    %12 = arith.andi %10, %11 : i1
    %13 = arith.extui %12 : i1 to i32
    %c0_i32_11 = arith.constant 0 : i32
    %14 = arith.cmpi ne, %13, %c0_i32_11 : i32
    scf.if %14 {
      %c0_15 = arith.constant 0 : index
      %c0_16 = arith.constant 0 : index
      %20 = vector.load %arg11[%c0_15, %c0_16] : memref<16x32xf32, #tpu.memory_space<vmem>>, vector<16x32xf32>
      %c0_17 = arith.constant 0 : index
      %c0_18 = arith.constant 0 : index
      %21 = vector.load %arg5[%c0_17, %c0_18] : memref<1x32xf32, #tpu.memory_space<vmem>>, vector<1x32xf32>
      %22 = vector.broadcast %21 : vector<1x32xf32> to vector<16x32xf32>
      %23 = arith.addf %20, %22 : vector<16x32xf32>
      %c0_19 = arith.constant 0 : index
      %c0_20 = arith.constant 0 : index
      %24 = vector.load %arg10[%c0_19, %c0_20] : memref<16x32xf32, #tpu.memory_space<vmem>>, vector<16x32xf32>
      tpu.vector_store %arg10[%c0_19, %c0_20], %23 {strides = array<i32>} : memref<16x32xf32, #tpu.memory_space<vmem>>, vector<16x32xf32>,
    } else {
    }
    %c0_i32_12 = arith.constant 0 : i32
    %15 = arith.cmpi eq, %arg2, %c0_i32_12 : i32
    %c0_i32_13 = arith.constant 0 : i32
    %16 = arith.cmpi sgt, %arg1, %c0_i32_13 : i32
    %17 = arith.andi %15, %16 : i1
    %18 = arith.extui %17 : i1 to i32
    %c0_i32_14 = arith.constant 0 : i32
    %19 = arith.cmpi ne, %18, %c0_i32_14 : i32
    scf.if %19 {
      %c0_15 = arith.constant 0 : index
      %c0_16 = arith.constant 0 : index
      %20 = vector.load %arg11[%c0_15, %c0_16] : memref<16x32xf32, #tpu.memory_space<vmem>>, vector<16x32xf32>
      %c0_17 = arith.constant 0 : index
      %c0_18 = arith.constant 0 : index
      %21 = vector.load %arg5[%c0_17, %c0_18] : memref<1x32xf32, #tpu.memory_space<vmem>>, vector<1x32xf32>
      %22 = vector.broadcast %21 : vector<1x32xf32> to vector<16x32xf32>
      %23 = arith.addf %20, %22 : vector<16x32xf32>
      %c0_19 = arith.constant 0 : index
      %c0_20 = arith.constant 0 : index
      %24 = vector.load %arg10[%c0_19, %c0_20] : memref<16x32xf32, #tpu.memory_space<vmem>>, vector<16x32xf32>
      %25 = arith.truncf %24 : vector<16x32xf32> to vector<16x32xbf16>
      %c0_21 = arith.constant 0 : index
      %c0_22 = arith.constant 0 : index
      %26 = vector.load %arg6[%c0_21, %c0_22] : memref<32x32xbf16, #tpu.memory_space<vmem>>, vector<32x32xbf16>
      %cst_23 = arith.constant dense<0.000000e+00> : vector<16x32xf32>
      %27 = tpu.matmul %25, %26, %cst_23 {dimension_numbers = #tpu.dot_dimension_numbers<[1], [0], [0], [1], [0, 0, 1, 1], [], []>} : vector<16x32xbf16>, vector<32x32xbf16>, vector<16x32xf32> -> vector<16x32xf32>
      %c0_24 = arith.constant 0 : index
      %c0_25 = arith.constant 0 : index
      %28 = vector.load %arg7[%c0_24, %c0_25] : memref<1x32xf32, #tpu.memory_space<vmem>>, vector<1x32xf32>
      %29 = vector.broadcast %28 : vector<1x32xf32> to vector<16x32xf32>
      %30 = arith.addf %27, %29 : vector<16x32xf32>
      %31 = math.tanh %30 : vector<16x32xf32>
      %32 = arith.truncf %23 : vector<16x32xf32> to vector<16x32xbf16>
      %c0_26 = arith.constant 0 : index
      %c0_27 = arith.constant 0 : index
      %33 = vector.load %arg6[%c0_26, %c0_27] : memref<32x32xbf16, #tpu.memory_space<vmem>>, vector<32x32xbf16>
      %cst_28 = arith.constant dense<0.000000e+00> : vector<16x32xf32>
      %34 = tpu.matmul %32, %33, %cst_28 {dimension_numbers = #tpu.dot_dimension_numbers<[1], [0], [0], [1], [0, 0, 1, 1], [], []>} : vector<16x32xbf16>, vector<32x32xbf16>, vector<16x32xf32> -> vector<16x32xf32>
      %c0_29 = arith.constant 0 : index
      %c0_30 = arith.constant 0 : index
      %35 = vector.load %arg7[%c0_29, %c0_30] : memref<1x32xf32, #tpu.memory_space<vmem>>, vector<1x32xf32>
      %36 = vector.broadcast %35 : vector<1x32xf32> to vector<16x32xf32>
      %37 = arith.addf %34, %36 : vector<16x32xf32>
      %38 = math.tanh %37 : vector<16x32xf32>
      %c0_31 = arith.constant 0 : index
      %c0_32 = arith.constant 0 : index
      %39 = vector.load %arg8[%c0_31, %c0_32] : memref<1x32xf32, #tpu.memory_space<vmem>>, vector<1x32xf32>
      %40 = vector.broadcast %39 : vector<1x32xf32> to vector<16x32xf32>
      %41 = arith.mulf %31, %40 : vector<16x32xf32>
      %cst_33 = arith.constant dense<0.000000e+00> : vector<16xf32>
      %42 = vector.multi_reduction <add>, %41, %cst_33 [1] : vector<16x32xf32> to vector<16xf32>
      %43 = vector.shape_cast %42 : vector<16xf32> to vector<16x1xf32>
      %c0_34 = arith.constant 0 : index
      %c0_35 = arith.constant 0 : index
      %44 = vector.load %arg9[%c0_34, %c0_35] : memref<1x1xf32, #tpu.memory_space<vmem>>, vector<1x1xf32>
      %45 = vector.broadcast %44 : vector<1x1xf32> to vector<16x1xf32>
      %46 = arith.addf %43, %45 : vector<16x1xf32>
      %c0_36 = arith.constant 0 : index
      %c0_37 = arith.constant 0 : index
      %47 = vector.load %arg8[%c0_36, %c0_37] : memref<1x32xf32, #tpu.memory_space<vmem>>, vector<1x32xf32>
      %48 = vector.broadcast %47 : vector<1x32xf32> to vector<16x32xf32>
      %49 = arith.mulf %38, %48 : vector<16x32xf32>
      %cst_38 = arith.constant dense<0.000000e+00> : vector<16xf32>
      %50 = vector.multi_reduction <add>, %49, %cst_38 [1] : vector<16x32xf32> to vector<16xf32>
      %51 = vector.shape_cast %50 : vector<16xf32> to vector<16x1xf32>
      %c0_39 = arith.constant 0 : index
      %c0_40 = arith.constant 0 : index
      %52 = vector.load %arg9[%c0_39, %c0_40] : memref<1x1xf32, #tpu.memory_space<vmem>>, vector<1x1xf32>
      %53 = vector.broadcast %52 : vector<1x1xf32> to vector<16x1xf32>
      %54 = arith.addf %51, %53 : vector<16x1xf32>
      %55 = arith.maximumf %46, %54 : vector<16x1xf32>
      %56 = arith.subf %46, %55 : vector<16x1xf32>
      %57 = math.exp %56 : vector<16x1xf32>
      %58 = arith.subf %54, %55 : vector<16x1xf32>
      %59 = math.exp %58 : vector<16x1xf32>
      %60 = arith.addf %57, %59 : vector<16x1xf32>
      %61 = tpu.reciprocal %60 {approx = true} : vector<16x1xf32> -> vector<16x1xf32>
      %62 = vector.broadcast %57 : vector<16x1xf32> to vector<16x32xf32>
      %63 = arith.mulf %62, %24 : vector<16x32xf32>
      %64 = vector.broadcast %59 : vector<16x1xf32> to vector<16x32xf32>
      %65 = arith.mulf %64, %23 : vector<16x32xf32>
      %66 = arith.addf %63, %65 : vector<16x32xf32>
      %67 = vector.broadcast %61 : vector<16x1xf32> to vector<16x32xf32>
      %68 = arith.mulf %66, %67 : vector<16x32xf32>
      %c0_41 = arith.constant 0 : index
      %c0_42 = arith.constant 0 : index
      %69 = vector.load %arg10[%c0_41, %c0_42] : memref<16x32xf32, #tpu.memory_space<vmem>>, vector<16x32xf32>
      tpu.vector_store %arg10[%c0_41, %c0_42], %68 {strides = array<i32>} : memref<16x32xf32, #tpu.memory_space<vmem>>, vector<16x32xf32>,
    } else {
    }
    return
  }
  func.func @transform_0(%arg0: i32, %arg1: i32, %arg2: i32) -> (i32, i32, i32) {
    %c0_i32 = arith.constant 0 : i32
    return %arg1, %arg0, %arg2 : i32, i32, i32
  }
  func.func @transform_1(%arg0: i32, %arg1: i32, %arg2: i32) -> (i32, i32) {
    %c0_i32 = arith.constant 0 : i32
    %c0_i32_0 = arith.constant 0 : i32
    return %arg2, %c0_i32 : i32, i32
  }
  func.func @transform_2(%arg0: i32, %arg1: i32, %arg2: i32) -> (i32, i32) {
    %c0_i32 = arith.constant 0 : i32
    %c0_i32_0 = arith.constant 0 : i32
    %c0_i32_1 = arith.constant 0 : i32
    return %c0_i32, %c0_i32_0 : i32, i32
  }
  func.func @transform_3(%arg0: i32, %arg1: i32, %arg2: i32) -> (i32, i32) {
    %c0_i32 = arith.constant 0 : i32
    %c0_i32_0 = arith.constant 0 : i32
    %c0_i32_1 = arith.constant 0 : i32
    return %c0_i32, %c0_i32_0 : i32, i32
  }
  func.func @transform_4(%arg0: i32, %arg1: i32, %arg2: i32) -> (i32, i32) {
    %c0_i32 = arith.constant 0 : i32
    %c0_i32_0 = arith.constant 0 : i32
    %c0_i32_1 = arith.constant 0 : i32
    return %c0_i32, %c0_i32_0 : i32, i32
  }
  func.func @transform_5(%arg0: i32, %arg1: i32, %arg2: i32) -> (i32, i32) {
    %c0_i32 = arith.constant 0 : i32
    %c0_i32_0 = arith.constant 0 : i32
    %c0_i32_1 = arith.constant 0 : i32
    return %c0_i32, %c0_i32_0 : i32, i32
  }
  func.func @transform_6(%arg0: i32, %arg1: i32, %arg2: i32) -> (i32, i32) {
    %c0_i32 = arith.constant 0 : i32
    %c0_i32_0 = arith.constant 0 : i32
    %c0_i32_1 = arith.constant 0 : i32
    return %c0_i32, %c0_i32_0 : i32, i32
  }
  func.func @transform_7(%arg0: i32, %arg1: i32, %arg2: i32) -> (i32, i32) {
    %c0_i32 = arith.constant 0 : i32
    %c0_i32_0 = arith.constant 0 : i32
    return %arg0, %c0_i32 : i32, i32
  }
}

module attributes {stable_mosaic.version = 11 : i64} {
  func.func @_xw_kernel(%arg0: i32, %arg1: memref<16x32xbf16, #tpu.memory_space<vmem>>, %arg2: memref<32x32xbf16, #tpu.memory_space<vmem>>, %arg3: memref<16x32xbf16, #tpu.memory_space<vmem>>) attributes {dimension_semantics = [#tpu.dimension_semantics<parallel>], iteration_bounds = array<i64: 1>, scalar_prefetch = 0 : i64, scratch_operands = 0 : i64, tpu.core_type = #tpu.core_type<tc>, window_params = [{transform_indices = @transform_0, window_bounds = array<i64: 16, 32>}, {pipeline_mode = #tpu.pipeline_mode<synchronous>, transform_indices = @transform_1, window_bounds = array<i64: 32, 32>}, {transform_indices = @transform_2, window_bounds = array<i64: 16, 32>}]} {
    %c0 = arith.constant 0 : index
    %c0_0 = arith.constant 0 : index
    %0 = vector.load %arg1[%c0, %c0_0] : memref<16x32xbf16, #tpu.memory_space<vmem>>, vector<16x32xbf16>
    %c0_1 = arith.constant 0 : index
    %c0_2 = arith.constant 0 : index
    %1 = vector.load %arg2[%c0_1, %c0_2] : memref<32x32xbf16, #tpu.memory_space<vmem>>, vector<32x32xbf16>
    %cst = arith.constant dense<0.000000e+00> : vector<16x32xf32>
    %2 = tpu.matmul %0, %1, %cst {dimension_numbers = #tpu.dot_dimension_numbers<[1], [0], [0], [1], [0, 0, 1, 1], [], []>} : vector<16x32xbf16>, vector<32x32xbf16>, vector<16x32xf32> -> vector<16x32xf32>
    %3 = arith.truncf %2 : vector<16x32xf32> to vector<16x32xbf16>
    %c0_3 = arith.constant 0 : index
    %c0_4 = arith.constant 0 : index
    %4 = vector.load %arg3[%c0_3, %c0_4] : memref<16x32xbf16, #tpu.memory_space<vmem>>, vector<16x32xbf16>
    tpu.vector_store %arg3[%c0_3, %c0_4], %3 {strides = array<i32>} : memref<16x32xbf16, #tpu.memory_space<vmem>>, vector<16x32xbf16>,
    return
  }
  func.func @transform_0(%arg0: i32) -> (i32, i32) {
    %c0_i32 = arith.constant 0 : i32
    %c0_i32_0 = arith.constant 0 : i32
    return %arg0, %c0_i32 : i32, i32
  }
  func.func @transform_1(%arg0: i32) -> (i32, i32) {
    %c0_i32 = arith.constant 0 : i32
    %c0_i32_0 = arith.constant 0 : i32
    %c0_i32_1 = arith.constant 0 : i32
    return %c0_i32, %c0_i32_0 : i32, i32
  }
  func.func @transform_2(%arg0: i32) -> (i32, i32) {
    %c0_i32 = arith.constant 0 : i32
    %c0_i32_0 = arith.constant 0 : i32
    return %arg0, %c0_i32 : i32, i32
  }
}

module attributes {stable_mosaic.version = 11 : i64} {
  func.func @kernel(%arg0: i32, %arg1: memref<1x64x32xbf16, #tpu.memory_space<vmem>>, %arg2: memref<1x64x32xbf16, #tpu.memory_space<vmem>>, %arg3: memref<32x1024xbf16, #tpu.memory_space<vmem>>, %arg4: memref<32x1024xbf16, #tpu.memory_space<vmem>>, %arg5: memref<1x1024xf32, #tpu.memory_space<vmem>>, %arg6: memref<1x1024xf32, #tpu.memory_space<vmem>>, %arg7: memref<128x512xbf16, #tpu.memory_space<vmem>>, %arg8: memref<128x512xbf16, #tpu.memory_space<vmem>>, %arg9: memref<128x512xbf16, #tpu.memory_space<vmem>>, %arg10: memref<1x64x128xf32, #tpu.memory_space<vmem>>, %arg11: memref<1x64x128xf32, #tpu.memory_space<vmem>>, %arg12: memref<1x64x128xf32, #tpu.memory_space<vmem>>, %arg13: memref<64x1024xf32, #tpu.memory_space<vmem>>, %arg14: memref<64x1024xf32, #tpu.memory_space<vmem>>) attributes {dimension_semantics = [#tpu.dimension_semantics<parallel>], iteration_bounds = array<i64: 1>, scalar_prefetch = 0 : i64, scratch_operands = 2 : i64, tpu.core_type = #tpu.core_type<tc>, window_params = [{transform_indices = @transform_0, window_bounds = array<i64: 1, 64, 32>}, {transform_indices = @transform_1, window_bounds = array<i64: 1, 64, 32>}, {pipeline_mode = #tpu.pipeline_mode<synchronous>, transform_indices = @transform_2, window_bounds = array<i64: 32, 1024>}, {pipeline_mode = #tpu.pipeline_mode<synchronous>, transform_indices = @transform_3, window_bounds = array<i64: 32, 1024>}, {pipeline_mode = #tpu.pipeline_mode<synchronous>, transform_indices = @transform_4, window_bounds = array<i64: 1, 1024>}, {pipeline_mode = #tpu.pipeline_mode<synchronous>, transform_indices = @transform_5, window_bounds = array<i64: 1, 1024>}, {pipeline_mode = #tpu.pipeline_mode<synchronous>, transform_indices = @transform_6, window_bounds = array<i64: 128, 512>}, {pipeline_mode = #tpu.pipeline_mode<synchronous>, transform_indices = @transform_7, window_bounds = array<i64: 128, 512>}, {pipeline_mode = #tpu.pipeline_mode<synchronous>, transform_indices = @transform_8, window_bounds = array<i64: 128, 512>}, {transform_indices = @transform_9, window_bounds = array<i64: 1, 64, 128>}, {transform_indices = @transform_10, window_bounds = array<i64: 1, 64, 128>}, {transform_indices = @transform_11, window_bounds = array<i64: 1, 64, 128>}]} {
    %c0 = arith.constant 0 : index
    %c0_0 = arith.constant 0 : index
    %c0_1 = arith.constant 0 : index
    %0 = vector.load %arg1[%c0, %c0_0, %c0_1] : memref<1x64x32xbf16, #tpu.memory_space<vmem>>, vector<1x64x32xbf16>
    %1 = vector.shape_cast %0 : vector<1x64x32xbf16> to vector<64x32xbf16>
    %c0_2 = arith.constant 0 : index
    %c0_3 = arith.constant 0 : index
    %2 = vector.load %arg3[%c0_2, %c0_3] : memref<32x1024xbf16, #tpu.memory_space<vmem>>, vector<32x1024xbf16>
    %cst = arith.constant dense<0.000000e+00> : vector<64x1024xf32>
    %3 = tpu.matmul %1, %2, %cst {dimension_numbers = #tpu.dot_dimension_numbers<[1], [0], [0], [1], [0, 0, 1, 1], [], []>} : vector<64x32xbf16>, vector<32x1024xbf16>, vector<64x1024xf32> -> vector<64x1024xf32>
    %c0_4 = arith.constant 0 : index
    %c0_5 = arith.constant 0 : index
    %4 = vector.load %arg5[%c0_4, %c0_5] : memref<1x1024xf32, #tpu.memory_space<vmem>>, vector<1x1024xf32>
    %5 = vector.broadcast %4 : vector<1x1024xf32> to vector<64x1024xf32>
    %6 = arith.addf %3, %5 : vector<64x1024xf32>
    %c0_6 = arith.constant 0 : index
    %c0_7 = arith.constant 0 : index
    %7 = vector.load %arg13[%c0_6, %c0_7] : memref<64x1024xf32, #tpu.memory_space<vmem>>, vector<64x1024xf32>
    tpu.vector_store %arg13[%c0_6, %c0_7], %6 {strides = array<i32>} : memref<64x1024xf32, #tpu.memory_space<vmem>>, vector<64x1024xf32>,
    %c0_8 = arith.constant 0 : index
    %c0_9 = arith.constant 0 : index
    %c0_10 = arith.constant 0 : index
    %8 = vector.load %arg2[%c0_8, %c0_9, %c0_10] : memref<1x64x32xbf16, #tpu.memory_space<vmem>>, vector<1x64x32xbf16>
    %9 = vector.shape_cast %8 : vector<1x64x32xbf16> to vector<64x32xbf16>
    %c0_11 = arith.constant 0 : index
    %c0_12 = arith.constant 0 : index
    %10 = vector.load %arg4[%c0_11, %c0_12] : memref<32x1024xbf16, #tpu.memory_space<vmem>>, vector<32x1024xbf16>
    %cst_13 = arith.constant dense<0.000000e+00> : vector<64x1024xf32>
    %11 = tpu.matmul %9, %10, %cst_13 {dimension_numbers = #tpu.dot_dimension_numbers<[1], [0], [0], [1], [0, 0, 1, 1], [], []>} : vector<64x32xbf16>, vector<32x1024xbf16>, vector<64x1024xf32> -> vector<64x1024xf32>
    %c0_14 = arith.constant 0 : index
    %c0_15 = arith.constant 0 : index
    %12 = vector.load %arg6[%c0_14, %c0_15] : memref<1x1024xf32, #tpu.memory_space<vmem>>, vector<1x1024xf32>
    %13 = vector.broadcast %12 : vector<1x1024xf32> to vector<64x1024xf32>
    %14 = arith.addf %11, %13 : vector<64x1024xf32>
    %c0_16 = arith.constant 0 : index
    %c0_17 = arith.constant 0 : index
    %15 = vector.load %arg14[%c0_16, %c0_17] : memref<64x1024xf32, #tpu.memory_space<vmem>>, vector<64x1024xf32>
    tpu.vector_store %arg14[%c0_16, %c0_17], %14 {strides = array<i32>} : memref<64x1024xf32, #tpu.memory_space<vmem>>, vector<64x1024xf32>,
    %cst_18 = arith.constant 0.000000e+00 : f32
    %16 = vector.broadcast %cst_18 : f32 to vector<8x128xf32>
    %c0_i32 = arith.constant 0 : i32
    %c8_i32 = arith.constant 8 : i32
    %17 = arith.addi %c0_i32, %c8_i32 : i32
    %c1_i32 = arith.constant 1 : i32
    %18:6 = scf.for %arg15 = %c0_i32 to %17 step %c1_i32 iter_args(%arg16 = %16, %arg17 = %16, %arg18 = %16, %arg19 = %16, %arg20 = %16, %arg21 = %16) -> (vector<8x128xf32>, vector<8x128xf32>, vector<8x128xf32>, vector<8x128xf32>, vector<8x128xf32>, vector<8x128xf32>)  : i32 {
      %c8_i32_20 = arith.constant 8 : i32
      %19 = arith.muli %arg15, %c8_i32_20 : i32
      %20 = tpu.assume_multiple %19, 8 : i32
      %21 = arith.index_cast %20 : i32 to index
      %c0_21 = arith.constant 0 : index
      %22 = vector.load %arg13[%21, %c0_21] : memref<64x1024xf32, #tpu.memory_space<vmem>>, vector<8x1024xf32>
      %23 = arith.index_cast %20 : i32 to index
      %c0_22 = arith.constant 0 : index
      %24 = vector.load %arg14[%23, %c0_22] : memref<64x1024xf32, #tpu.memory_space<vmem>>, vector<8x1024xf32>
      %25 = vector.extract_strided_slice %24 {offsets = [0, 0], sizes = [8, 512], strides = [1, 1]} : vector<8x1024xf32> to vector<8x512xf32>
      %26 = arith.truncf %arg16 : vector<8x128xf32> to vector<8x128xbf16>
      %c0_23 = arith.constant 0 : index
      %c0_24 = arith.constant 0 : index
      %27 = vector.load %arg7[%c0_23, %c0_24] : memref<128x512xbf16, #tpu.memory_space<vmem>>, vector<128x512xbf16>
      %cst_25 = arith.constant dense<0.000000e+00> : vector<8x512xf32>
      %28 = tpu.matmul %26, %27, %cst_25 {dimension_numbers = #tpu.dot_dimension_numbers<[1], [0], [0], [1], [0, 0, 1, 1], [], []>} : vector<8x128xbf16>, vector<128x512xbf16>, vector<8x512xf32> -> vector<8x512xf32>
      %29 = arith.addf %25, %28 : vector<8x512xf32>
      %30 = vector.extract_strided_slice %29 {offsets = [0, 0], sizes = [8, 128], strides = [1, 1]} : vector<8x512xf32> to vector<8x128xf32>
      %31 = arith.negf %30 : vector<8x128xf32>
      %32 = math.exp %31 : vector<8x128xf32>
      %cst_26 = arith.constant 1.000000e+00 : f32
      %33 = vector.broadcast %cst_26 : f32 to vector<8x128xf32>
      %34 = arith.addf %33, %32 : vector<8x128xf32>
      %35 = arith.divf %33, %34 : vector<8x128xf32>
      %36 = vector.extract_strided_slice %29 {offsets = [0, 128], sizes = [8, 128], strides = [1, 1]} : vector<8x512xf32> to vector<8x128xf32>
      %37 = arith.negf %36 : vector<8x128xf32>
      %38 = math.exp %37 : vector<8x128xf32>
      %cst_27 = arith.constant 1.000000e+00 : f32
      %39 = vector.broadcast %cst_27 : f32 to vector<8x128xf32>
      %40 = arith.addf %39, %38 : vector<8x128xf32>
      %41 = arith.divf %39, %40 : vector<8x128xf32>
      %42 = vector.extract_strided_slice %29 {offsets = [0, 256], sizes = [8, 128], strides = [1, 1]} : vector<8x512xf32> to vector<8x128xf32>
      %43 = math.tanh %42 : vector<8x128xf32>
      %44 = vector.extract_strided_slice %29 {offsets = [0, 384], sizes = [8, 128], strides = [1, 1]} : vector<8x512xf32> to vector<8x128xf32>
      %45 = arith.negf %44 : vector<8x128xf32>
      %46 = math.exp %45 : vector<8x128xf32>
      %cst_28 = arith.constant 1.000000e+00 : f32
      %47 = vector.broadcast %cst_28 : f32 to vector<8x128xf32>
      %48 = arith.addf %47, %46 : vector<8x128xf32>
      %49 = arith.divf %47, %48 : vector<8x128xf32>
      %50 = arith.mulf %41, %arg17 : vector<8x128xf32>
      %51 = arith.mulf %35, %43 : vector<8x128xf32>
      %52 = arith.addf %50, %51 : vector<8x128xf32>
      %53 = math.tanh %52 : vector<8x128xf32>
      %54 = arith.mulf %49, %53 : vector<8x128xf32>
      %55 = vector.extract_strided_slice %22 {offsets = [0, 0], sizes = [8, 512], strides = [1, 1]} : vector<8x1024xf32> to vector<8x512xf32>
      %56 = arith.truncf %arg18 : vector<8x128xf32> to vector<8x128xbf16>
      %c0_29 = arith.constant 0 : index
      %c0_30 = arith.constant 0 : index
      %57 = vector.load %arg8[%c0_29, %c0_30] : memref<128x512xbf16, #tpu.memory_space<vmem>>, vector<128x512xbf16>
      %cst_31 = arith.constant dense<0.000000e+00> : vector<8x512xf32>
      %58 = tpu.matmul %56, %57, %cst_31 {dimension_numbers = #tpu.dot_dimension_numbers<[1], [0], [0], [1], [0, 0, 1, 1], [], []>} : vector<8x128xbf16>, vector<128x512xbf16>, vector<8x512xf32> -> vector<8x512xf32>
      %59 = arith.addf %55, %58 : vector<8x512xf32>
      %60 = vector.extract_strided_slice %59 {offsets = [0, 0], sizes = [8, 128], strides = [1, 1]} : vector<8x512xf32> to vector<8x128xf32>
      %61 = arith.negf %60 : vector<8x128xf32>
      %62 = math.exp %61 : vector<8x128xf32>
      %cst_32 = arith.constant 1.000000e+00 : f32
      %63 = vector.broadcast %cst_32 : f32 to vector<8x128xf32>
      %64 = arith.addf %63, %62 : vector<8x128xf32>
      %65 = arith.divf %63, %64 : vector<8x128xf32>
      %66 = vector.extract_strided_slice %59 {offsets = [0, 128], sizes = [8, 128], strides = [1, 1]} : vector<8x512xf32> to vector<8x128xf32>
      %67 = arith.negf %66 : vector<8x128xf32>
      %68 = math.exp %67 : vector<8x128xf32>
      %cst_33 = arith.constant 1.000000e+00 : f32
      %69 = vector.broadcast %cst_33 : f32 to vector<8x128xf32>
      %70 = arith.addf %69, %68 : vector<8x128xf32>
      %71 = arith.divf %69, %70 : vector<8x128xf32>
      %72 = vector.extract_strided_slice %59 {offsets = [0, 256], sizes = [8, 128], strides = [1, 1]} : vector<8x512xf32> to vector<8x128xf32>
      %73 = math.tanh %72 : vector<8x128xf32>
      %74 = vector.extract_strided_slice %59 {offsets = [0, 384], sizes = [8, 128], strides = [1, 1]} : vector<8x512xf32> to vector<8x128xf32>
      %75 = arith.negf %74 : vector<8x128xf32>
      %76 = math.exp %75 : vector<8x128xf32>
      %cst_34 = arith.constant 1.000000e+00 : f32
      %77 = vector.broadcast %cst_34 : f32 to vector<8x128xf32>
      %78 = arith.addf %77, %76 : vector<8x128xf32>
      %79 = arith.divf %77, %78 : vector<8x128xf32>
      %80 = arith.mulf %71, %arg19 : vector<8x128xf32>
      %81 = arith.mulf %65, %73 : vector<8x128xf32>
      %82 = arith.addf %80, %81 : vector<8x128xf32>
      %83 = math.tanh %82 : vector<8x128xf32>
      %84 = arith.mulf %79, %83 : vector<8x128xf32>
      %85 = vector.extract_strided_slice %22 {offsets = [0, 512], sizes = [8, 512], strides = [1, 1]} : vector<8x1024xf32> to vector<8x512xf32>
      %86 = vector.extract_strided_slice %24 {offsets = [0, 512], sizes = [8, 512], strides = [1, 1]} : vector<8x1024xf32> to vector<8x512xf32>
      %87 = arith.addf %85, %86 : vector<8x512xf32>
      %88 = arith.truncf %arg20 : vector<8x128xf32> to vector<8x128xbf16>
      %c0_35 = arith.constant 0 : index
      %c0_36 = arith.constant 0 : index
      %89 = vector.load %arg9[%c0_35, %c0_36] : memref<128x512xbf16, #tpu.memory_space<vmem>>, vector<128x512xbf16>
      %cst_37 = arith.constant dense<0.000000e+00> : vector<8x512xf32>
      %90 = tpu.matmul %88, %89, %cst_37 {dimension_numbers = #tpu.dot_dimension_numbers<[1], [0], [0], [1], [0, 0, 1, 1], [], []>} : vector<8x128xbf16>, vector<128x512xbf16>, vector<8x512xf32> -> vector<8x512xf32>
      %91 = arith.addf %87, %90 : vector<8x512xf32>
      %92 = vector.extract_strided_slice %91 {offsets = [0, 0], sizes = [8, 128], strides = [1, 1]} : vector<8x512xf32> to vector<8x128xf32>
      %93 = arith.negf %92 : vector<8x128xf32>
      %94 = math.exp %93 : vector<8x128xf32>
      %cst_38 = arith.constant 1.000000e+00 : f32
      %95 = vector.broadcast %cst_38 : f32 to vector<8x128xf32>
      %96 = arith.addf %95, %94 : vector<8x128xf32>
      %97 = arith.divf %95, %96 : vector<8x128xf32>
      %98 = vector.extract_strided_slice %91 {offsets = [0, 128], sizes = [8, 128], strides = [1, 1]} : vector<8x512xf32> to vector<8x128xf32>
      %99 = arith.negf %98 : vector<8x128xf32>
      %100 = math.exp %99 : vector<8x128xf32>
      %cst_39 = arith.constant 1.000000e+00 : f32
      %101 = vector.broadcast %cst_39 : f32 to vector<8x128xf32>
      %102 = arith.addf %101, %100 : vector<8x128xf32>
      %103 = arith.divf %101, %102 : vector<8x128xf32>
      %104 = vector.extract_strided_slice %91 {offsets = [0, 256], sizes = [8, 128], strides = [1, 1]} : vector<8x512xf32> to vector<8x128xf32>
      %105 = math.tanh %104 : vector<8x128xf32>
      %106 = vector.extract_strided_slice %91 {offsets = [0, 384], sizes = [8, 128], strides = [1, 1]} : vector<8x512xf32> to vector<8x128xf32>
      %107 = arith.negf %106 : vector<8x128xf32>
      %108 = math.exp %107 : vector<8x128xf32>
      %cst_40 = arith.constant 1.000000e+00 : f32
      %109 = vector.broadcast %cst_40 : f32 to vector<8x128xf32>
      %110 = arith.addf %109, %108 : vector<8x128xf32>
      %111 = arith.divf %109, %110 : vector<8x128xf32>
      %112 = arith.mulf %103, %arg21 : vector<8x128xf32>
      %113 = arith.mulf %97, %105 : vector<8x128xf32>
      %114 = arith.addf %112, %113 : vector<8x128xf32>
      %115 = math.tanh %114 : vector<8x128xf32>
      %116 = arith.mulf %111, %115 : vector<8x128xf32>
      %c0_41 = arith.constant 0 : index
      %117 = arith.index_cast %20 : i32 to index
      %c0_42 = arith.constant 0 : index
      %118 = vector.load %arg10[%c0_41, %117, %c0_42] : memref<1x64x128xf32, #tpu.memory_space<vmem>>, vector<1x8x128xf32>
      %119 = vector.shape_cast %118 : vector<1x8x128xf32> to vector<8x128xf32>
      %120 = vector.shape_cast %54 : vector<8x128xf32> to vector<1x8x128xf32>
      tpu.vector_store %arg10[%c0_41, %117, %c0_42], %120 {strides = array<i32>} : memref<1x64x128xf32, #tpu.memory_space<vmem>>, vector<1x8x128xf32>,
      %c0_43 = arith.constant 0 : index
      %121 = arith.index_cast %20 : i32 to index
      %c0_44 = arith.constant 0 : index
      %122 = vector.load %arg11[%c0_43, %121, %c0_44] : memref<1x64x128xf32, #tpu.memory_space<vmem>>, vector<1x8x128xf32>
      %123 = vector.shape_cast %122 : vector<1x8x128xf32> to vector<8x128xf32>
      %124 = vector.shape_cast %84 : vector<8x128xf32> to vector<1x8x128xf32>
      tpu.vector_store %arg11[%c0_43, %121, %c0_44], %124 {strides = array<i32>} : memref<1x64x128xf32, #tpu.memory_space<vmem>>, vector<1x8x128xf32>,
      %c0_45 = arith.constant 0 : index
      %125 = arith.index_cast %20 : i32 to index
      %c0_46 = arith.constant 0 : index
      %126 = vector.load %arg12[%c0_45, %125, %c0_46] : memref<1x64x128xf32, #tpu.memory_space<vmem>>, vector<1x8x128xf32>
      %127 = vector.shape_cast %126 : vector<1x8x128xf32> to vector<8x128xf32>
      %128 = vector.shape_cast %116 : vector<8x128xf32> to vector<1x8x128xf32>
      tpu.vector_store %arg12[%c0_45, %125, %c0_46], %128 {strides = array<i32>} : memref<1x64x128xf32, #tpu.memory_space<vmem>>, vector<1x8x128xf32>,
      scf.yield %54, %52, %84, %82, %116, %114 : vector<8x128xf32>, vector<8x128xf32>, vector<8x128xf32>, vector<8x128xf32>, vector<8x128xf32>, vector<8x128xf32>
    }
    %c8_i32_19 = arith.constant 8 : i32
    return
  }
  func.func @transform_0(%arg0: i32) -> (i32, i32, i32) {
    %c0_i32 = arith.constant 0 : i32
    %c0_i32_0 = arith.constant 0 : i32
    %c0_i32_1 = arith.constant 0 : i32
    return %arg0, %c0_i32, %c0_i32_0 : i32, i32, i32
  }
  func.func @transform_1(%arg0: i32) -> (i32, i32, i32) {
    %c0_i32 = arith.constant 0 : i32
    %c0_i32_0 = arith.constant 0 : i32
    %c0_i32_1 = arith.constant 0 : i32
    return %arg0, %c0_i32, %c0_i32_0 : i32, i32, i32
  }
  func.func @transform_2(%arg0: i32) -> (i32, i32) {
    %c0_i32 = arith.constant 0 : i32
    %c0_i32_0 = arith.constant 0 : i32
    %c0_i32_1 = arith.constant 0 : i32
    return %c0_i32, %c0_i32_0 : i32, i32
  }
  func.func @transform_3(%arg0: i32) -> (i32, i32) {
    %c0_i32 = arith.constant 0 : i32
    %c0_i32_0 = arith.constant 0 : i32
    %c0_i32_1 = arith.constant 0 : i32
    return %c0_i32, %c0_i32_0 : i32, i32
  }
  func.func @transform_4(%arg0: i32) -> (i32, i32) {
    %c0_i32 = arith.constant 0 : i32
    %c0_i32_0 = arith.constant 0 : i32
    %c0_i32_1 = arith.constant 0 : i32
    return %c0_i32, %c0_i32_0 : i32, i32
  }
  func.func @transform_5(%arg0: i32) -> (i32, i32) {
    %c0_i32 = arith.constant 0 : i32
    %c0_i32_0 = arith.constant 0 : i32
    %c0_i32_1 = arith.constant 0 : i32
    return %c0_i32, %c0_i32_0 : i32, i32
  }
  func.func @transform_6(%arg0: i32) -> (i32, i32) {
    %c0_i32 = arith.constant 0 : i32
    %c0_i32_0 = arith.constant 0 : i32
    %c0_i32_1 = arith.constant 0 : i32
    return %c0_i32, %c0_i32_0 : i32, i32
  }
  func.func @transform_7(%arg0: i32) -> (i32, i32) {
    %c0_i32 = arith.constant 0 : i32
    %c0_i32_0 = arith.constant 0 : i32
    %c0_i32_1 = arith.constant 0 : i32
    return %c0_i32, %c0_i32_0 : i32, i32
  }
  func.func @transform_8(%arg0: i32) -> (i32, i32) {
    %c0_i32 = arith.constant 0 : i32
    %c0_i32_0 = arith.constant 0 : i32
    %c0_i32_1 = arith.constant 0 : i32
    return %c0_i32, %c0_i32_0 : i32, i32
  }
  func.func @transform_9(%arg0: i32) -> (i32, i32, i32) {
    %c0_i32 = arith.constant 0 : i32
    %c0_i32_0 = arith.constant 0 : i32
    %c0_i32_1 = arith.constant 0 : i32
    return %arg0, %c0_i32, %c0_i32_0 : i32, i32, i32
  }
  func.func @transform_10(%arg0: i32) -> (i32, i32, i32) {
    %c0_i32 = arith.constant 0 : i32
    %c0_i32_0 = arith.constant 0 : i32
    %c0_i32_1 = arith.constant 0 : i32
    return %arg0, %c0_i32, %c0_i32_0 : i32, i32, i32
  }
  func.func @transform_11(%arg0: i32) -> (i32, i32, i32) {
    %c0_i32 = arith.constant 0 : i32
    %c0_i32_0 = arith.constant 0 : i32
    %c0_i32_1 = arith.constant 0 : i32
    return %arg0, %c0_i32, %c0_i32_0 : i32, i32, i32
  }
}

module attributes {stable_mosaic.version = 11 : i64} {
  func.func @_mlp2_kernel(%arg0: i32, %arg1: i32, %arg2: memref<8x32xbf16, #tpu.memory_space<vmem>>, %arg3: memref<8x32xbf16, #tpu.memory_space<vmem>>, %arg4: memref<32x128xbf16, #tpu.memory_space<vmem>>, %arg5: memref<32x128xbf16, #tpu.memory_space<vmem>>, %arg6: memref<1x128xf32, #tpu.memory_space<vmem>>, %arg7: memref<128x128xbf16, #tpu.memory_space<vmem>>, %arg8: memref<1x128xf32, #tpu.memory_space<vmem>>, %arg9: memref<128x128xbf16, #tpu.memory_space<vmem>>, %arg10: memref<1x128xf32, #tpu.memory_space<vmem>>, %arg11: memref<8x128xf32, #tpu.memory_space<vmem>>, %arg12: memref<8x128xbf16, #tpu.memory_space<vmem>>) attributes {dimension_semantics = [#tpu.dimension_semantics<parallel>, #tpu.dimension_semantics<arbitrary>], iteration_bounds = array<i64: 1, 1>, scalar_prefetch = 0 : i64, scratch_operands = 1 : i64, tpu.core_type = #tpu.core_type<tc>, window_params = [{transform_indices = @transform_0, window_bounds = array<i64: 8, 32>}, {transform_indices = @transform_1, window_bounds = array<i64: 8, 32>}, {pipeline_mode = #tpu.pipeline_mode<synchronous>, transform_indices = @transform_2, window_bounds = array<i64: 32, 128>}, {pipeline_mode = #tpu.pipeline_mode<synchronous>, transform_indices = @transform_3, window_bounds = array<i64: 32, 128>}, {pipeline_mode = #tpu.pipeline_mode<synchronous>, transform_indices = @transform_4, window_bounds = array<i64: 1, 128>}, {pipeline_mode = #tpu.pipeline_mode<synchronous>, transform_indices = @transform_5, window_bounds = array<i64: 128, 128>}, {pipeline_mode = #tpu.pipeline_mode<synchronous>, transform_indices = @transform_6, window_bounds = array<i64: 1, 128>}, {transform_indices = @transform_7, window_bounds = array<i64: 128, 128>}, {transform_indices = @transform_8, window_bounds = array<i64: 1, 128>}, {transform_indices = @transform_9, window_bounds = array<i64: 8, 128>}]} {
    %c0_i32 = arith.constant 0 : i32
    %0 = arith.cmpi eq, %arg1, %c0_i32 : i32
    %1 = arith.extui %0 : i1 to i32
    %c0_i32_0 = arith.constant 0 : i32
    %2 = arith.cmpi ne, %1, %c0_i32_0 : i32
    scf.if %2 {
      %c0_8 = arith.constant 0 : index
      %c0_9 = arith.constant 0 : index
      %10 = vector.load %arg2[%c0_8, %c0_9] : memref<8x32xbf16, #tpu.memory_space<vmem>>, vector<8x32xbf16>
      %c0_10 = arith.constant 0 : index
      %c0_11 = arith.constant 0 : index
      %11 = vector.load %arg4[%c0_10, %c0_11] : memref<32x128xbf16, #tpu.memory_space<vmem>>, vector<32x128xbf16>
      %cst_12 = arith.constant dense<0.000000e+00> : vector<8x128xf32>
      %12 = tpu.matmul %10, %11, %cst_12 {dimension_numbers = #tpu.dot_dimension_numbers<[1], [0], [0], [1], [0, 0, 1, 1], [], []>} : vector<8x32xbf16>, vector<32x128xbf16>, vector<8x128xf32> -> vector<8x128xf32>
      %c0_13 = arith.constant 0 : index
      %c0_14 = arith.constant 0 : index
      %13 = vector.load %arg3[%c0_13, %c0_14] : memref<8x32xbf16, #tpu.memory_space<vmem>>, vector<8x32xbf16>
      %c0_15 = arith.constant 0 : index
      %c0_16 = arith.constant 0 : index
      %14 = vector.load %arg5[%c0_15, %c0_16] : memref<32x128xbf16, #tpu.memory_space<vmem>>, vector<32x128xbf16>
      %cst_17 = arith.constant dense<0.000000e+00> : vector<8x128xf32>
      %15 = tpu.matmul %13, %14, %cst_17 {dimension_numbers = #tpu.dot_dimension_numbers<[1], [0], [0], [1], [0, 0, 1, 1], [], []>} : vector<8x32xbf16>, vector<32x128xbf16>, vector<8x128xf32> -> vector<8x128xf32>
      %16 = arith.addf %12, %15 : vector<8x128xf32>
      %c0_18 = arith.constant 0 : index
      %c0_19 = arith.constant 0 : index
      %17 = vector.load %arg6[%c0_18, %c0_19] : memref<1x128xf32, #tpu.memory_space<vmem>>, vector<1x128xf32>
      %18 = vector.broadcast %17 : vector<1x128xf32> to vector<8x128xf32>
      %19 = arith.addf %16, %18 : vector<8x128xf32>
      %cst_20 = arith.constant 0.000000e+00 : f32
      %20 = vector.broadcast %cst_20 : f32 to vector<8x128xf32>
      %21 = arith.maximumf %19, %20 : vector<8x128xf32>
      %22 = arith.truncf %21 : vector<8x128xf32> to vector<8x128xbf16>
      %c0_21 = arith.constant 0 : index
      %c0_22 = arith.constant 0 : index
      %23 = vector.load %arg7[%c0_21, %c0_22] : memref<128x128xbf16, #tpu.memory_space<vmem>>, vector<128x128xbf16>
      %cst_23 = arith.constant dense<0.000000e+00> : vector<8x128xf32>
      %24 = tpu.matmul %22, %23, %cst_23 {dimension_numbers = #tpu.dot_dimension_numbers<[1], [0], [0], [1], [0, 0, 1, 1], [], []>} : vector<8x128xbf16>, vector<128x128xbf16>, vector<8x128xf32> -> vector<8x128xf32>
      %c0_24 = arith.constant 0 : index
      %c0_25 = arith.constant 0 : index
      %25 = vector.load %arg8[%c0_24, %c0_25] : memref<1x128xf32, #tpu.memory_space<vmem>>, vector<1x128xf32>
      %26 = vector.broadcast %25 : vector<1x128xf32> to vector<8x128xf32>
      %27 = arith.addf %24, %26 : vector<8x128xf32>
      %cst_26 = arith.constant 0.000000e+00 : f32
      %28 = vector.broadcast %cst_26 : f32 to vector<8x128xf32>
      %29 = arith.maximumf %27, %28 : vector<8x128xf32>
      %30 = arith.truncf %29 : vector<8x128xf32> to vector<8x128xbf16>
      %c0_27 = arith.constant 0 : index
      %c0_28 = arith.constant 0 : index
      %31 = vector.load %arg12[%c0_27, %c0_28] : memref<8x128xbf16, #tpu.memory_space<vmem>>, vector<8x128xbf16>
      tpu.vector_store %arg12[%c0_27, %c0_28], %30 {strides = array<i32>} : memref<8x128xbf16, #tpu.memory_space<vmem>>, vector<8x128xbf16>,
    } else {
    }
    %c0 = arith.constant 0 : index
    %c0_1 = arith.constant 0 : index
    %3 = vector.load %arg12[%c0, %c0_1] : memref<8x128xbf16, #tpu.memory_space<vmem>>, vector<8x128xbf16>
    %c0_2 = arith.constant 0 : index
    %c0_3 = arith.constant 0 : index
    %4 = vector.load %arg9[%c0_2, %c0_3] : memref<128x128xbf16, #tpu.memory_space<vmem>>, vector<128x128xbf16>
    %cst = arith.constant dense<0.000000e+00> : vector<8x128xf32>
    %5 = tpu.matmul %3, %4, %cst {dimension_numbers = #tpu.dot_dimension_numbers<[1], [0], [0], [1], [0, 0, 1, 1], [], []>} : vector<8x128xbf16>, vector<128x128xbf16>, vector<8x128xf32> -> vector<8x128xf32>
    %c0_4 = arith.constant 0 : index
    %c0_5 = arith.constant 0 : index
    %6 = vector.load %arg10[%c0_4, %c0_5] : memref<1x128xf32, #tpu.memory_space<vmem>>, vector<1x128xf32>
    %7 = vector.broadcast %6 : vector<1x128xf32> to vector<8x128xf32>
    %8 = arith.addf %5, %7 : vector<8x128xf32>
    %c0_6 = arith.constant 0 : index
    %c0_7 = arith.constant 0 : index
    %9 = vector.load %arg11[%c0_6, %c0_7] : memref<8x128xf32, #tpu.memory_space<vmem>>, vector<8x128xf32>
    tpu.vector_store %arg11[%c0_6, %c0_7], %8 {strides = array<i32>} : memref<8x128xf32, #tpu.memory_space<vmem>>, vector<8x128xf32>,
    return
  }
  func.func @transform_0(%arg0: i32, %arg1: i32) -> (i32, i32) {
    %c0_i32 = arith.constant 0 : i32
    %c0_i32_0 = arith.constant 0 : i32
    return %arg0, %c0_i32 : i32, i32
  }
  func.func @transform_1(%arg0: i32, %arg1: i32) -> (i32, i32) {
    %c0_i32 = arith.constant 0 : i32
    %c0_i32_0 = arith.constant 0 : i32
    return %arg0, %c0_i32 : i32, i32
  }
  func.func @transform_2(%arg0: i32, %arg1: i32) -> (i32, i32) {
    %c0_i32 = arith.constant 0 : i32
    %c0_i32_0 = arith.constant 0 : i32
    %c0_i32_1 = arith.constant 0 : i32
    return %c0_i32, %c0_i32_0 : i32, i32
  }
  func.func @transform_3(%arg0: i32, %arg1: i32) -> (i32, i32) {
    %c0_i32 = arith.constant 0 : i32
    %c0_i32_0 = arith.constant 0 : i32
    %c0_i32_1 = arith.constant 0 : i32
    return %c0_i32, %c0_i32_0 : i32, i32
  }
  func.func @transform_4(%arg0: i32, %arg1: i32) -> (i32, i32) {
    %c0_i32 = arith.constant 0 : i32
    %c0_i32_0 = arith.constant 0 : i32
    %c0_i32_1 = arith.constant 0 : i32
    return %c0_i32, %c0_i32_0 : i32, i32
  }
  func.func @transform_5(%arg0: i32, %arg1: i32) -> (i32, i32) {
    %c0_i32 = arith.constant 0 : i32
    %c0_i32_0 = arith.constant 0 : i32
    %c0_i32_1 = arith.constant 0 : i32
    return %c0_i32, %c0_i32_0 : i32, i32
  }
  func.func @transform_6(%arg0: i32, %arg1: i32) -> (i32, i32) {
    %c0_i32 = arith.constant 0 : i32
    %c0_i32_0 = arith.constant 0 : i32
    %c0_i32_1 = arith.constant 0 : i32
    return %c0_i32, %c0_i32_0 : i32, i32
  }
  func.func @transform_7(%arg0: i32, %arg1: i32) -> (i32, i32) {
    %c0_i32 = arith.constant 0 : i32
    %c0_i32_0 = arith.constant 0 : i32
    return %c0_i32, %arg1 : i32, i32
  }
  func.func @transform_8(%arg0: i32, %arg1: i32) -> (i32, i32) {
    %c0_i32 = arith.constant 0 : i32
    %c0_i32_0 = arith.constant 0 : i32
    return %c0_i32, %arg1 : i32, i32
  }
  func.func @transform_9(%arg0: i32, %arg1: i32) -> (i32, i32) {
    %c0_i32 = arith.constant 0 : i32
    return %arg0, %arg1 : i32, i32
  }
}

module attributes {stable_mosaic.version = 11 : i64} {
  func.func @_mlp2_kernel(%arg0: i32, %arg1: i32, %arg2: memref<16x32xbf16, #tpu.memory_space<vmem>>, %arg3: memref<16x32xbf16, #tpu.memory_space<vmem>>, %arg4: memref<32x128xbf16, #tpu.memory_space<vmem>>, %arg5: memref<32x128xbf16, #tpu.memory_space<vmem>>, %arg6: memref<1x128xf32, #tpu.memory_space<vmem>>, %arg7: memref<128x128xbf16, #tpu.memory_space<vmem>>, %arg8: memref<1x128xf32, #tpu.memory_space<vmem>>, %arg9: memref<128x128xbf16, #tpu.memory_space<vmem>>, %arg10: memref<1x128xf32, #tpu.memory_space<vmem>>, %arg11: memref<16x128xf32, #tpu.memory_space<vmem>>, %arg12: memref<16x128xbf16, #tpu.memory_space<vmem>>) attributes {dimension_semantics = [#tpu.dimension_semantics<parallel>, #tpu.dimension_semantics<arbitrary>], iteration_bounds = array<i64: 1, 1>, scalar_prefetch = 0 : i64, scratch_operands = 1 : i64, tpu.core_type = #tpu.core_type<tc>, window_params = [{transform_indices = @transform_0, window_bounds = array<i64: 16, 32>}, {transform_indices = @transform_1, window_bounds = array<i64: 16, 32>}, {pipeline_mode = #tpu.pipeline_mode<synchronous>, transform_indices = @transform_2, window_bounds = array<i64: 32, 128>}, {pipeline_mode = #tpu.pipeline_mode<synchronous>, transform_indices = @transform_3, window_bounds = array<i64: 32, 128>}, {pipeline_mode = #tpu.pipeline_mode<synchronous>, transform_indices = @transform_4, window_bounds = array<i64: 1, 128>}, {pipeline_mode = #tpu.pipeline_mode<synchronous>, transform_indices = @transform_5, window_bounds = array<i64: 128, 128>}, {pipeline_mode = #tpu.pipeline_mode<synchronous>, transform_indices = @transform_6, window_bounds = array<i64: 1, 128>}, {transform_indices = @transform_7, window_bounds = array<i64: 128, 128>}, {transform_indices = @transform_8, window_bounds = array<i64: 1, 128>}, {transform_indices = @transform_9, window_bounds = array<i64: 16, 128>}]} {
    %c0_i32 = arith.constant 0 : i32
    %0 = arith.cmpi eq, %arg1, %c0_i32 : i32
    %1 = arith.extui %0 : i1 to i32
    %c0_i32_0 = arith.constant 0 : i32
    %2 = arith.cmpi ne, %1, %c0_i32_0 : i32
    scf.if %2 {
      %c0_8 = arith.constant 0 : index
      %c0_9 = arith.constant 0 : index
      %10 = vector.load %arg2[%c0_8, %c0_9] : memref<16x32xbf16, #tpu.memory_space<vmem>>, vector<16x32xbf16>
      %c0_10 = arith.constant 0 : index
      %c0_11 = arith.constant 0 : index
      %11 = vector.load %arg4[%c0_10, %c0_11] : memref<32x128xbf16, #tpu.memory_space<vmem>>, vector<32x128xbf16>
      %cst_12 = arith.constant dense<0.000000e+00> : vector<16x128xf32>
      %12 = tpu.matmul %10, %11, %cst_12 {dimension_numbers = #tpu.dot_dimension_numbers<[1], [0], [0], [1], [0, 0, 1, 1], [], []>} : vector<16x32xbf16>, vector<32x128xbf16>, vector<16x128xf32> -> vector<16x128xf32>
      %c0_13 = arith.constant 0 : index
      %c0_14 = arith.constant 0 : index
      %13 = vector.load %arg3[%c0_13, %c0_14] : memref<16x32xbf16, #tpu.memory_space<vmem>>, vector<16x32xbf16>
      %c0_15 = arith.constant 0 : index
      %c0_16 = arith.constant 0 : index
      %14 = vector.load %arg5[%c0_15, %c0_16] : memref<32x128xbf16, #tpu.memory_space<vmem>>, vector<32x128xbf16>
      %cst_17 = arith.constant dense<0.000000e+00> : vector<16x128xf32>
      %15 = tpu.matmul %13, %14, %cst_17 {dimension_numbers = #tpu.dot_dimension_numbers<[1], [0], [0], [1], [0, 0, 1, 1], [], []>} : vector<16x32xbf16>, vector<32x128xbf16>, vector<16x128xf32> -> vector<16x128xf32>
      %16 = arith.addf %12, %15 : vector<16x128xf32>
      %c0_18 = arith.constant 0 : index
      %c0_19 = arith.constant 0 : index
      %17 = vector.load %arg6[%c0_18, %c0_19] : memref<1x128xf32, #tpu.memory_space<vmem>>, vector<1x128xf32>
      %18 = vector.broadcast %17 : vector<1x128xf32> to vector<16x128xf32>
      %19 = arith.addf %16, %18 : vector<16x128xf32>
      %cst_20 = arith.constant 0.000000e+00 : f32
      %20 = vector.broadcast %cst_20 : f32 to vector<16x128xf32>
      %21 = arith.maximumf %19, %20 : vector<16x128xf32>
      %22 = arith.truncf %21 : vector<16x128xf32> to vector<16x128xbf16>
      %c0_21 = arith.constant 0 : index
      %c0_22 = arith.constant 0 : index
      %23 = vector.load %arg7[%c0_21, %c0_22] : memref<128x128xbf16, #tpu.memory_space<vmem>>, vector<128x128xbf16>
      %cst_23 = arith.constant dense<0.000000e+00> : vector<16x128xf32>
      %24 = tpu.matmul %22, %23, %cst_23 {dimension_numbers = #tpu.dot_dimension_numbers<[1], [0], [0], [1], [0, 0, 1, 1], [], []>} : vector<16x128xbf16>, vector<128x128xbf16>, vector<16x128xf32> -> vector<16x128xf32>
      %c0_24 = arith.constant 0 : index
      %c0_25 = arith.constant 0 : index
      %25 = vector.load %arg8[%c0_24, %c0_25] : memref<1x128xf32, #tpu.memory_space<vmem>>, vector<1x128xf32>
      %26 = vector.broadcast %25 : vector<1x128xf32> to vector<16x128xf32>
      %27 = arith.addf %24, %26 : vector<16x128xf32>
      %cst_26 = arith.constant 0.000000e+00 : f32
      %28 = vector.broadcast %cst_26 : f32 to vector<16x128xf32>
      %29 = arith.maximumf %27, %28 : vector<16x128xf32>
      %30 = arith.truncf %29 : vector<16x128xf32> to vector<16x128xbf16>
      %c0_27 = arith.constant 0 : index
      %c0_28 = arith.constant 0 : index
      %31 = vector.load %arg12[%c0_27, %c0_28] : memref<16x128xbf16, #tpu.memory_space<vmem>>, vector<16x128xbf16>
      tpu.vector_store %arg12[%c0_27, %c0_28], %30 {strides = array<i32>} : memref<16x128xbf16, #tpu.memory_space<vmem>>, vector<16x128xbf16>,
    } else {
    }
    %c0 = arith.constant 0 : index
    %c0_1 = arith.constant 0 : index
    %3 = vector.load %arg12[%c0, %c0_1] : memref<16x128xbf16, #tpu.memory_space<vmem>>, vector<16x128xbf16>
    %c0_2 = arith.constant 0 : index
    %c0_3 = arith.constant 0 : index
    %4 = vector.load %arg9[%c0_2, %c0_3] : memref<128x128xbf16, #tpu.memory_space<vmem>>, vector<128x128xbf16>
    %cst = arith.constant dense<0.000000e+00> : vector<16x128xf32>
    %5 = tpu.matmul %3, %4, %cst {dimension_numbers = #tpu.dot_dimension_numbers<[1], [0], [0], [1], [0, 0, 1, 1], [], []>} : vector<16x128xbf16>, vector<128x128xbf16>, vector<16x128xf32> -> vector<16x128xf32>
    %c0_4 = arith.constant 0 : index
    %c0_5 = arith.constant 0 : index
    %6 = vector.load %arg10[%c0_4, %c0_5] : memref<1x128xf32, #tpu.memory_space<vmem>>, vector<1x128xf32>
    %7 = vector.broadcast %6 : vector<1x128xf32> to vector<16x128xf32>
    %8 = arith.addf %5, %7 : vector<16x128xf32>
    %c0_6 = arith.constant 0 : index
    %c0_7 = arith.constant 0 : index
    %9 = vector.load %arg11[%c0_6, %c0_7] : memref<16x128xf32, #tpu.memory_space<vmem>>, vector<16x128xf32>
    tpu.vector_store %arg11[%c0_6, %c0_7], %8 {strides = array<i32>} : memref<16x128xf32, #tpu.memory_space<vmem>>, vector<16x128xf32>,
    return
  }
  func.func @transform_0(%arg0: i32, %arg1: i32) -> (i32, i32) {
    %c0_i32 = arith.constant 0 : i32
    %c0_i32_0 = arith.constant 0 : i32
    return %arg0, %c0_i32 : i32, i32
  }
  func.func @transform_1(%arg0: i32, %arg1: i32) -> (i32, i32) {
    %c0_i32 = arith.constant 0 : i32
    %c0_i32_0 = arith.constant 0 : i32
    return %arg0, %c0_i32 : i32, i32
  }
  func.func @transform_2(%arg0: i32, %arg1: i32) -> (i32, i32) {
    %c0_i32 = arith.constant 0 : i32
    %c0_i32_0 = arith.constant 0 : i32
    %c0_i32_1 = arith.constant 0 : i32
    return %c0_i32, %c0_i32_0 : i32, i32
  }
  func.func @transform_3(%arg0: i32, %arg1: i32) -> (i32, i32) {
    %c0_i32 = arith.constant 0 : i32
    %c0_i32_0 = arith.constant 0 : i32
    %c0_i32_1 = arith.constant 0 : i32
    return %c0_i32, %c0_i32_0 : i32, i32
  }
  func.func @transform_4(%arg0: i32, %arg1: i32) -> (i32, i32) {
    %c0_i32 = arith.constant 0 : i32
    %c0_i32_0 = arith.constant 0 : i32
    %c0_i32_1 = arith.constant 0 : i32
    return %c0_i32, %c0_i32_0 : i32, i32
  }
  func.func @transform_5(%arg0: i32, %arg1: i32) -> (i32, i32) {
    %c0_i32 = arith.constant 0 : i32
    %c0_i32_0 = arith.constant 0 : i32
    %c0_i32_1 = arith.constant 0 : i32
    return %c0_i32, %c0_i32_0 : i32, i32
  }
  func.func @transform_6(%arg0: i32, %arg1: i32) -> (i32, i32) {
    %c0_i32 = arith.constant 0 : i32
    %c0_i32_0 = arith.constant 0 : i32
    %c0_i32_1 = arith.constant 0 : i32
    return %c0_i32, %c0_i32_0 : i32, i32
  }
  func.func @transform_7(%arg0: i32, %arg1: i32) -> (i32, i32) {
    %c0_i32 = arith.constant 0 : i32
    %c0_i32_0 = arith.constant 0 : i32
    return %c0_i32, %arg1 : i32, i32
  }
  func.func @transform_8(%arg0: i32, %arg1: i32) -> (i32, i32) {
    %c0_i32 = arith.constant 0 : i32
    %c0_i32_0 = arith.constant 0 : i32
    return %c0_i32, %arg1 : i32, i32
  }
  func.func @transform_9(%arg0: i32, %arg1: i32) -> (i32, i32) {
    %c0_i32 = arith.constant 0 : i32
    return %arg0, %arg1 : i32, i32
  }
}

</mosaic_0001>

<bundles_post_ra>
// kernel: module_forward.6
= control target key start
LH: loop header
LB: loop body
LE: loop exit
PB: predicated region body
PF: predicated region fallthrough
CT: control target
= control target key end

     0   :  { %v119_v0 = vmov 0.0   ;;  %vm120_vm0 = vmmov 0   ;;  %vm35_vm1 = vcmask 261120   ;;  %vm88_vm2 = vcmask 257024   ;;  %s151_s1 = inlined_call_operand.vmem [shape: bf16[32,32], index: 1, kind: input, shape index: {}]   ;;  %s152_s0 = inlined_call_operand.vmem [shape: bf16[16,32], index: 0, kind: input, shape index: {}]   ;;  %s153_s2 = inlined_call_operand.vmem [shape: bf16[16,32], index: 2, kind: output, shape index: {}]  }
   0x1   :  { %106 = vmatprep.subr.bf16.mxu0 %v119_v0  ;;  %v116_v1 = vld [vmem:[%s151_s1 + $0x8] sm:$0xff]   ;;  %110 = vmatprep.mubr.msk.bf16.mxu0 %vm120_vm0, %v119_v0  ;;  %v117_v2 = vld [vmem:[%s151_s1] sm:$0xff]  }
   0x2   :  { %107 = vmatpush3.bf16.msra.mxu0 %v116_v1  ;;  %v118_v3 = vld [vmem:[%s152_s0] sm:$0xff]  }
   0x3   :  { %108 = vmatprep.subr.bf16.mxu0 %v119_v0 }
   0x6   :  { %109 = vmatpush3.bf16.msra.mxu0 %v117_v2 }
   0x9   :  { %111 = vmatmul.mubr.msk.bf16.vlgmr.msra.gmra.mxu0 %vm35_vm1, %v118_v3 }
  0xc9   :  { %v73_v4 = vpop.f32.mrf.mxu0 }
  0xca   :  { %v101_v5 = vpack.c.bf16 %v73_v4, %v73_v4 }
  0xcb   :  { %v112_v6 = vpop.f32.mrf.mxu0 }
  0xcc   :  { %89 = vst.msk [vmem:[%s153_s2] sm:$0xf] %vm88_vm2, %v101_v5 }
  0xcd   :  { %v76_v7 = vpop.f32.mrf.mxu0 }
  0xce   :  { %v102_v8 = vpack.c.bf16 %v76_v7, %v76_v7 }
  0xcf   :  { %v113_v9 = vpop.f32.mrf.mxu0 }
  0xd0   :  { %90 = vst.msk [vmem:[%s153_s2 + $0x4] sm:$0xf] %vm88_vm2, %v102_v8 }

// kernel: module_forward.8
= control target key start
LH: loop header
LB: loop body
LE: loop exit
PB: predicated region body
PF: predicated region fallthrough
CT: control target
= control target key end

     0   :  { %11 = vsyncpa [#allocation4], 0  ;;  %s519_s0 = inlined_call_operand.hbm [shape: bf16[16,16], index: 0, kind: input, shape index: {}]   ;;  %s520_s1 = inlined_call_operand.vmem [shape: bf16[16,32], index: 1, kind: input, shape index: {}, may-alias: {1,2}]   ;;  %s521_s2 = inlined_call_operand.vmem [shape: bf16[16,32], index: 2, kind: input, shape index: {}, may-alias: {1,2}]   ;;  %s522_s3 = inlined_call_operand.hbm [shape: bf16[32,32], index: 3, kind: input, shape index: {}]   ;;  %s523_s4 = inlined_call_operand.hbm [shape: bf16[32,32], index: 4, kind: input, shape index: {}]   ;;  %s524_s5 = inlined_call_operand.hbm [shape: f32[1,32], index: 5, kind: input, shape index: {}]   ;;  %s525_s6 = inlined_call_operand.vmem [shape: f32[16,32], index: 6, kind: output, shape index: {}]  }
   0x1   :  { %12 = vsyncpa [#allocation6], 0 }
   0x2   :  { %13 = vsyncpa [#allocation9], 0  ;;  %s444_s21 = smov [#allocation5]   ;;  %s445_s23 = smov [#allocation3]  }
   0x3   :  { %s35_s22 = sshll.u32 %s444_s21, 4  ;;  %s19_s24 = sshll.u32 %s445_s23, 4  ;;  %s36_s22 = int_to_ptr.vmem [resolvable:$true] %s35_s22  ;;  %s20_s24 = int_to_ptr.vmem [resolvable:$true] %s19_s24 }
   0x4   :  { %s366_s25 = scalar_lea.vmem %s36_s22, 256  ;;  %p371_p1 = scmp.lt.s32.totalorder %s36_s22, %s36_s22 }
   0x5   :  { %p367_p0 = scmp.ne.s32.totalorder %s36_s22, %s366_s25  ;;  %p372_p2 = scmp.lt.s32.totalorder %s366_s25, %s366_s25 }
   0x7   :  { %p373_p3 = por %p372_p2, %p371_p1 }
   0x9   :  { %p374_p4 = pnand %p373_p3, %p367_p0 }
   0xb   :  { %377 = shalt.err (!%p374_p4)
}
   0xc   :  { %s446_s26 = smov 64   ;;  %s447_s27 = smov 4  }
   0xd   :  { %41 = dma.hbm_to_vmem [thread:$0]  %s522_s3, 256, %s36_s22, [#allocation6], %s446_s26, %s446_s26, %s447_s27  }
   0xe   :  { %s386_s30 = scalar_lea.vmem %s20_s24, 128  ;;  %p391_p6 = scmp.lt.s32.totalorder %s20_s24, %s20_s24 }
   0xf   :  { %p387_p5 = scmp.ne.s32.totalorder %s20_s24, %s386_s30  ;;  %p392_p7 = scmp.lt.s32.totalorder %s386_s30, %s386_s30 }
  0x11   :  { %p393_p8 = por %p392_p7, %p391_p6 }
  0x13   :  { %p394_p9 = pnand %p393_p8, %p387_p5 }
  0x15   :  { %397 = shalt.err (!%p394_p9)
}
  0x16   :  { %25 = dma.hbm_to_vmem [thread:$0]  %s519_s0, 128, %s20_s24, [#allocation4], %s446_s26, %s446_s26, %s447_s27  }
  0x17   :  { %s448_s9 = smov [#allocation7]   ;;  %s449_s11 = smov [#allocation8]  }
  0x18   :  { %s47_s10 = sshll.u32 %s448_s9, 4  ;;  %s60_s12 = sshll.u32 %s449_s11, 4  ;;  %s48_s10 = int_to_ptr.vmem [resolvable:$true] %s47_s10  ;;  %s61_s12 = int_to_ptr.vmem [resolvable:$true] %s60_s12 }
  0x19   :  { %s406_s13 = scalar_lea.vmem %s48_s10, 256  ;;  %p411_p11 = scmp.lt.s32.totalorder %s48_s10, %s48_s10 }
  0x1a   :  { %p407_p10 = scmp.ne.s32.totalorder %s48_s10, %s406_s13  ;;  %p412_p12 = scmp.lt.s32.totalorder %s406_s13, %s406_s13 }
  0x1c   :  { %p413_p13 = por %p412_p12, %p411_p11 }
  0x1e   :  { %p414_p0 = pnand %p413_p13, %p407_p10 }
  0x20   :  { %417 = shalt.err (!%p414_p0)
}
  0x21   :  { %53 = dma.hbm_to_vmem [thread:$0]  %s523_s4, 256, %s48_s10, [#allocation6], %s446_s26, %s446_s26, %s447_s27  }
  0x22   :  { %s426_s15 = scalar_lea.vmem %s61_s12, 16  ;;  %s430_s0 = scalar_lea.vmem %s61_s12, 32 }
  0x23   :  { %p427_p1 = scmp.ne.s32.totalorder %s61_s12, %s426_s15  ;;  %p431_p2 = scmp.lt.s32.totalorder %s61_s12, %s61_s12 }
  0x24   :  { %p432_p3 = scmp.lt.s32.totalorder %s430_s0, %s426_s15 }
  0x26   :  { %p433_p4 = por %p432_p3, %p431_p2 }
  0x28   :  { %p434_p5 = pnand %p433_p4, %p427_p1 }
  0x2a   :  { %437 = shalt.err (!%p434_p5)
}
  0x2b   :  { %63 = dma.hbm_to_vmem [thread:$0]  %s524_s5, 16, %s61_s12, [#allocation9]  }
  0x2c   :  { %438 = dma.done.wait [#allocation4], 128  }
  0x2d   :  { %439 = vsyncadd [#allocation4], 4294967168 }
  0x2e   :  { %440 = dma.done.wait [#allocation6], 512  }
  0x2f   :  { %441 = vsyncadd [#allocation6], 4294966784 }
  0x30   :  { %442 = dma.done.wait [#allocation9], 16  }
  0x31   :  { %443 = vsyncadd [#allocation9], 4294967280  ;;  %vm81_vm0 = vcmask 261120   ;;  %v450_v0 = vmov 0.0   ;;  %vm451_vm1 = vmmov 0   ;;  %v351_v1 = vld [vmem:[%s520_s1] sm:$0xff]  }
  0x32   :  { %321 = vmatprep.subr.bf16.mxu0 %v450_v0  ;;  %323 = vmatprep.mubr.msk.bf16.mxu0 %vm451_vm1, %v450_v0  ;;  %82 = vst.msk [vmem:[#allocation2] sm:$0xff] %vm81_vm0, %v450_v0  ;;  %83 = vst.msk [vmem:[#allocation2 + $0x8] sm:$0xff] %vm81_vm0, %v450_v0  ;;  %v352_v2 = vld [vmem:[#allocation3] sm:$0xff]   ;;  %vm101_vm2 = vcmask 130048   ;;  %v353_v3 = vld [vmem:[#allocation5 + $0x8] sm:$0xff]  }
  0x33   :  { %327 = vmatprep.subr.bf16.mxu1 %v450_v0  ;;  %331 = vmatprep.mubr.msk.bf16.mxu1 %vm451_vm1, %v450_v0  ;;  %v354_v4 = vld [vmem:[#allocation5] sm:$0xff]   ;;  %v355_v5 = vld [vmem:[#allocation7 + $0x8] sm:$0xff]   ;;  %v356_v6 = vld [vmem:[%s521_s2] sm:$0xff]  }
  0x34   :  { %322 = vmatpush3.bf16.msra.mxu0 %v351_v1  ;;  %328 = vmatpush3.bf16.msra.mxu1 %v355_v5  ;;  %v357_v7 = vld [vmem:[#allocation7] sm:$0xff]   ;;  %v312_v24 = vld [vmem:[#allocation8] ss:$0 sm:$0xff] }
  0x35   :  { %335 = vmatprep.subr.bf16.mxu0 %v450_v0  ;;  %329 = vmatprep.subr.bf16.mxu1 %v450_v0 }
  0x37   :  { %324 = vmatmul.mubr.msk.bf16.vlgmr.msra.gmra.mxu0 %vm101_vm2, %v352_v2 }
  0x38   :  { %339 = vmatprep.mubr.msk.bf16.mxu0 %vm451_vm1, %v450_v0  ;;  %336 = vmatpush3.bf16.msra.mxu0 %v353_v3 }
  0x39   :  { %337 = vmatprep.subr.bf16.mxu0 %v450_v0  ;;  %330 = vmatpush3.bf16.msra.mxu1 %v357_v7  ;;  %v84_v8 = vld [vmem:[#allocation2] sm:$0xff]  ;;  %v85_v12 = vld [vmem:[#allocation2 + $0x8] sm:$0xff] }
  0x3c   :  { %338 = vmatpush3.bf16.msra.mxu0 %v354_v4 }
  0x3f   :  { %340 = vmatmul.mubr.msk.bf16.vlgmr.msra.gmra.mxu0 %vm81_vm0, %v356_v6 }
  0xf7   :  { %v139_v9 = vpop.f32.mrf.mxu0 }
  0xf8   :  { %v146_v10 = vadd.f32 %v139_v9, %v84_v8 }
  0xf9   :  { %v325_v11 = vpop.f32.mrf.mxu0 }
  0xfa   :  { %149 = vst.msk [vmem:[#allocation2] sm:$0xff] %vm81_vm0, %v146_v10 }
  0xfb   :  { %v142_v13 = vpop.f32.mrf.mxu0 }
  0xfc   :  { %v147_v14 = vadd.f32 %v142_v13, %v85_v12 }
  0xfd   :  { %v326_v15 = vpop.f32.mrf.mxu0 }
  0xfe   :  { %150 = vst.msk [vmem:[#allocation2 + $0x8] sm:$0xff] %vm81_vm0, %v147_v14 }
  0xff   :  { %v277_v19 = vpop.f32.mrf.mxu0 }
 0x101   :  { %v160_v16 = vld [vmem:[#allocation2] sm:$0xff]  ;;  %v341_v20 = vpop.f32.mrf.mxu0 }
 0x103   :  { %v280_v21 = vpop.f32.mrf.mxu0 }
 0x105   :  { %v161_v17 = vld [vmem:[#allocation2 + $0x8] sm:$0xff]  ;;  %v342_v22 = vpop.f32.mrf.mxu0 }
 0x106   :  { %v162_v18 = vpack.c.bf16 %v161_v17, %v160_v16 }
 0x108   :  { %332 = vmatmul.mubr.msk.bf16.vlgmr.msra.gmra.mxu1 %vm81_vm0, %v162_v18 }
 0x1c8   :  { %v216_v23 = vpop.f32.mrf.mxu1 }
 0x1c9   :  { %v278_v25 = vadd.f32 %v277_v19, %v216_v23 }
 0x1ca   :  { %v333_v26 = vpop.f32.mrf.mxu1 }
 0x1cb   :  { %v291_v27 = vadd.f32 %v312_v24, %v278_v25 }
 0x1cc   :  { %v219_v28 = vpop.f32.mrf.mxu1 }
 0x1cd   :  { %293 = vst.msk [vmem:[%s525_s6] sm:$0xff] %vm81_vm0, %v291_v27  ;;  %v281_v29 = vadd.f32 %v280_v21, %v219_v28 }
 0x1ce   :  { %v334_v30 = vpop.f32.mrf.mxu1 }
 0x1cf   :  { %v292_v31 = vadd.f32 %v312_v24, %v281_v29 }
 0x1d1   :  { %294 = vst.msk [vmem:[%s525_s6 + $0x8] sm:$0xff] %vm81_vm0, %v292_v31 }
 0x1d2   :  { %299 = vsyncpa [#allocation4], 1 }
 0x1d3   :  { %300 = vsyncpa [#allocation6], 1 }
 0x1d4   :  { %301 = vsyncpa [#allocation9], 1 }

// kernel: module_forward.7
= control target key start
LH: loop header
LB: loop body
LE: loop exit
PB: predicated region body
PF: predicated region fallthrough
CT: control target
= control target key end

     0   :  { %s1515_s0 = inlined_call_operand.hbm [shape: bf16[3,16,16], index: 0, kind: input, shape index: {}]   ;;  %s1516_s1 = inlined_call_operand.vmem [shape: bf16[16,32], index: 1, kind: input, shape index: {}]   ;;  %s1517_s2 = inlined_call_operand.hbm [shape: f32[1,32], index: 2, kind: input, shape index: {}]   ;;  %s1518_s3 = inlined_call_operand.hbm [shape: bf16[32,32], index: 3, kind: input, shape index: {}]   ;;  %s1519_s4 = inlined_call_operand.hbm [shape: f32[1,32], index: 4, kind: input, shape index: {}]   ;;  %s1520_s5 = inlined_call_operand.hbm [shape: f32[1,32], index: 5, kind: input, shape index: {}]   ;;  %s1521_s6 = inlined_call_operand.<no memory space> [shape: f32[1,1], index: 6, kind: input, shape index: {}]   ;;  %s1522_s7 = inlined_call_operand.vmem [shape: f32[16,32], index: 7, kind: output, shape index: {}]  }
   0x1   :  { %v12_v0 = vstv %s1521_s6 }
   0x2   :  { %13 = vst [vmem:[#allocation3] sm:$0x1] %v12_v0 }
   0x3   :  { %14 = vsyncpa [#allocation5], 0 }
   0x4   :  { %16 = vsyncpa [#allocation5 + $0x1], 0 }
   0x5   :  { %17 = vsyncpa [#allocation7], 0 }
   0x6   :  { %18 = vsyncpa [#allocation10], 0  ;;  %s1300_s26 = smov 0   ;;  %s1302_s27 = smov 0  }
   0x7   :  { %s1304_s28 = smov 0   ;;  %s1306_s29 = smov 0  }
   0x8   :  { %s1308_s30 = smov 0   ;;  %s1310_s8 = smov 0  }
   0x9 LB: > { %s856_s6 = sadd.s32 4294967295, %s1243_s8   ;;  %p67_p0 = scmp.ne.s32.totalorder %s1227_s27, %s1223_s26  ;;  %s1243_s8 = sphi %s1310_s8, %s24_s8   ;;  %s1239_s30 = sphi %s1308_s30, %s1539_s30   ;;  %s1235_s29 = sphi %s1306_s29, %s1538_s29   ;;  %s1231_s28 = sphi %s1304_s28, %s1537_s28   ;;  %s1227_s27 = sphi %s1302_s27, %s1536_s27   ;;  %s1223_s26 = sphi %s1300_s26, %s1535_s26  }
   0xa   : > { %p1330_p1 = scmp.eq.s32.totalorder %s856_s6, 0  ;;  %p857_p2 = scmp.ge.s32.totalorder %s1243_s8, 1 }
   0xb   : > { %p235_p3 = scmp.lt.s32.totalorder %s1243_s8, 4  ;;  %s1245_s12 = smov [#allocation6]  }
   0xc   : > { %s1527_s9 = scalar_select %p1330_p1, 1, 0 }
   0xd   : > { %p1338_p4 = por %p1330_p1, %p67_p0  ;;  %p1342_p5 = pnand %p857_p2, %p235_p3 }
   0xe   : > { %s257_s13 = sshll.u32 %s1245_s12, 4  ;;  %s1246_s14 = smov [#allocation9]   ;;  %s258_s13 = int_to_ptr.vmem [resolvable:$true] %s257_s13 }
   0xf   : > { %s1528_s10 = scalar_select %p1338_p4, 1, 0 }
  0x10   : > { %p942_p6 = pneg %p1342_p5  ;;  %s281_s15 = sshll.u32 %s1246_s14, 4  ;;  %s282_s15 = int_to_ptr.vmem [resolvable:$true] %s281_s15 }
  0x11   : > { %s1247_s17 = smov [#allocation8]   ;;  %s1064_s19 = scalar_lea.vmem %s258_s13, 16 }
  0x12   : > { %p1350_p7 = pnand %p942_p6, %p1330_p1  ;;  %s267_s18 = sshll.u32 %s1247_s17, 4  ;;  %s1354_s18 = int_to_ptr.vmem [resolvable:$true] %s267_s18 }
  0x13   : > { %p1065_p9 = scmp.ne.s32.totalorder %s258_s13, %s1064_s19  ;;  %s1071_s20 = scalar_lea.vmem %s258_s13, 32 }
  0x14   : > { %p1055_p8 = pneg %p1350_p7  ;;  %p1072_p12 = scmp.lt.s32.totalorder %s258_s13, %s258_s13 }
  0x15   : > { %p1073_p13 = scmp.lt.s32.totalorder %s1071_s20, %s1064_s19 }
  0x16   : > { %p1067_p10 = pnand %p1065_p9, %p1055_p8 }
  0x17   : > { %p1074_p0 = por %p1073_p13, %p1072_p12 }
  0x18   : > { %p1068_p11 = pneg %p1067_p10 }
  0x1a   : > { %p1075_p2 = pnand %p1074_p0, %p1068_p11 }
  0x1c   : > { %1078 = shalt.err (!%p1075_p2)
}
  0x1d   : > { %945 = dma.hbm_to_vmem [thread:$0]  (!%p1350_p7), %s1517_s2, 16, %s258_s13, [#allocation7]  }
  0x1e   : > { %s1090_s23 = scalar_lea.vmem %s282_s15, 16  ;;  %s1097_s24 = scalar_lea.vmem %s282_s15, 32 }
  0x1f   : > { %p1091_p3 = scmp.ne.s32.totalorder %s282_s15, %s1090_s23  ;;  %p1098_p10 = scmp.lt.s32.totalorder %s282_s15, %s282_s15 }
  0x20   : > { %p1099_p1 = scmp.lt.s32.totalorder %s1097_s24, %s1090_s23 }
  0x21   : > { %p1093_p6 = pnand %p1091_p3, %p1055_p8 }
  0x22   : > { %p1100_p4 = por %p1099_p1, %p1098_p10 }
  0x23   : > { %p1094_p9 = pneg %p1093_p6 }
  0x25   : > { %p1101_p12 = pnand %p1100_p4, %p1094_p9 }
  0x27   : > { %1104 = shalt.err (!%p1101_p12)
}
  0x28   : > { %951 = dma.hbm_to_vmem [thread:$0]  (!%p1350_p7), %s1519_s4, 16, %s282_s15, [#allocation10]  }
  0x29   : > { %s1116_s6 = scalar_lea.vmem %s1354_s18, 256  ;;  %p1124_p1 = scmp.lt.s32.totalorder %s1354_s18, %s1354_s18 }
  0x2a   : > { %p1117_p11 = scmp.ne.s32.totalorder %s1354_s18, %s1116_s6  ;;  %p1125_p4 = scmp.lt.s32.totalorder %s1116_s6, %s1116_s6 }
  0x2c   : > { %p1119_p13 = pnand %p1117_p11, %p1055_p8  ;;  %p1126_p2 = por %p1125_p4, %p1124_p1 }
  0x2e   : > { %p1120_p0 = pneg %p1119_p13 }
  0x30   : > { %p1127_p3 = pnand %p1126_p2, %p1120_p0 }
  0x32   : > { %1130 = shalt.err (!%p1127_p3)
}
  0x33   : > { %s1526_s12 = smov 64   ;;  %s1249_s13 = smov 4  }
  0x34   : > { %948 = dma.hbm_to_vmem [thread:$0]  (!%p1350_p7), %s1518_s3, 256, %s1354_s18, [#allocation7], %s1526_s12, %s1526_s12, %s1249_s13  }
  0x35   : > { %s1250_s17 = smov [#allocation11]  }
  0x36   : > { %s292_s19 = sshll.u32 %s1250_s17, 4  ;;  %s293_s19 = int_to_ptr.vmem [resolvable:$true] %s292_s19 }
  0x37   : > { %s1142_s20 = scalar_lea.vmem %s293_s19, 16  ;;  %s1149_s21 = scalar_lea.vmem %s293_s19, 32 }
  0x38   : > { %p1143_p6 = scmp.ne.s32.totalorder %s293_s19, %s1142_s20  ;;  %p1150_p12 = scmp.lt.s32.totalorder %s293_s19, %s293_s19 }
  0x39   : > { %p1151_p11 = scmp.lt.s32.totalorder %s1149_s21, %s1142_s20 }
  0x3a   : > { %p1145_p9 = pnand %p1143_p6, %p1055_p8 }
  0x3b   : > { %p1152_p13 = por %p1151_p11, %p1150_p12 }
  0x3c   : > { %p1146_p10 = pneg %p1145_p9 }
  0x3e   : > { %p1153_p0 = pnand %p1152_p13, %p1146_p10 }
  0x40   : > { %1156 = shalt.err (!%p1153_p0)
}
  0x41   : > { %954 = dma.hbm_to_vmem [thread:$0]  (!%p1350_p7), %s1520_s5, 16, %s293_s19, [#allocation10]  }
  0x42   : > { %s39_s18 = sadd.s32 1, %s1239_s30  ;;  %s54_s24 = sadd.s32 1, %s1231_s28 }
  0x43   : > { %p41_p8 = scmp.ge.s32.totalorder %s39_s18, 3  ;;  %p61_p1 = scmp.ne.s32.totalorder %s1231_s28, %s1227_s27 }
  0x44   : > { %p62_p4 = scmp.eq.s32.totalorder %s1243_s8, 0  ;;  %p963_p2 = scmp.lt.s32.totalorder %s1243_s8, 3 }
  0x45   : > { %s1541_s18 = smov (%p41_p8, %s39_s18), 0  ;;  %s306_s16 = sand.u32 1, %s1231_s28  }
  0x46   : > { %p63_p3 = por %p62_p4, %p61_p1  ;;  %s47_s25 = ssub.s32 %s1239_s30, %s1541_s18 }
  0x47   : > { %p52_p6 = scmp.eq.s32.totalorder %s47_s25, 0  ;;  %s864_s26 = sshll.u32 %s306_s16, 3 }
  0x48   : > { %s891_s6 = sshll.u32 %s1239_s30, 7  ;;  %s310_s20 = scalar_lea.vmem [#allocation4], %s864_s26 }
  0x49   : > { %s1411_s14 = scalar_select %p52_p6, %s1231_s28, %s54_s24  }
  0x4a   : > { %s319_s19 = scalar_lea.hbm %s1515_s0, %s891_s6  ;;  %s320_s21 = sshll.u32 %s310_s20, 4  ;;  %s321_s21 = int_to_ptr.vmem [resolvable:$true] %s320_s21 }
  0x4b   : > { %p1418_p7 = pnand %p963_p2, %p63_p3  ;;  %s307_s23 = scalar_lea.sflag [#allocation5], %s306_s16 }
  0x4c   : > { %s1170_s25 = scalar_lea.vmem %s321_s21, 128  ;;  %s1251_s24 = smov [#allocation4]  }
  0x4d   : > { %p1159_p9 = pneg %p1418_p7  ;;  %p1171_p10 = scmp.ne.s32.totalorder %s321_s21, %s1170_s25 }
  0x4e   : > { %s1175_s12 = sshll.u32 %s1251_s24, 4  ;;  %s1176_s12 = int_to_ptr.vmem [resolvable:$false] %s1175_s12 }
  0x4f   : > { %p1173_p12 = pnand %p1171_p10, %p1159_p9  ;;  %s1177_s6 = scalar_lea.vmem %s1176_s12, 256 }
  0x50   : > { %p1178_p13 = scmp.lt.s32.totalorder %s321_s21, %s1176_s12  ;;  %p1179_p0 = scmp.lt.s32.totalorder %s1177_s6, %s1170_s25 }
  0x51   : > { %p1174_p11 = pneg %p1173_p12 }
  0x52   : > { %p1180_p8 = por %p1179_p0, %p1178_p13 }
  0x54   : > { %p1181_p1 = pnand %p1180_p8, %p1174_p11 }
  0x56   : > { %1184 = shalt.err (!%p1181_p1)
}
  0x57   : > { %s1532_s26 = smov 64   ;;  %332 = sbr.rel (%p1342_p5) target bundleno = 845 (0x34d), region = 48 }
  0x58   : > { %958 = dma.hbm_to_vmem [thread:$0]  (!%p1418_p7), %s319_s19, 128, %s321_s21, %s307_s23, %s1532_s26, %s1532_s26, %s1249_s13  }
  0x59   : > { %s334_s16 = sand.u32 (!%p1342_p5), 1, %s1227_s27   ;;  %p1533_p4 = scmp.ne.s32.totalorder (!%p1342_p5), %s1528_s10, 0 }
  0x5a   : > { %s868_s15 = sshll.u32 (!%p1342_p5), %s334_s16, 3  ;;  %s335_s17 = scalar_lea.sflag (!%p1342_p5), [#allocation5], %s334_s16 }
  0x5b   : > { %s338_s20 = scalar_lea.vmem (!%p1342_p5), [#allocation4], %s868_s15 }
  0x5c   : > { %1210 = dma.done.wait (%p1533_p4), %s335_s17, 128  }
  0x5d   : > { %1212 = vsyncadd (%p1533_p4), %s335_s17, 4294967168  ;;  %p1534_p2 = scmp.ne.s32.totalorder %s1527_s9, 0 }
  0x5f   : > { %1214 = dma.done.wait (%p1534_p2), [#allocation7], 272  }
  0x60   : > { %1216 = vsyncadd (%p1534_p2), [#allocation7], 4294967024 }
  0x61   : > { %1218 = dma.done.wait (%p1534_p2), [#allocation10], 32  }
  0x62   : > { %1220 = vsyncadd (%p1534_p2), [#allocation10], 4294967264  ;;  %vm408_vm0 = vcmask 261120   ;;  %v1252_v1 = vmov 0.0   ;;  %vm1253_vm1 = vmmov 0   ;;  %v1027_v2 = vld [vmem:[%s1516_s1] sm:$0xff]  }
  0x63   : > { %409 = vst.msk [vmem:[#allocation2] sm:$0xff] %vm408_vm0, %v1252_v1  ;;  %410 = vst.msk [vmem:[#allocation2 + $0x8] sm:$0xff] %vm408_vm0, %v1252_v1  ;;  %902 = vmatprep.subr.bf16.mxu0 %v1252_v1  ;;  %904 = vmatprep.mubr.msk.bf16.mxu0 %vm1253_vm1, %v1252_v1  ;;  %v1028_v3 = vld [vmem:[%s338_s20] sm:$0xff]   ;;  %vm428_vm2 = vcmask 130048   ;;  %p478_p5 = scmp.eq.s32.totalorder %s1235_s29, 0 }
  0x64   : > { %903 = vmatpush3.bf16.msra.mxu0 %v1027_v2  ;;  %v877_v13 = vld [vmem:[#allocation6] ss:$0 sm:$0xff] (%p478_p5) }
  0x67   : > { %905 = vmatmul.mubr.msk.bf16.vlgmr.msra.gmra.mxu0 %vm428_vm2, %v1028_v3 }
  0x6a   : > { %v411_v4 = vld [vmem:[#allocation2] sm:$0xff]  ;;  %v412_v8 = vld [vmem:[#allocation2 + $0x8] sm:$0xff] }
 0x127   : > { %v466_v5 = vpop.f32.mrf.mxu0 }
 0x128   : > { %v473_v6 = vadd.f32 %v466_v5, %v411_v4 }
 0x129   : > { %v906_v7 = vpop.f32.mrf.mxu0 }
 0x12a   : > { %476 = vst.msk [vmem:[#allocation2] sm:$0xff] %vm408_vm0, %v473_v6  ;;  %482 = sbr.rel (!%p478_p5) target bundleno = 313 (0x139), region = 76 }
 0x12b   : > { %v469_v9 = vpop.f32.mrf.mxu0 }
 0x12c   : > { %v474_v10 = vadd.f32 %v469_v9, %v412_v8 }
 0x12d   : > { %v907_v11 = vpop.f32.mrf.mxu0 }
 0x12e   : > { %477 = vst.msk [vmem:[#allocation2 + $0x8] sm:$0xff] %vm408_vm0, %v474_v10 }
 0x131   : > { %v483_v12 = vld [vmem:[#allocation2] sm:$0xff] }
 0x132   : > { %v492_v15 = vadd.f32 %v877_v13, %v483_v12 }
 0x134   : > { %494 = vst.msk [vmem:[%s1522_s7] sm:$0xff] %vm408_vm0, %v492_v15 }
 0x135   : > { %v484_v14 = vld [vmem:[#allocation2 + $0x8] sm:$0xff] }
 0x136   : > { %v493_v16 = vadd.f32 %v877_v13, %v484_v14 }
 0x138   : > { %495 = vst.msk [vmem:[%s1522_s7 + $0x8] sm:$0xff] %vm408_vm0, %v493_v16 }
 0x139 PF: > { %p496_p3 = scmp.gt.s32.totalorder %s1235_s29, 0 }
 0x13a   : > { %v1031_v17 = vld [vmem:[#allocation8 + $0x8] sm:$0xff] (%p496_p3)   ;;  %v1254_v18 = vmov (%p496_p3), 0.0   ;;  %v1032_v19 = vld [vmem:[#allocation8] sm:$0xff] (%p496_p3)   ;;  %v879_v24 = vld [vmem:[#allocation6] ss:$0 sm:$0xff] (%p496_p3)  ;;  %vm1255_vm3 = vmmov (%p496_p3), 0  }
 0x13b   : > { %500 = sbr.rel (!%p496_p3) target bundleno = 845 (0x34d), region = 80  ;;  %908 = vmatprep.subr.bf16.mxu0 (%p496_p3), %v1254_v18  ;;  %916 = vmatprep.subr.bf16.mxu1 (%p496_p3), %v1254_v18  ;;  %v1464_v20 = vld [vmem:[%s1522_s7] sm:$0xff] (%p496_p3)  ;;  %v880_v29 = vld [vmem:[#allocation9] ss:$0 sm:$0xff] (%p496_p3)  ;;  %v885_v42 = vld [vmem:[#allocation11] ss:$0 sm:$0xff] (%p496_p3) }
 0x13c   : > { %909 = vmatpush3.bf16.msra.mxu0 (%p496_p3), %v1031_v17  ;;  %917 = vmatpush3.bf16.msra.mxu1 (%p496_p3), %v1031_v17  ;;  %v501_v22 = vld [vmem:[#allocation2] sm:$0xff] (%p496_p3)  ;;  %v1256_v55 = vmov (%p496_p3), 0   ;;  %v886_v56 = vld [vmem:[#allocation3] ss:$0 sm:$0xff] (%p496_p3) }
 0x13d   : > { %910 = vmatprep.subr.bf16.mxu0 (%p496_p3), %v1254_v18  ;;  %918 = vmatprep.subr.bf16.mxu1 (%p496_p3), %v1254_v18  ;;  %v1471_v25 = vadd.f32 (%p496_p3), %v879_v24, %v501_v22 }
 0x13e   : > { %912 = vmatprep.mubr.msk.bf16.mxu0 (%p496_p3), %vm1255_vm3, %v1254_v18  ;;  %920 = vmatprep.mubr.msk.bf16.mxu1 (%p496_p3), %vm1255_vm3, %v1254_v18 }
 0x13f   : > { %v1469_v21 = vld [vmem:[%s1522_s7 + $0x8] sm:$0xff] (%p496_p3)  ;;  %1030 = vset.pattern.permute.xlu1 (%p496_p3), %v1256_v55  ;;  %1029 = vset.pattern.permute.xlu0 (%p496_p3), %v1256_v55 }
 0x140   : > { %v502_v23 = vld [vmem:[#allocation2 + $0x8] sm:$0xff]  ;;  %v514_v27 = vpack.c.bf16 %v1469_v21, %v1464_v20  ;;  %911 = vmatpush3.bf16.msra.mxu0 %v1032_v19  ;;  %919 = vmatpush3.bf16.msra.mxu1 %v1032_v19 }
 0x141   : > { %v1473_v26 = vadd.f32 %v879_v24, %v502_v23 }
 0x143   : > { %v584_v28 = vpack.c.bf16 %v1473_v26, %v1471_v25  ;;  %913 = vmatmul.mubr.msk.bf16.vlgmr.msra.gmra.mxu0 %vm408_vm0, %v514_v27 }
 0x145   : > { %921 = vmatmul.mubr.msk.bf16.vlgmr.msra.gmra.mxu1 %vm408_vm0, %v584_v28 }
 0x203   : > { %v575_v30 = vpop.f32.mrf.mxu0 }
 0x204   : > { %v576_v32 = vadd.f32 %v880_v29, %v575_v30 }
 0x205   : > { %v622_v31 = vpop.f32.mrf.mxu1  ;;  %v914_v34 = vpop.f32.mrf.mxu0 }
 0x206   : > { %v623_v33 = vadd.f32 %v880_v29, %v622_v31  ;;  %1033 = vtanh.f32 %v576_v32 }
 0x207   : > { %v922_v35 = vpop.f32.mrf.mxu1  ;;  %v578_v36 = vpop.f32.mrf.mxu0 }
 0x208   : > { %1035 = vtanh.f32 %v623_v33  ;;  %v579_v38 = vadd.f32 %v880_v29, %v578_v36 }
 0x209   : > { %v625_v37 = vpop.f32.mrf.mxu1  ;;  %v915_v40 = vpop.f32.mrf.mxu0 }
 0x20a   : > { %v626_v39 = vadd.f32 %v880_v29, %v625_v37  ;;  %1037 = vtanh.f32 %v579_v38 }
 0x20b   : > { %v923_v41 = vpop.f32.mrf.mxu1 }
 0x20c   : > { %1039 = vtanh.f32 %v626_v39 }
 0x213   : > { %v1034_v43 = vpop.eup %1033 }
 0x214   : > { %v638_v45 = vmul.f32 %v1034_v43, %v885_v42 }
 0x215   : > { %v1036_v44 = vpop.eup %1035 }
 0x216   : > { %v655_v46 = vmul.f32 %v1036_v44, %v885_v42  ;;  %v640_v47 = vsel %vm408_vm0, %v638_v45, 0.0 }
 0x217   : > { %v1038_v48 = vpop.eup %1037  ;;  %641 = vadd.xlane.f32.xlu0 %v640_v47 }
 0x218   : > { %v657_v49 = vsel %vm408_vm0, %v655_v46, 0.0  ;;  %v639_v51 = vmul.f32 %v1038_v48, %v885_v42 }
 0x219   : > { %v1040_v50 = vpop.eup %1039  ;;  %658 = vadd.xlane.f32.xlu1 %v657_v49 }
 0x21a   : > { %v656_v52 = vmul.f32 %v1040_v50, %v885_v42  ;;  %v643_v53 = vsel %vm408_vm0, %v639_v51, 0.0 }
 0x21b   : > { %644 = vadd.xlane.f32.xlu0 %v643_v53 }
 0x21c   : > { %v660_v54 = vsel %vm408_vm0, %v656_v52, 0.0 }
 0x21d   : > { %661 = vadd.xlane.f32.xlu1 %v660_v54 }
 0x2a0   : > { %v642_v57 = vpop.xlane.xlu0 %641 }
 0x2a1   : > { %v653_v58 = vadd.f32 %v886_v56, %v642_v57 }
 0x2a2   : > { %v659_v59 = vpop.xlane.xlu1 %658 }
 0x2a3   : > { %v663_v60 = vadd.f32 %v886_v56, %v659_v59 }
 0x2a4   : > { %v645_v62 = vpop.xlane.xlu0 %644 }
 0x2a5   : > { %v665_v61 = vmax.f32 %v653_v58, %v663_v60  ;;  %v654_v63 = vadd.f32 %v886_v56, %v645_v62 }
 0x2a6   : > { %v662_v0 = vpop.xlane.xlu1 %661 }
 0x2a7   : > { %v667_v1 = vsub.f32 %v653_v58, %v665_v61  ;;  %v673_v2 = vsub.f32 %v663_v60, %v665_v61  ;;  %v664_v3 = vadd.f32 %v886_v56, %v662_v0 }
 0x2a9   : > { %v669_v4 = vmul.f32 1.442695, %v667_v1  ;;  %v675_v5 = vmul.f32 1.442695, %v673_v2  ;;  %v666_v6 = vmax.f32 %v654_v63, %v664_v3 }
 0x2ab   : > { %1041 = vpow2.f32 %v669_v4  ;;  %v668_v7 = vsub.f32 %v654_v63, %v666_v6  ;;  %v674_v8 = vsub.f32 %v664_v3, %v666_v6 }
 0x2ac   : > { %1043 = vpow2.f32 %v675_v5 }
 0x2ad   : > { %v671_v9 = vmul.f32 1.442695, %v668_v7  ;;  %v677_v10 = vmul.f32 1.442695, %v674_v8 }
 0x2af   : > { %1045 = vpow2.f32 %v671_v9 }
 0x2b0   : > { %1047 = vpow2.f32 %v677_v10 }
 0x2b8   : > { %v1042_v11 = vpop.eup %1041 }
 0x2b9   : > { %v1044_v12 = vpop.eup %1043  ;;  %685 = vperm.xlu0 %1029, %v1042_v11  }
 0x2ba   : > { %v679_v13 = vadd.f32 %v1044_v12, %v1042_v11  ;;  %697 = vperm.xlu1 %1030, %v1044_v12  }
 0x2bc   : > { %v1046_v14 = vpop.eup %1045  ;;  %1049 = vrcp.f32 %v679_v13 }
 0x2bd   : > { %v1048_v15 = vpop.eup %1047 }
 0x2be   : > { %v680_v16 = vadd.f32 %v1048_v15, %v1046_v14  ;;  %690 = vperm.xlu1 %1030, %v1046_v14  }
 0x2c0   : > { %1051 = vrcp.f32 %v680_v16 }
 0x2c2   : > { %702 = vperm.xlu1 %1030, %v1048_v15  }
 0x2c9   : > { %v1050_v17 = vpop.eup %1049 }
 0x2ca   : > { %711 = vperm.xlu1 %1030, %v1050_v17  }
 0x2cd   : > { %v1052_v18 = vpop.eup %1051 }
 0x2ce   : > { %716 = vperm.xlu1 %1030, %v1052_v18  }
 0x334   : > { %v686_v23 = vpop.permute.xlu0 %685 }
 0x335   : > { %v698_v19 = vpop.permute.xlu1 %697  ;;  %v693_v24 = vmul.f32 %v686_v23, %v1464_v20 }
 0x336   : > { %v705_v27 = vmul.f32 %v698_v19, %v1471_v25 }
 0x338   : > { %v707_v30 = vadd.f32 %v705_v27, %v693_v24 }
 0x339   : > { %v691_v22 = vpop.permute.xlu1 %690 }
 0x33a   : > { %v694_v32 = vmul.f32 %v691_v22, %v1469_v21 }
 0x33d   : > { %v703_v28 = vpop.permute.xlu1 %702 }
 0x33e   : > { %v706_v29 = vmul.f32 %v703_v28, %v1473_v26 }
 0x340   : > { %v708_v34 = vadd.f32 %v706_v29, %v694_v32 }
 0x345   : > { %v712_v31 = vpop.permute.xlu1 %711 }
 0x346   : > { %v719_v33 = vmul.f32 %v712_v31, %v707_v30 }
 0x348   : > { %721 = vst.msk [vmem:[%s1522_s7] sm:$0xff] %vm408_vm0, %v719_v33 }
 0x349   : > { %v717_v35 = vpop.permute.xlu1 %716 }
 0x34a   : > { %v720_v36 = vmul.f32 %v717_v35, %v708_v34 }
 0x34c   : > { %722 = vst.msk [vmem:[%s1522_s7 + $0x8] sm:$0xff] %vm408_vm0, %v720_v36 }
 0x34d PF: > { %s24_s8 = sadd.s32 1, %s1243_s8   ;;  %s1535_s26 = smov %s1227_s27 }
 0x34e   : > { %p21_p6 = scmp.ge.s32.totalorder %s24_s8, 5   ;;  %s1536_s27 = smov %s1231_s28 }
 0x34f   : > { %s1537_s28 = smov %s1411_s14  ;;  %s1538_s29 = smov %s1239_s30 }
 0x350   : > { %s1539_s30 = smov %s1541_s18  ;;  %23 = sbr.rel (!%p21_p6) target bundleno = 9 (0x9), region = 119 }
 0x355   :  { %745 = vsyncpa [#allocation5], 1 }
 0x356   :  { %747 = vsyncpa [#allocation5 + $0x1], 1 }
 0x357   :  { %748 = vsyncpa [#allocation7], 1 }
 0x358   :  { %749 = vsyncpa [#allocation10], 1 }

// kernel: module_forward.9
= control target key start
LH: loop header
LB: loop body
LE: loop exit
PB: predicated region body
PF: predicated region fallthrough
CT: control target
= control target key end

     0   :  { %17 = vsyncpa [#allocation5], 0  ;;  %s3551_s0 = inlined_call_operand.vmem [shape: bf16[1,64,32], index: 0, kind: input, shape index: {}]   ;;  %s3552_s1 = inlined_call_operand.vmem [shape: bf16[1,64,32], index: 1, kind: input, shape index: {}]   ;;  %s3553_s2 = inlined_call_operand.vmem [shape: bf16[32,1024], index: 2, kind: input, shape index: {}]   ;;  %s3554_s3 = inlined_call_operand.hbm [shape: bf16[32,1024], index: 3, kind: input, shape index: {}]   ;;  %s3555_s4 = inlined_call_operand.hbm [shape: f32[1,1024], index: 4, kind: input, shape index: {}]   ;;  %s3556_s5 = inlined_call_operand.hbm [shape: f32[1,1024], index: 5, kind: input, shape index: {}]   ;;  %s3557_s6 = inlined_call_operand.vmem [shape: bf16[128,512], index: 6, kind: input, shape index: {}]   ;;  %s3558_s7 = inlined_call_operand.vmem [shape: bf16[128,512], index: 7, kind: input, shape index: {}]   ;;  %s3559_s8 = inlined_call_operand.vmem [shape: bf16[128,512], index: 8, kind: input, shape index: {}]   ;;  %s3560_s9 = inlined_call_operand.vmem [shape: f32[1,64,128], index: 9, kind: output, shape index: {0}]   ;;  %s3561_s10 = inlined_call_operand.vmem [shape: f32[1,64,128], index: 10, kind: output, shape index: {1}]   ;;  %s3562_s11 = inlined_call_operand.vmem [shape: f32[1,64,128], index: 11, kind: output, shape index: {2}]  }
   0x1   :  { %18 = vsyncpa [#allocation7], 0  ;;  %s2710_s17 = smov [#allocation6]   ;;  %s2711_s19 = smov [#allocation4]  }
   0x2   :  { %s43_s18 = sshll.u32 %s2710_s17, 4  ;;  %s30_s20 = sshll.u32 %s2711_s19, 4  ;;  %s44_s18 = int_to_ptr.vmem [resolvable:$true] %s43_s18  ;;  %s31_s20 = int_to_ptr.vmem [resolvable:$true] %s30_s20 }
   0x3   :  { %s2598_s21 = scalar_lea.vmem %s44_s18, 128  ;;  %p2603_p1 = scmp.lt.s32.totalorder %s44_s18, %s44_s18 }
   0x4   :  { %p2599_p0 = scmp.ne.s32.totalorder %s44_s18, %s2598_s21  ;;  %p2604_p2 = scmp.lt.s32.totalorder %s2598_s21, %s2598_s21 }
   0x6   :  { %p2605_p3 = por %p2604_p2, %p2603_p1 }
   0x8   :  { %p2606_p4 = pnand %p2605_p3, %p2599_p0 }
   0xa   :  { %2609 = shalt.err (!%p2606_p4)
}
   0xb   :  { %46 = dma.hbm_to_vmem [thread:$0]  %s3555_s4, 128, %s44_s18, [#allocation7]  }
   0xc   :  { %s2618_s24 = scalar_lea.vmem %s31_s20, 2048  ;;  %p2623_p6 = scmp.lt.s32.totalorder %s31_s20, %s31_s20 }
   0xd   :  { %p2619_p5 = scmp.ne.s32.totalorder %s31_s20, %s2618_s24  ;;  %p2624_p7 = scmp.lt.s32.totalorder %s2618_s24, %s2618_s24 }
   0xf   :  { %p2625_p8 = por %p2624_p7, %p2623_p6 }
  0x11   :  { %p2626_p9 = pnand %p2625_p8, %p2619_p5 }
  0x13   :  { %2629 = shalt.err (!%p2626_p9)
}
  0x14   :  { %s2712_s25 = smov 512   ;;  %s2713_s26 = smov 32  }
  0x15   :  { %36 = dma.hbm_to_vmem [thread:$0]  %s3554_s3, 2048, %s31_s20, [#allocation5], %s2712_s25, %s2712_s25, %s2713_s26  }
  0x16   :  { %s2714_s29 = smov [#allocation8]  }
  0x17   :  { %s53_s30 = sshll.u32 %s2714_s29, 4  ;;  %s54_s30 = int_to_ptr.vmem [resolvable:$true] %s53_s30 }
  0x18   :  { %s2638_s12 = scalar_lea.vmem %s54_s30, 128  ;;  %p2643_p11 = scmp.lt.s32.totalorder %s54_s30, %s54_s30 }
  0x19   :  { %p2639_p10 = scmp.ne.s32.totalorder %s54_s30, %s2638_s12  ;;  %p2644_p12 = scmp.lt.s32.totalorder %s2638_s12, %s2638_s12 }
  0x1b   :  { %p2645_p13 = por %p2644_p12, %p2643_p11 }
  0x1d   :  { %p2646_p0 = pnand %p2645_p13, %p2639_p10 }
  0x1f   :  { %2649 = shalt.err (!%p2646_p0)
}
  0x20   :  { %56 = dma.hbm_to_vmem [thread:$0]  %s3556_s5, 128, %s54_s30, [#allocation7]  }
  0x21   :  { %2678 = dma.done.wait [#allocation5], 2048  }
  0x22   :  { %2679 = vsyncadd [#allocation5], 4294965248 }
  0x23   :  { %2680 = dma.done.wait [#allocation7], 256  }
  0x24   :  { %2681 = vsyncadd [#allocation7], 4294967040  ;;  %v2715_v0 = vmov 0   ;;  %v89_v1 = vld [vmem:[%s3553_s2 + $0x40] sm:$0xff]  ;;  %v90_v3 = vld [vmem:[%s3553_s2 + $0x48] sm:$0xff]  ;;  %vm239_vm0 = vcmask 261120  }
  0x25   :  { %284 = vmatprep.mubr.bf16.mxu0 %v2715_v0  ;;  %357 = vmatprep.mubr.bf16.mxu1 %v2715_v0  ;;  %v93_v2 = vld [vmem:[%s3553_s2 + $0x60] sm:$0xff]  ;;  %v94_v5 = vld [vmem:[%s3553_s2 + $0x68] sm:$0xff]  ;;  %v91_v15 = vld [vmem:[%s3553_s2 + $0x50] sm:$0xff] }
  0x26   :  { %v2157_v4 = vcombine.high %v89_v1, %v93_v2  ;;  %v2156_v6 = vcombine.low %v89_v1, %v93_v2  ;;  %v81_v7 = vld [vmem:[%s3553_s2] sm:$0xff]  ;;  %v2159_v9 = vcombine.high %v90_v3, %v94_v5  ;;  %v2158_v10 = vcombine.low %v90_v3, %v94_v5  ;;  %v82_v12 = vld [vmem:[%s3553_s2 + $0x8] sm:$0xff]  ;;  %v95_v17 = vld [vmem:[%s3553_s2 + $0x70] sm:$0xff] }
  0x27   :  { %v85_v8 = vld [vmem:[%s3553_s2 + $0x20] sm:$0xff]  ;;  %v86_v13 = vld [vmem:[%s3553_s2 + $0x28] sm:$0xff]  ;;  %v92_v18 = vld [vmem:[%s3553_s2 + $0x58] sm:$0xff]  ;;  %v2161_v21 = vcombine.high %v91_v15, %v95_v17  ;;  %v2160_v27 = vcombine.low %v91_v15, %v95_v17 }
  0x28   :  { %v2149_v11 = vcombine.high %v81_v7, %v85_v8  ;;  %264 = vmatprep.subr.bf16.mxu0 %v2157_v4  ;;  %v2151_v14 = vcombine.high %v82_v12, %v86_v13  ;;  %337 = vmatprep.subr.bf16.mxu1 %v2159_v9  ;;  %v2148_v16 = vcombine.low %v81_v7, %v85_v8  ;;  %v96_v19 = vld [vmem:[%s3553_s2 + $0x78] sm:$0xff]  ;;  %v2827_v22 = vld [vmem:[%s3551_s0] sm:$0xff]   ;;  %v83_v24 = vld [vmem:[%s3553_s2 + $0x10] sm:$0xff] }
  0x29   :  { %265 = vmatpush1.bf16.msra.mxu0 %v2156_v6  ;;  %338 = vmatpush1.bf16.msra.mxu1 %v2158_v10  ;;  %v2150_v20 = vcombine.low %v82_v12, %v86_v13  ;;  %v2163_v23 = vcombine.high %v92_v18, %v96_v19  ;;  %v87_v25 = vld [vmem:[%s3553_s2 + $0x30] sm:$0xff]  ;;  %v84_v26 = vld [vmem:[%s3553_s2 + $0x18] sm:$0xff]  ;;  %v2162_v29 = vcombine.low %v92_v18, %v96_v19  ;;  %v624_v31 = vld [vmem:[#allocation4 + $0x40] sm:$0xff]  ;;  %v99_v10 = vlaneseq }
  0x2a   :  { %266 = vmatprep.subr.bf16.mxu0 %v2149_v11  ;;  %339 = vmatprep.subr.bf16.mxu1 %v2151_v14  ;;  %v88_v28 = vld [vmem:[%s3553_s2 + $0x38] sm:$0xff]  ;;  %v2153_v30 = vcombine.high %v83_v24, %v87_v25  ;;  %v628_v32 = vld [vmem:[#allocation4 + $0x60] sm:$0xff]  ;;  %v625_v34 = vld [vmem:[#allocation4 + $0x48] sm:$0xff]  ;;  %v2152_v36 = vcombine.low %v83_v24, %v87_v25 }
  0x2b   :  { %v2155_v33 = vcombine.high %v84_v26, %v88_v28  ;;  %v629_v35 = vld [vmem:[#allocation4 + $0x68] sm:$0xff]  ;;  %v2154_v37 = vcombine.low %v84_v26, %v88_v28  ;;  %v2193_v38 = vcombine.high %v624_v31, %v628_v32  ;;  %v2392_v41 = vld [vmem:[%s3551_s0 + $0x10] sm:$0xff]   ;;  %v2393_v42 = vld [vmem:[%s3551_s0 + $0x18] sm:$0xff]   ;;  %v2192_v45 = vcombine.low %v624_v31, %v628_v32 }
  0x2c   :  { %v2195_v39 = vcombine.high %v625_v34, %v629_v35  ;;  %v2391_v40 = vld [vmem:[%s3551_s0 + $0x8] sm:$0xff]   ;;  %v616_v43 = vld [vmem:[#allocation4] sm:$0xff]  ;;  %v2194_v48 = vcombine.low %v625_v34, %v629_v35  ;;  %v626_v50 = vld [vmem:[#allocation4 + $0x50] sm:$0xff]  ;;  %v2928_v11 = vshrl.u32 %v99_v10, 7 }
  0x2d   :  { %267 = vmatpush1.bf16.msra.mxu0 %v2148_v16  ;;  %340 = vmatpush1.bf16.msra.mxu1 %v2150_v20  ;;  %v620_v44 = vld [vmem:[#allocation4 + $0x20] sm:$0xff]  ;;  %v617_v46 = vld [vmem:[#allocation4 + $0x8] sm:$0xff]  ;;  %v630_v51 = vld [vmem:[#allocation4 + $0x70] sm:$0xff] }
  0x2e   :  { %410 = vmatprep.subr.bf16.mxu0 %v2161_v21  ;;  %483 = vmatprep.subr.bf16.mxu1 %v2163_v23  ;;  %v621_v47 = vld [vmem:[#allocation4 + $0x28] sm:$0xff]  ;;  %v2185_v49 = vcombine.high %v616_v43, %v620_v44  ;;  %v627_v53 = vld [vmem:[#allocation4 + $0x58] sm:$0xff]  ;;  %v2184_v55 = vcombine.low %v616_v43, %v620_v44  ;;  %v2197_v57 = vcombine.high %v626_v50, %v630_v51  ;;  %v2394_v59 = vld [vmem:[%s3552_s1] sm:$0xff]   ;;  %v101_v12 = vsub.s32 0, %v2928_v11 }
  0x2f   :  { %v2187_v52 = vcombine.high %v617_v46, %v621_v47  ;;  %v631_v54 = vld [vmem:[#allocation4 + $0x78] sm:$0xff]  ;;  %v2186_v56 = vcombine.low %v617_v46, %v621_v47  ;;  %v618_v60 = vld [vmem:[#allocation4 + $0x10] sm:$0xff]  ;;  %v2196_v62 = vcombine.low %v626_v50, %v630_v51  ;;  %v2395_v7 = vld [vmem:[%s3552_s1 + $0x8] sm:$0xff]   ;;  %v109_v14 = vsub.s32 2, %v2928_v11 }
  0x30   :  { %2164 = vmatmul.mubr.msk.bf16.vlgmr.msra.gmra.mxu0 %vm239_vm0, %v2827_v22  ;;  %2168 = vmatmul.mubr.msk.bf16.vlgmr.msra.gmra.mxu1 %vm239_vm0, %v2827_v22  ;;  %v2199_v58 = vcombine.high %v627_v53, %v631_v54  ;;  %v622_v61 = vld [vmem:[#allocation4 + $0x30] sm:$0xff]  ;;  %v619_v63 = vld [vmem:[#allocation4 + $0x18] sm:$0xff]  ;;  %v2198_v2 = vcombine.low %v627_v53, %v631_v54  ;;  %v2931_v13 = vld [vmem:[#allocation6] sm:$0xff]  ;;  %v105_v15 = vsub.s32 1, %v2928_v11  ;;  %v113_v16 = vsub.s32 3, %v2928_v11 }
  0x31   :  { %411 = vmatpush1.bf16.msra.mxu0 %v2160_v27  ;;  %484 = vmatpush1.bf16.msra.mxu1 %v2162_v29  ;;  %v623_v1 = vld [vmem:[#allocation4 + $0x38] sm:$0xff]  ;;  %v2189_v3 = vcombine.high %v618_v60, %v622_v61  ;;  %v2188_v5 = vcombine.low %v618_v60, %v622_v61  ;;  %v2396_v8 = vld [vmem:[%s3552_s1 + $0x10] sm:$0xff]   ;;  %v2944_v17 = vrot.slane %v2931_v13, %v109_v14 }
  0x32   :  { %294 = vmatprep.mubr.bf16.mxu0 %v2715_v0  ;;  %367 = vmatprep.mubr.bf16.mxu1 %v2715_v0  ;;  %v2191_v4 = vcombine.high %v619_v63, %v623_v1  ;;  %v2190_v6 = vcombine.low %v619_v63, %v623_v1  ;;  %v2397_v9 = vld [vmem:[%s3552_s1 + $0x18] sm:$0xff]   ;;  %v2949_v18 = vrot.slane %v2931_v13, %v105_v15  ;;  %s3162_s1 = smov 0  }
  0x33   :  { %412 = vmatprep.subr.bf16.mxu0 %v2153_v30  ;;  %485 = vmatprep.subr.bf16.mxu1 %v2155_v33  ;;  %v2954_v20 = vrot.slane %v2931_v13, %v113_v16 }
  0x35   :  { %413 = vmatpush1.bf16.msra.mxu0 %v2152_v36  ;;  %486 = vmatpush1.bf16.msra.mxu1 %v2154_v37 }
  0x36   :  { %798 = vmatprep.subr.bf16.mxu0 %v2193_v38  ;;  %871 = vmatprep.subr.bf16.mxu1 %v2195_v39 }
  0x38   :  { %2165 = vmatmul.mubr.msk.bf16.gmra.mxu0 %vm239_vm0, %v2391_v40  ;;  %2169 = vmatmul.mubr.msk.bf16.gmra.mxu1 %vm239_vm0, %v2391_v40 }
  0x39   :  { %304 = vmatprep.mubr.bf16.mxu0 %v2715_v0  ;;  %377 = vmatprep.mubr.bf16.mxu1 %v2715_v0 }
  0x40   :  { %2166 = vmatmul.mubr.msk.bf16.gmra.mxu0 %vm239_vm0, %v2392_v41  ;;  %2170 = vmatmul.mubr.msk.bf16.gmra.mxu1 %vm239_vm0, %v2392_v41 }
  0x41   :  { %314 = vmatprep.mubr.bf16.mxu0 %v2715_v0  ;;  %387 = vmatprep.mubr.bf16.mxu1 %v2715_v0 }
  0x48   :  { %2167 = vmatmul.mubr.msk.bf16.gmra.mxu0 %vm239_vm0, %v2393_v42  ;;  %2171 = vmatmul.mubr.msk.bf16.gmra.mxu1 %vm239_vm0, %v2393_v42 }
  0x49   :  { %430 = vmatprep.mubr.bf16.mxu0 %v2715_v0  ;;  %503 = vmatprep.mubr.bf16.mxu1 %v2715_v0 }
  0x50   :  { %2172 = vmatmul.mubr.msk.bf16.vlgmr.msra.gmra.mxu0 %vm239_vm0, %v2827_v22  ;;  %2176 = vmatmul.mubr.msk.bf16.vlgmr.msra.gmra.mxu1 %vm239_vm0, %v2827_v22 }
  0x51   :  { %799 = vmatpush1.bf16.msra.mxu0 %v2192_v45  ;;  %872 = vmatpush1.bf16.msra.mxu1 %v2194_v48 }
  0x52   :  { %440 = vmatprep.mubr.bf16.mxu0 %v2715_v0  ;;  %513 = vmatprep.mubr.bf16.mxu1 %v2715_v0 }
  0x53   :  { %800 = vmatprep.subr.bf16.mxu0 %v2185_v49  ;;  %873 = vmatprep.subr.bf16.mxu1 %v2187_v52 }
  0x55   :  { %801 = vmatpush1.bf16.msra.mxu0 %v2184_v55  ;;  %874 = vmatpush1.bf16.msra.mxu1 %v2186_v56 }
  0x56   :  { %944 = vmatprep.subr.bf16.mxu0 %v2197_v57  ;;  %1017 = vmatprep.subr.bf16.mxu1 %v2199_v58 }
  0x58   :  { %2173 = vmatmul.mubr.msk.bf16.gmra.mxu0 %vm239_vm0, %v2391_v40  ;;  %2177 = vmatmul.mubr.msk.bf16.gmra.mxu1 %vm239_vm0, %v2391_v40 }
  0x59   :  { %450 = vmatprep.mubr.bf16.mxu0 %v2715_v0  ;;  %523 = vmatprep.mubr.bf16.mxu1 %v2715_v0 }
  0x60   :  { %2174 = vmatmul.mubr.msk.bf16.gmra.mxu0 %vm239_vm0, %v2392_v41  ;;  %2178 = vmatmul.mubr.msk.bf16.gmra.mxu1 %vm239_vm0, %v2392_v41 }
  0x61   :  { %460 = vmatprep.mubr.bf16.mxu0 %v2715_v0  ;;  %533 = vmatprep.mubr.bf16.mxu1 %v2715_v0 }
  0x68   :  { %2175 = vmatmul.mubr.msk.bf16.gmra.mxu0 %vm239_vm0, %v2393_v42  ;;  %2179 = vmatmul.mubr.msk.bf16.gmra.mxu1 %vm239_vm0, %v2393_v42 }
  0x69   :  { %818 = vmatprep.mubr.bf16.mxu0 %v2715_v0  ;;  %891 = vmatprep.mubr.bf16.mxu1 %v2715_v0 }
  0x70   :  { %2200 = vmatmul.mubr.msk.bf16.vlgmr.msra.gmra.mxu0 %vm239_vm0, %v2394_v59  ;;  %2204 = vmatmul.mubr.msk.bf16.vlgmr.msra.gmra.mxu1 %vm239_vm0, %v2394_v59 }
  0x71   :  { %945 = vmatpush1.bf16.msra.mxu0 %v2196_v62  ;;  %1018 = vmatpush1.bf16.msra.mxu1 %v2198_v2 }
  0x72   :  { %828 = vmatprep.mubr.bf16.mxu0 %v2715_v0  ;;  %901 = vmatprep.mubr.bf16.mxu1 %v2715_v0 }
  0x73   :  { %946 = vmatprep.subr.bf16.mxu0 %v2189_v3  ;;  %1019 = vmatprep.subr.bf16.mxu1 %v2191_v4 }
  0x75   :  { %947 = vmatpush1.bf16.msra.mxu0 %v2188_v5  ;;  %1020 = vmatpush1.bf16.msra.mxu1 %v2190_v6 }
  0x78   :  { %2201 = vmatmul.mubr.msk.bf16.gmra.mxu0 %vm239_vm0, %v2395_v7  ;;  %2205 = vmatmul.mubr.msk.bf16.gmra.mxu1 %vm239_vm0, %v2395_v7 }
  0x79   :  { %838 = vmatprep.mubr.bf16.mxu0 %v2715_v0  ;;  %911 = vmatprep.mubr.bf16.mxu1 %v2715_v0 }
  0x80   :  { %2202 = vmatmul.mubr.msk.bf16.gmra.mxu0 %vm239_vm0, %v2396_v8  ;;  %2206 = vmatmul.mubr.msk.bf16.gmra.mxu1 %vm239_vm0, %v2396_v8 }
  0x81   :  { %848 = vmatprep.mubr.bf16.mxu0 %v2715_v0  ;;  %921 = vmatprep.mubr.bf16.mxu1 %v2715_v0 }
  0x88   :  { %2203 = vmatmul.mubr.msk.bf16.gmra.mxu0 %vm239_vm0, %v2397_v9  ;;  %2207 = vmatmul.mubr.msk.bf16.gmra.mxu1 %vm239_vm0, %v2397_v9 }
  0x89   :  { %964 = vmatprep.mubr.bf16.mxu0 %v2715_v0  ;;  %1037 = vmatprep.mubr.bf16.mxu1 %v2715_v0 }
  0x90   :  { %2208 = vmatmul.mubr.msk.bf16.vlgmr.msra.gmra.mxu0 %vm239_vm0, %v2394_v59  ;;  %2212 = vmatmul.mubr.msk.bf16.vlgmr.msra.gmra.mxu1 %vm239_vm0, %v2394_v59 }
  0x91   :  { %974 = vmatprep.mubr.bf16.mxu0 %v2715_v0  ;;  %1047 = vmatprep.mubr.bf16.mxu1 %v2715_v0 }
  0x98   :  { %2209 = vmatmul.mubr.msk.bf16.gmra.mxu0 %vm239_vm0, %v2395_v7  ;;  %2213 = vmatmul.mubr.msk.bf16.gmra.mxu1 %vm239_vm0, %v2395_v7 }
  0x99   :  { %984 = vmatprep.mubr.bf16.mxu0 %v2715_v0  ;;  %1057 = vmatprep.mubr.bf16.mxu1 %v2715_v0 }
  0xa0   :  { %2210 = vmatmul.mubr.msk.bf16.gmra.mxu0 %vm239_vm0, %v2396_v8  ;;  %2214 = vmatmul.mubr.msk.bf16.gmra.mxu1 %vm239_vm0, %v2396_v8  ;;  %v117_v8 = vsub.s32 4, %v2928_v11 }
  0xa1   :  { %994 = vmatprep.mubr.bf16.mxu0 %v2715_v0  ;;  %1067 = vmatprep.mubr.bf16.mxu1 %v2715_v0  ;;  %v2939_v0 = vrot.slane %v2931_v13, %v101_v12 }
  0xa8   :  { %2211 = vmatmul.mubr.msk.bf16.gmra.mxu0 %vm239_vm0, %v2397_v9  ;;  %2215 = vmatmul.mubr.msk.bf16.gmra.mxu1 %vm239_vm0, %v2397_v9 }
  0xf0   :  { %v286_v19 = vpop.f32.mrf.mxu0  ;;  %v359_v22 = vpop.f32.mrf.mxu1 }
  0xf1   :  { %v287_v21 = vadd.f32 %v286_v19, %v2939_v0  ;;  %v360_v23 = vadd.f32 %v359_v22, %v2944_v17  ;;  %v125_v19 = vsub.s32 6, %v2928_v11 }
  0xf2   :  { %v288_v24 = vpop.f32.mrf.mxu0  ;;  %v361_v26 = vpop.f32.mrf.mxu1 }
  0xf3   :  { %544 = vst [vmem:[#allocation2] sm:$0xff] %v287_v21  ;;  %v289_v25 = vadd.f32 %v288_v24, %v2949_v18  ;;  %546 = vst [vmem:[#allocation2 + $0x10] sm:$0xff] %v360_v23  ;;  %v362_v27 = vadd.f32 %v361_v26, %v2954_v20  ;;  %v121_v23 = vsub.s32 5, %v2928_v11  ;;  %v129_v26 = vsub.s32 7, %v2928_v11 }
  0xf4   :  { %v290_v28 = vpop.f32.mrf.mxu0  ;;  %v363_v30 = vpop.f32.mrf.mxu1 }
  0xf5   :  { %545 = vst [vmem:[#allocation2 + $0x8] sm:$0xff] %v289_v25  ;;  %v291_v29 = vadd.f32 %v290_v28, %v2939_v0  ;;  %547 = vst [vmem:[#allocation2 + $0x18] sm:$0xff] %v362_v27  ;;  %v364_v31 = vadd.f32 %v363_v30, %v2944_v17 }
  0xf6   :  { %v292_v32 = vpop.f32.mrf.mxu0  ;;  %v365_v34 = vpop.f32.mrf.mxu1 }
  0xf7   :  { %552 = vst [vmem:[#allocation2 + $0x40] sm:$0xff] %v291_v29  ;;  %v293_v33 = vadd.f32 %v292_v32, %v2949_v18  ;;  %554 = vst [vmem:[#allocation2 + $0x50] sm:$0xff] %v364_v31  ;;  %v366_v35 = vadd.f32 %v365_v34, %v2954_v20  ;;  %v2992_v29 = vrot.slane %v2931_v13, %v117_v8 }
  0xf8   :  { %v296_v36 = vpop.f32.mrf.mxu0  ;;  %v369_v38 = vpop.f32.mrf.mxu1  ;;  %v2998_v32 = vrot.slane %v2931_v13, %v125_v19 }
  0xf9   :  { %553 = vst [vmem:[#allocation2 + $0x48] sm:$0xff] %v293_v33  ;;  %v297_v37 = vadd.f32 %v296_v36, %v2939_v0  ;;  %555 = vst [vmem:[#allocation2 + $0x58] sm:$0xff] %v366_v35  ;;  %v370_v39 = vadd.f32 %v369_v38, %v2944_v17 }
  0xfa   :  { %v298_v40 = vpop.f32.mrf.mxu0  ;;  %v371_v42 = vpop.f32.mrf.mxu1 }
  0xfb   :  { %560 = vst [vmem:[#allocation2 + $0x80] sm:$0xff] %v297_v37  ;;  %v299_v41 = vadd.f32 %v298_v40, %v2949_v18  ;;  %562 = vst [vmem:[#allocation2 + $0x90] sm:$0xff] %v370_v39  ;;  %v372_v43 = vadd.f32 %v371_v42, %v2954_v20 }
  0xfc   :  { %v300_v44 = vpop.f32.mrf.mxu0  ;;  %v373_v46 = vpop.f32.mrf.mxu1 }
  0xfd   :  { %561 = vst [vmem:[#allocation2 + $0x88] sm:$0xff] %v299_v41  ;;  %v301_v45 = vadd.f32 %v300_v44, %v2939_v0  ;;  %563 = vst [vmem:[#allocation2 + $0x98] sm:$0xff] %v372_v43  ;;  %v374_v47 = vadd.f32 %v373_v46, %v2944_v17 }
  0xfe   :  { %v302_v48 = vpop.f32.mrf.mxu0  ;;  %v375_v50 = vpop.f32.mrf.mxu1 }
  0xff   :  { %568 = vst [vmem:[#allocation2 + $0xc0] sm:$0xff] %v301_v45  ;;  %v303_v49 = vadd.f32 %v302_v48, %v2949_v18  ;;  %570 = vst [vmem:[#allocation2 + $0xd0] sm:$0xff] %v374_v47  ;;  %v376_v51 = vadd.f32 %v375_v50, %v2954_v20 }
 0x100   :  { %v306_v52 = vpop.f32.mrf.mxu0  ;;  %v379_v54 = vpop.f32.mrf.mxu1 }
 0x101   :  { %569 = vst [vmem:[#allocation2 + $0xc8] sm:$0xff] %v303_v49  ;;  %v307_v53 = vadd.f32 %v306_v52, %v2939_v0  ;;  %571 = vst [vmem:[#allocation2 + $0xd8] sm:$0xff] %v376_v51  ;;  %v380_v55 = vadd.f32 %v379_v54, %v2944_v17 }
 0x102   :  { %v308_v56 = vpop.f32.mrf.mxu0  ;;  %v381_v58 = vpop.f32.mrf.mxu1 }
 0x103   :  { %576 = vst [vmem:[#allocation2 + $0x100] sm:$0xff] %v307_v53  ;;  %v309_v57 = vadd.f32 %v308_v56, %v2949_v18  ;;  %578 = vst [vmem:[#allocation2 + $0x110] sm:$0xff] %v380_v55  ;;  %v382_v59 = vadd.f32 %v381_v58, %v2954_v20 }
 0x104   :  { %v310_v60 = vpop.f32.mrf.mxu0  ;;  %v383_v62 = vpop.f32.mrf.mxu1 }
 0x105   :  { %577 = vst [vmem:[#allocation2 + $0x108] sm:$0xff] %v309_v57  ;;  %v311_v61 = vadd.f32 %v310_v60, %v2939_v0  ;;  %579 = vst [vmem:[#allocation2 + $0x118] sm:$0xff] %v382_v59  ;;  %v384_v63 = vadd.f32 %v383_v62, %v2944_v17 }
 0x106   :  { %v312_v1 = vpop.f32.mrf.mxu0  ;;  %v385_v3 = vpop.f32.mrf.mxu1 }
 0x107   :  { %584 = vst [vmem:[#allocation2 + $0x140] sm:$0xff] %v311_v61  ;;  %v313_v2 = vadd.f32 %v312_v1, %v2949_v18  ;;  %586 = vst [vmem:[#allocation2 + $0x150] sm:$0xff] %v384_v63  ;;  %v386_v4 = vadd.f32 %v385_v3, %v2954_v20 }
 0x108   :  { %v316_v5 = vpop.f32.mrf.mxu0  ;;  %v389_v7 = vpop.f32.mrf.mxu1 }
 0x109   :  { %585 = vst [vmem:[#allocation2 + $0x148] sm:$0xff] %v313_v2  ;;  %v317_v6 = vadd.f32 %v316_v5, %v2939_v0  ;;  %587 = vst [vmem:[#allocation2 + $0x158] sm:$0xff] %v386_v4  ;;  %v390_v9 = vadd.f32 %v389_v7, %v2944_v17 }
 0x10a   :  { %v318_v10 = vpop.f32.mrf.mxu0  ;;  %v391_v22 = vpop.f32.mrf.mxu1 }
 0x10b   :  { %592 = vst [vmem:[#allocation2 + $0x180] sm:$0xff] %v317_v6  ;;  %v319_v21 = vadd.f32 %v318_v10, %v2949_v18  ;;  %594 = vst [vmem:[#allocation2 + $0x190] sm:$0xff] %v390_v9  ;;  %v392_v24 = vadd.f32 %v391_v22, %v2954_v20 }
 0x10c   :  { %v320_v25 = vpop.f32.mrf.mxu0  ;;  %v393_v28 = vpop.f32.mrf.mxu1 }
 0x10d   :  { %593 = vst [vmem:[#allocation2 + $0x188] sm:$0xff] %v319_v21  ;;  %v321_v27 = vadd.f32 %v320_v25, %v2939_v0  ;;  %595 = vst [vmem:[#allocation2 + $0x198] sm:$0xff] %v392_v24  ;;  %v394_v30 = vadd.f32 %v393_v28, %v2944_v17  ;;  %v3004_v0 = vrot.slane %v2931_v13, %v121_v23 }
 0x10e   :  { %v322_v31 = vpop.f32.mrf.mxu0  ;;  %v395_v34 = vpop.f32.mrf.mxu1  ;;  %v3010_v17 = vrot.slane %v2931_v13, %v129_v26 }
 0x10f   :  { %600 = vst [vmem:[#allocation2 + $0x1c0] sm:$0xff] %v321_v27  ;;  %v323_v33 = vadd.f32 %v322_v31, %v2949_v18  ;;  %602 = vst [vmem:[#allocation2 + $0x1d0] sm:$0xff] %v394_v30  ;;  %v396_v35 = vadd.f32 %v395_v34, %v2954_v20 }
 0x110   :  { %v432_v36 = vpop.f32.mrf.mxu0  ;;  %v505_v38 = vpop.f32.mrf.mxu1 }
 0x111   :  { %601 = vst [vmem:[#allocation2 + $0x1c8] sm:$0xff] %v323_v33  ;;  %v433_v37 = vadd.f32 %v432_v36, %v2992_v29  ;;  %603 = vst [vmem:[#allocation2 + $0x1d8] sm:$0xff] %v396_v35  ;;  %v506_v18 = vadd.f32 %v505_v38, %v2998_v32  ;;  %v3038_v38 = vld [vmem:[#allocation8] sm:$0xff] }
 0x112   :  { %v434_v39 = vpop.f32.mrf.mxu0  ;;  %v507_v41 = vpop.f32.mrf.mxu1 }
 0x113   :  { %548 = vst [vmem:[#allocation2 + $0x20] sm:$0xff] %v433_v37  ;;  %v435_v40 = vadd.f32 %v434_v39, %v3004_v0  ;;  %550 = vst [vmem:[#allocation2 + $0x30] sm:$0xff] %v506_v18  ;;  %v508_v20 = vadd.f32 %v507_v41, %v3010_v17 }
 0x114   :  { %v436_v42 = vpop.f32.mrf.mxu0  ;;  %v509_v43 = vpop.f32.mrf.mxu1 }
 0x115   :  { %549 = vst [vmem:[#allocation2 + $0x28] sm:$0xff] %v435_v40  ;;  %v437_v13 = vadd.f32 %v436_v42, %v2992_v29  ;;  %551 = vst [vmem:[#allocation2 + $0x38] sm:$0xff] %v508_v20  ;;  %v510_v44 = vadd.f32 %v509_v43, %v2998_v32 }
 0x116   :  { %v438_v45 = vpop.f32.mrf.mxu0  ;;  %v511_v47 = vpop.f32.mrf.mxu1 }
 0x117   :  { %556 = vst [vmem:[#allocation2 + $0x60] sm:$0xff] %v437_v13  ;;  %v439_v46 = vadd.f32 %v438_v45, %v3004_v0  ;;  %558 = vst [vmem:[#allocation2 + $0x70] sm:$0xff] %v510_v44  ;;  %v512_v48 = vadd.f32 %v511_v47, %v3010_v17  ;;  %v3046_v13 = vrot.slane %v3038_v38, %v101_v12 }
 0x118   :  { %v442_v49 = vpop.f32.mrf.mxu0  ;;  %v515_v51 = vpop.f32.mrf.mxu1  ;;  %v3052_v45 = vrot.slane %v3038_v38, %v109_v14 }
 0x119   :  { %557 = vst [vmem:[#allocation2 + $0x68] sm:$0xff] %v439_v46  ;;  %v443_v50 = vadd.f32 %v442_v49, %v2992_v29  ;;  %559 = vst [vmem:[#allocation2 + $0x78] sm:$0xff] %v512_v48  ;;  %v516_v52 = vadd.f32 %v515_v51, %v2998_v32 }
 0x11a   :  { %v444_v53 = vpop.f32.mrf.mxu0  ;;  %v517_v55 = vpop.f32.mrf.mxu1 }
 0x11b   :  { %564 = vst [vmem:[#allocation2 + $0xa0] sm:$0xff] %v443_v50  ;;  %v445_v54 = vadd.f32 %v444_v53, %v3004_v0  ;;  %566 = vst [vmem:[#allocation2 + $0xb0] sm:$0xff] %v516_v52  ;;  %v518_v56 = vadd.f32 %v517_v55, %v3010_v17 }
 0x11c   :  { %v446_v57 = vpop.f32.mrf.mxu0  ;;  %v519_v59 = vpop.f32.mrf.mxu1 }
 0x11d   :  { %565 = vst [vmem:[#allocation2 + $0xa8] sm:$0xff] %v445_v54  ;;  %v447_v58 = vadd.f32 %v446_v57, %v2992_v29  ;;  %567 = vst [vmem:[#allocation2 + $0xb8] sm:$0xff] %v518_v56  ;;  %v520_v60 = vadd.f32 %v519_v59, %v2998_v32 }
 0x11e   :  { %v448_v61 = vpop.f32.mrf.mxu0  ;;  %v521_v63 = vpop.f32.mrf.mxu1 }
 0x11f   :  { %572 = vst [vmem:[#allocation2 + $0xe0] sm:$0xff] %v447_v58  ;;  %v449_v62 = vadd.f32 %v448_v61, %v3004_v0  ;;  %574 = vst [vmem:[#allocation2 + $0xf0] sm:$0xff] %v520_v60  ;;  %v522_v1 = vadd.f32 %v521_v63, %v3010_v17 }
 0x120   :  { %v452_v2 = vpop.f32.mrf.mxu0  ;;  %v525_v4 = vpop.f32.mrf.mxu1 }
 0x121   :  { %573 = vst [vmem:[#allocation2 + $0xe8] sm:$0xff] %v449_v62  ;;  %v453_v3 = vadd.f32 %v452_v2, %v2992_v29  ;;  %575 = vst [vmem:[#allocation2 + $0xf8] sm:$0xff] %v522_v1  ;;  %v526_v5 = vadd.f32 %v525_v4, %v2998_v32 }
 0x122   :  { %v454_v6 = vpop.f32.mrf.mxu0  ;;  %v527_v9 = vpop.f32.mrf.mxu1 }
 0x123   :  { %580 = vst [vmem:[#allocation2 + $0x120] sm:$0xff] %v453_v3  ;;  %v455_v7 = vadd.f32 %v454_v6, %v3004_v0  ;;  %582 = vst [vmem:[#allocation2 + $0x130] sm:$0xff] %v526_v5  ;;  %v528_v10 = vadd.f32 %v527_v9, %v3010_v17 }
 0x124   :  { %v456_v21 = vpop.f32.mrf.mxu0  ;;  %v529_v24 = vpop.f32.mrf.mxu1 }
 0x125   :  { %581 = vst [vmem:[#allocation2 + $0x128] sm:$0xff] %v455_v7  ;;  %v457_v22 = vadd.f32 %v456_v21, %v2992_v29  ;;  %583 = vst [vmem:[#allocation2 + $0x138] sm:$0xff] %v528_v10  ;;  %v530_v25 = vadd.f32 %v529_v24, %v2998_v32 }
 0x126   :  { %v458_v27 = vpop.f32.mrf.mxu0  ;;  %v531_v30 = vpop.f32.mrf.mxu1 }
 0x127   :  { %588 = vst [vmem:[#allocation2 + $0x160] sm:$0xff] %v457_v22  ;;  %v459_v28 = vadd.f32 %v458_v27, %v3004_v0  ;;  %590 = vst [vmem:[#allocation2 + $0x170] sm:$0xff] %v530_v25  ;;  %v532_v31 = vadd.f32 %v531_v30, %v3010_v17 }
 0x128   :  { %v462_v33 = vpop.f32.mrf.mxu0  ;;  %v535_v35 = vpop.f32.mrf.mxu1 }
 0x129   :  { %589 = vst [vmem:[#allocation2 + $0x168] sm:$0xff] %v459_v28  ;;  %v463_v34 = vadd.f32 %v462_v33, %v2992_v29  ;;  %591 = vst [vmem:[#allocation2 + $0x178] sm:$0xff] %v532_v31  ;;  %v536_v36 = vadd.f32 %v535_v35, %v2998_v32 }
 0x12a   :  { %v464_v37 = vpop.f32.mrf.mxu0  ;;  %v537_v39 = vpop.f32.mrf.mxu1 }
 0x12b   :  { %596 = vst [vmem:[#allocation2 + $0x1a0] sm:$0xff] %v463_v34  ;;  %v465_v18 = vadd.f32 %v464_v37, %v3004_v0  ;;  %598 = vst [vmem:[#allocation2 + $0x1b0] sm:$0xff] %v536_v36  ;;  %v538_v40 = vadd.f32 %v537_v39, %v3010_v17 }
 0x12c   :  { %v466_v41 = vpop.f32.mrf.mxu0  ;;  %v539_v42 = vpop.f32.mrf.mxu1 }
 0x12d   :  { %597 = vst [vmem:[#allocation2 + $0x1a8] sm:$0xff] %v465_v18  ;;  %v467_v20 = vadd.f32 %v466_v41, %v2992_v29  ;;  %599 = vst [vmem:[#allocation2 + $0x1b8] sm:$0xff] %v538_v40  ;;  %v540_v43 = vadd.f32 %v539_v42, %v2998_v32  ;;  %v3058_v29 = vrot.slane %v3038_v38, %v105_v15 }
 0x12e   :  { %v468_v44 = vpop.f32.mrf.mxu0  ;;  %v541_v47 = vpop.f32.mrf.mxu1  ;;  %v3064_v32 = vrot.slane %v3038_v38, %v113_v16 }
 0x12f   :  { %604 = vst [vmem:[#allocation2 + $0x1e0] sm:$0xff] %v467_v20  ;;  %v469_v46 = vadd.f32 %v468_v44, %v3004_v0  ;;  %606 = vst [vmem:[#allocation2 + $0x1f0] sm:$0xff] %v540_v43  ;;  %v542_v12 = vadd.f32 %v541_v47, %v3010_v17 }
 0x130   :  { %v820_v48 = vpop.f32.mrf.mxu0  ;;  %v893_v49 = vpop.f32.mrf.mxu1 }
 0x131   :  { %605 = vst [vmem:[#allocation2 + $0x1e8] sm:$0xff] %v469_v46  ;;  %v821_v14 = vadd.f32 %v820_v48, %v3046_v13  ;;  %607 = vst [vmem:[#allocation2 + $0x1f8] sm:$0xff] %v542_v12  ;;  %v894_v0 = vadd.f32 %v893_v49, %v3052_v45 }
 0x132   :  { %v822_v50 = vpop.f32.mrf.mxu0  ;;  %v895_v51 = vpop.f32.mrf.mxu1 }
 0x133   :  { %1078 = vst [vmem:[#allocation3] sm:$0xff] %v821_v14  ;;  %v823_v15 = vadd.f32 %v822_v50, %v3058_v29  ;;  %1080 = vst [vmem:[#allocation3 + $0x10] sm:$0xff] %v894_v0  ;;  %v896_v17 = vadd.f32 %v895_v51, %v3064_v32 }
 0x134   :  { %v824_v52 = vpop.f32.mrf.mxu0  ;;  %v897_v53 = vpop.f32.mrf.mxu1 }
 0x135   :  { %1079 = vst [vmem:[#allocation3 + $0x8] sm:$0xff] %v823_v15  ;;  %v825_v16 = vadd.f32 %v824_v52, %v3046_v13  ;;  %1081 = vst [vmem:[#allocation3 + $0x18] sm:$0xff] %v896_v17  ;;  %v898_v54 = vadd.f32 %v897_v53, %v3052_v45  ;;  %v3098_v15 = vrot.slane %v3038_v38, %v117_v8 }
 0x136   :  { %v826_v55 = vpop.f32.mrf.mxu0  ;;  %v899_v57 = vpop.f32.mrf.mxu1  ;;  %v3104_v52 = vrot.slane %v3038_v38, %v125_v19 }
 0x137   :  { %1086 = vst [vmem:[#allocation3 + $0x40] sm:$0xff] %v825_v16  ;;  %v827_v56 = vadd.f32 %v826_v55, %v3058_v29  ;;  %1088 = vst [vmem:[#allocation3 + $0x50] sm:$0xff] %v898_v54  ;;  %v900_v58 = vadd.f32 %v899_v57, %v3064_v32 }
 0x138   :  { %v830_v59 = vpop.f32.mrf.mxu0  ;;  %v903_v61 = vpop.f32.mrf.mxu1 }
 0x139   :  { %1087 = vst [vmem:[#allocation3 + $0x48] sm:$0xff] %v827_v56  ;;  %v831_v60 = vadd.f32 %v830_v59, %v3046_v13  ;;  %1089 = vst [vmem:[#allocation3 + $0x58] sm:$0xff] %v900_v58  ;;  %v904_v62 = vadd.f32 %v903_v61, %v3052_v45 }
 0x13a   :  { %v832_v63 = vpop.f32.mrf.mxu0  ;;  %v905_v2 = vpop.f32.mrf.mxu1 }
 0x13b   :  { %1094 = vst [vmem:[#allocation3 + $0x80] sm:$0xff] %v831_v60  ;;  %v833_v1 = vadd.f32 %v832_v63, %v3058_v29  ;;  %1096 = vst [vmem:[#allocation3 + $0x90] sm:$0xff] %v904_v62  ;;  %v906_v3 = vadd.f32 %v905_v2, %v3064_v32 }
 0x13c   :  { %v834_v4 = vpop.f32.mrf.mxu0  ;;  %v907_v6 = vpop.f32.mrf.mxu1 }
 0x13d   :  { %1095 = vst [vmem:[#allocation3 + $0x88] sm:$0xff] %v833_v1  ;;  %v835_v5 = vadd.f32 %v834_v4, %v3046_v13  ;;  %1097 = vst [vmem:[#allocation3 + $0x98] sm:$0xff] %v906_v3  ;;  %v908_v7 = vadd.f32 %v907_v6, %v3052_v45 }
 0x13e   :  { %v836_v9 = vpop.f32.mrf.mxu0  ;;  %v909_v21 = vpop.f32.mrf.mxu1 }
 0x13f   :  { %1102 = vst [vmem:[#allocation3 + $0xc0] sm:$0xff] %v835_v5  ;;  %v837_v10 = vadd.f32 %v836_v9, %v3058_v29  ;;  %1104 = vst [vmem:[#allocation3 + $0xd0] sm:$0xff] %v908_v7  ;;  %v910_v22 = vadd.f32 %v909_v21, %v3064_v32 }
 0x140   :  { %v840_v24 = vpop.f32.mrf.mxu0  ;;  %v913_v27 = vpop.f32.mrf.mxu1 }
 0x141   :  { %1103 = vst [vmem:[#allocation3 + $0xc8] sm:$0xff] %v837_v10  ;;  %v841_v25 = vadd.f32 %v840_v24, %v3046_v13  ;;  %1105 = vst [vmem:[#allocation3 + $0xd8] sm:$0xff] %v910_v22  ;;  %v914_v28 = vadd.f32 %v913_v27, %v3052_v45 }
 0x142   :  { %v842_v30 = vpop.f32.mrf.mxu0  ;;  %v915_v33 = vpop.f32.mrf.mxu1 }
 0x143   :  { %1110 = vst [vmem:[#allocation3 + $0x100] sm:$0xff] %v841_v25  ;;  %v843_v31 = vadd.f32 %v842_v30, %v3058_v29  ;;  %1112 = vst [vmem:[#allocation3 + $0x110] sm:$0xff] %v914_v28  ;;  %v916_v34 = vadd.f32 %v915_v33, %v3064_v32 }
 0x144   :  { %v844_v35 = vpop.f32.mrf.mxu0  ;;  %v917_v37 = vpop.f32.mrf.mxu1 }
 0x145   :  { %1111 = vst [vmem:[#allocation3 + $0x108] sm:$0xff] %v843_v31  ;;  %v845_v36 = vadd.f32 %v844_v35, %v3046_v13  ;;  %1113 = vst [vmem:[#allocation3 + $0x118] sm:$0xff] %v916_v34  ;;  %v918_v18 = vadd.f32 %v917_v37, %v3052_v45 }
 0x146   :  { %v846_v39 = vpop.f32.mrf.mxu0  ;;  %v919_v41 = vpop.f32.mrf.mxu1 }
 0x147   :  { %1118 = vst [vmem:[#allocation3 + $0x140] sm:$0xff] %v845_v36  ;;  %v847_v40 = vadd.f32 %v846_v39, %v3058_v29  ;;  %1120 = vst [vmem:[#allocation3 + $0x150] sm:$0xff] %v918_v18  ;;  %v920_v20 = vadd.f32 %v919_v41, %v3064_v32 }
 0x148   :  { %v850_v42 = vpop.f32.mrf.mxu0  ;;  %v923_v44 = vpop.f32.mrf.mxu1 }
 0x149   :  { %1119 = vst [vmem:[#allocation3 + $0x148] sm:$0xff] %v847_v40  ;;  %v851_v43 = vadd.f32 %v850_v42, %v3046_v13  ;;  %1121 = vst [vmem:[#allocation3 + $0x158] sm:$0xff] %v920_v20  ;;  %v924_v46 = vadd.f32 %v923_v44, %v3052_v45 }
 0x14a   :  { %v852_v47 = vpop.f32.mrf.mxu0  ;;  %v925_v48 = vpop.f32.mrf.mxu1 }
 0x14b   :  { %1126 = vst [vmem:[#allocation3 + $0x180] sm:$0xff] %v851_v43  ;;  %v853_v12 = vadd.f32 %v852_v47, %v3058_v29  ;;  %1128 = vst [vmem:[#allocation3 + $0x190] sm:$0xff] %v924_v46  ;;  %v926_v14 = vadd.f32 %v925_v48, %v3064_v32 }
 0x14c   :  { %v854_v49 = vpop.f32.mrf.mxu0  ;;  %v927_v50 = vpop.f32.mrf.mxu1 }
 0x14d   :  { %1127 = vst [vmem:[#allocation3 + $0x188] sm:$0xff] %v853_v12  ;;  %v855_v0 = vadd.f32 %v854_v49, %v3046_v13  ;;  %1129 = vst [vmem:[#allocation3 + $0x198] sm:$0xff] %v926_v14  ;;  %v928_v51 = vadd.f32 %v927_v50, %v3052_v45  ;;  %v3110_v13 = vrot.slane %v3038_v38, %v121_v23 }
 0x14e   :  { %v856_v17 = vpop.f32.mrf.mxu0  ;;  %v929_v53 = vpop.f32.mrf.mxu1  ;;  %v3116_v45 = vrot.slane %v3038_v38, %v129_v26 }
 0x14f   :  { %1134 = vst [vmem:[#allocation3 + $0x1c0] sm:$0xff] %v855_v0  ;;  %v857_v16 = vadd.f32 %v856_v17, %v3058_v29  ;;  %1136 = vst [vmem:[#allocation3 + $0x1d0] sm:$0xff] %v928_v51  ;;  %v930_v8 = vadd.f32 %v929_v53, %v3064_v32 }
 0x150   :  { %v966_v54 = vpop.f32.mrf.mxu0  ;;  %v1039_v55 = vpop.f32.mrf.mxu1 }
 0x151   :  { %1135 = vst [vmem:[#allocation3 + $0x1c8] sm:$0xff] %v857_v16  ;;  %v967_v19 = vadd.f32 %v966_v54, %v3098_v15  ;;  %1137 = vst [vmem:[#allocation3 + $0x1d8] sm:$0xff] %v930_v8  ;;  %v1040_v29 = vadd.f32 %v1039_v55, %v3104_v52 }
 0x152   :  { %v968_v56 = vpop.f32.mrf.mxu0  ;;  %v1041_v57 = vpop.f32.mrf.mxu1 }
 0x153   :  { %1082 = vst [vmem:[#allocation3 + $0x20] sm:$0xff] %v967_v19  ;;  %v969_v23 = vadd.f32 %v968_v56, %v3110_v13  ;;  %1084 = vst [vmem:[#allocation3 + $0x30] sm:$0xff] %v1040_v29  ;;  %v1042_v32 = vadd.f32 %v1041_v57, %v3116_v45  ;;  %v3150_v56 = vmov 0.0   ;;  %v3154_v57 = vmov 0.0  }
 0x154   :  { %v970_v58 = vpop.f32.mrf.mxu0  ;;  %v1043_v26 = vpop.f32.mrf.mxu1 }
 0x155   :  { %1083 = vst [vmem:[#allocation3 + $0x28] sm:$0xff] %v969_v23  ;;  %v971_v11 = vadd.f32 %v970_v58, %v3098_v15  ;;  %1085 = vst [vmem:[#allocation3 + $0x38] sm:$0xff] %v1042_v32  ;;  %v1044_v38 = vadd.f32 %v1043_v26, %v3104_v52  ;;  %v3152_v23 = vmov 0.0   ;;  %v3158_v32 = vmov 0.0  }
 0x156   :  { %v972_v59 = vpop.f32.mrf.mxu0  ;;  %v1045_v61 = vpop.f32.mrf.mxu1 }
 0x157   :  { %1090 = vst [vmem:[#allocation3 + $0x60] sm:$0xff] %v971_v11  ;;  %v973_v60 = vadd.f32 %v972_v59, %v3110_v13  ;;  %1092 = vst [vmem:[#allocation3 + $0x70] sm:$0xff] %v1044_v38  ;;  %v1046_v62 = vadd.f32 %v1045_v61, %v3116_v45 }
 0x158   :  { %v976_v63 = vpop.f32.mrf.mxu0  ;;  %v1049_v2 = vpop.f32.mrf.mxu1 }
 0x159   :  { %1091 = vst [vmem:[#allocation3 + $0x68] sm:$0xff] %v973_v60  ;;  %v977_v1 = vadd.f32 %v976_v63, %v3098_v15  ;;  %1093 = vst [vmem:[#allocation3 + $0x78] sm:$0xff] %v1046_v62  ;;  %v1050_v3 = vadd.f32 %v1049_v2, %v3104_v52 }
 0x15a   :  { %v978_v4 = vpop.f32.mrf.mxu0  ;;  %v1051_v6 = vpop.f32.mrf.mxu1 }
 0x15b   :  { %1098 = vst [vmem:[#allocation3 + $0xa0] sm:$0xff] %v977_v1  ;;  %v979_v5 = vadd.f32 %v978_v4, %v3110_v13  ;;  %1100 = vst [vmem:[#allocation3 + $0xb0] sm:$0xff] %v1050_v3  ;;  %v1052_v7 = vadd.f32 %v1051_v6, %v3116_v45 }
 0x15c   :  { %v980_v9 = vpop.f32.mrf.mxu0  ;;  %v1053_v21 = vpop.f32.mrf.mxu1 }
 0x15d   :  { %1099 = vst [vmem:[#allocation3 + $0xa8] sm:$0xff] %v979_v5  ;;  %v981_v10 = vadd.f32 %v980_v9, %v3098_v15  ;;  %1101 = vst [vmem:[#allocation3 + $0xb8] sm:$0xff] %v1052_v7  ;;  %v1054_v22 = vadd.f32 %v1053_v21, %v3104_v52 }
 0x15e   :  { %v982_v24 = vpop.f32.mrf.mxu0  ;;  %v1055_v27 = vpop.f32.mrf.mxu1 }
 0x15f   :  { %1106 = vst [vmem:[#allocation3 + $0xe0] sm:$0xff] %v981_v10  ;;  %v983_v25 = vadd.f32 %v982_v24, %v3110_v13  ;;  %1108 = vst [vmem:[#allocation3 + $0xf0] sm:$0xff] %v1054_v22  ;;  %v1056_v28 = vadd.f32 %v1055_v27, %v3116_v45 }
 0x160   :  { %v986_v30 = vpop.f32.mrf.mxu0  ;;  %v1059_v33 = vpop.f32.mrf.mxu1 }
 0x161   :  { %1107 = vst [vmem:[#allocation3 + $0xe8] sm:$0xff] %v983_v25  ;;  %v987_v31 = vadd.f32 %v986_v30, %v3098_v15  ;;  %1109 = vst [vmem:[#allocation3 + $0xf8] sm:$0xff] %v1056_v28  ;;  %v1060_v34 = vadd.f32 %v1059_v33, %v3104_v52 }
 0x162   :  { %v988_v35 = vpop.f32.mrf.mxu0  ;;  %v1061_v37 = vpop.f32.mrf.mxu1 }
 0x163   :  { %1114 = vst [vmem:[#allocation3 + $0x120] sm:$0xff] %v987_v31  ;;  %v989_v36 = vadd.f32 %v988_v35, %v3110_v13  ;;  %1116 = vst [vmem:[#allocation3 + $0x130] sm:$0xff] %v1060_v34  ;;  %v1062_v18 = vadd.f32 %v1061_v37, %v3116_v45 }
 0x164   :  { %v990_v39 = vpop.f32.mrf.mxu0  ;;  %v1063_v41 = vpop.f32.mrf.mxu1 }
 0x165   :  { %1115 = vst [vmem:[#allocation3 + $0x128] sm:$0xff] %v989_v36  ;;  %v991_v40 = vadd.f32 %v990_v39, %v3098_v15  ;;  %1117 = vst [vmem:[#allocation3 + $0x138] sm:$0xff] %v1062_v18  ;;  %v1064_v20 = vadd.f32 %v1063_v41, %v3104_v52 }
 0x166   :  { %v992_v42 = vpop.f32.mrf.mxu0  ;;  %v1065_v44 = vpop.f32.mrf.mxu1 }
 0x167   :  { %1122 = vst [vmem:[#allocation3 + $0x160] sm:$0xff] %v991_v40  ;;  %v993_v43 = vadd.f32 %v992_v42, %v3110_v13  ;;  %1124 = vst [vmem:[#allocation3 + $0x170] sm:$0xff] %v1064_v20  ;;  %v1066_v46 = vadd.f32 %v1065_v44, %v3116_v45 }
 0x168   :  { %v996_v47 = vpop.f32.mrf.mxu0  ;;  %v1069_v48 = vpop.f32.mrf.mxu1 }
 0x169   :  { %1123 = vst [vmem:[#allocation3 + $0x168] sm:$0xff] %v993_v43  ;;  %v997_v12 = vadd.f32 %v996_v47, %v3098_v15  ;;  %1125 = vst [vmem:[#allocation3 + $0x178] sm:$0xff] %v1066_v46  ;;  %v1070_v14 = vadd.f32 %v1069_v48, %v3104_v52 }
 0x16a   :  { %v998_v49 = vpop.f32.mrf.mxu0  ;;  %v1071_v50 = vpop.f32.mrf.mxu1 }
 0x16b   :  { %1130 = vst [vmem:[#allocation3 + $0x1a0] sm:$0xff] %v997_v12  ;;  %v999_v0 = vadd.f32 %v998_v49, %v3110_v13  ;;  %1132 = vst [vmem:[#allocation3 + $0x1b0] sm:$0xff] %v1070_v14  ;;  %v1072_v51 = vadd.f32 %v1071_v50, %v3116_v45 }
 0x16c   :  { %v1000_v17 = vpop.f32.mrf.mxu0  ;;  %v1073_v53 = vpop.f32.mrf.mxu1 }
 0x16d   :  { %1131 = vst [vmem:[#allocation3 + $0x1a8] sm:$0xff] %v999_v0  ;;  %v1001_v16 = vadd.f32 %v1000_v17, %v3098_v15  ;;  %1133 = vst [vmem:[#allocation3 + $0x1b8] sm:$0xff] %v1072_v51  ;;  %v1074_v8 = vadd.f32 %v1073_v53, %v3104_v52  ;;  %v3156_v15 = vmov 0.0   ;;  %v3160_v52 = vmov 0.0  }
 0x16e   :  { %v1002_v54 = vpop.f32.mrf.mxu0  ;;  %v1075_v55 = vpop.f32.mrf.mxu1 }
 0x16f   :  { %1138 = vst [vmem:[#allocation3 + $0x1e0] sm:$0xff] %v1001_v16  ;;  %v1003_v19 = vadd.f32 %v1002_v54, %v3110_v13  ;;  %1140 = vst [vmem:[#allocation3 + $0x1f0] sm:$0xff] %v1074_v8  ;;  %v1076_v29 = vadd.f32 %v1075_v55, %v3116_v45 }
 0x171   :  { %1139 = vst [vmem:[#allocation3 + $0x1e8] sm:$0xff] %v1003_v19  ;;  %1141 = vst [vmem:[#allocation3 + $0x1f8] sm:$0xff] %v1076_v29 }
 0x172 LB: > { %v2398_v13 = vld [vmem:[%s3557_s6 + $0xe4] ss:$16 sps:$4 sm:$0xff]   ;;  %v2400_v45 = vld [vmem:[%s3557_s6 + $0xe0] ss:$16 sps:$4 sm:$0xff]   ;;  %v2716_v58 = vmov 0   ;;  %v1178_v18 = vpack.c.bf16 %v2704_v52, %v2704_v52  ;;  %s3486_s15 = sshll.u32 %s2708_s1, 3  ;;  %s2708_s1 = sphi %s3162_s1, %s1147_s1   ;;  %v2704_v52 = vphi %v3160_v52, %v3513_v52   ;;  %v2700_v32 = vphi %v3158_v32, %v3504_v32   ;;  %v2696_v15 = vphi %v3156_v15, %v1783_v15   ;;  %v2692_v57 = vphi %v3154_v57, %v1781_v57   ;;  %v2688_v23 = vphi %v3152_v23, %v2090_v23   ;;  %v2684_v56 = vphi %v3150_v56, %v2088_v56  }
 0x173   : > { %1403 = vmatprep.mubr.bf16.mxu0 %v2716_v58  ;;  %1444 = vmatprep.mubr.bf16.mxu1 %v2716_v58  ;;  %v2401_v11 = vld [vmem:[%s3557_s6 + $0xc4] ss:$16 sps:$4 sm:$0xff]   ;;  %v2403_v26 = vld [vmem:[%s3557_s6 + $0xc0] ss:$16 sps:$4 sm:$0xff]   ;;  %v2409_v59 = vld [vmem:[%s3557_s6 + $0xec] ss:$16 sps:$4 sm:$0xff]   ;;  %s2091_s21 = scalar_lea.vmem %s3560_s9, %s3486_s15  ;;  %s2093_s2 = scalar_lea.vmem %s3561_s10, %s3486_s15 }
 0x174   : > { %1371 = vmatprep.subr.bf16.mxu0 %v2398_v13  ;;  %v2404_v38 = vld [vmem:[%s3557_s6 + $0xa4] ss:$16 sps:$4 sm:$0xff]   ;;  %v2412_v60 = vld [vmem:[%s3557_s6 + $0xe8] ss:$16 sps:$4 sm:$0xff]   ;;  %v2406_v61 = vld [vmem:[%s3557_s6 + $0xa0] ss:$16 sps:$4 sm:$0xff]   ;;  %1412 = vmatprep.subr.bf16.mxu1 %v2409_v59  ;;  %s2095_s26 = scalar_lea.vmem %s3562_s11, %s3486_s15 }
 0x175   : > { %1372 = vmatpush1.bf16.msra.mxu0 %v2400_v45  ;;  %v2407_v62 = vld [vmem:[%s3557_s6 + $0x84] ss:$16 sps:$4 sm:$0xff]   ;;  %1413 = vmatpush1.bf16.msra.mxu1 %v2412_v60  ;;  %v2415_v63 = vld [vmem:[%s3557_s6 + $0xcc] ss:$16 sps:$4 sm:$0xff]   ;;  %v2418_v1 = vld [vmem:[%s3557_s6 + $0xc8] ss:$16 sps:$4 sm:$0xff]  }
 0x176   : > { %1373 = vmatprep.subr.bf16.mxu0 %v2401_v11  ;;  %1414 = vmatprep.subr.bf16.mxu1 %v2415_v63  ;;  %v2411_v2 = vld [vmem:[%s3557_s6 + $0x80] ss:$16 sps:$4 sm:$0xff]   ;;  %v2413_v3 = vld [vmem:[%s3557_s6 + $0x64] ss:$16 sps:$4 sm:$0xff]   ;;  %v2421_v4 = vld [vmem:[%s3557_s6 + $0xac] ss:$16 sps:$4 sm:$0xff]  }
 0x177   : > { %v2424_v5 = vld [vmem:[%s3557_s6 + $0xa8] ss:$16 sps:$4 sm:$0xff]   ;;  %v2427_v6 = vld [vmem:[%s3557_s6 + $0x8c] ss:$16 sps:$4 sm:$0xff]   ;;  %v2417_v7 = vld [vmem:[%s3557_s6 + $0x60] ss:$16 sps:$4 sm:$0xff]  }
 0x178   : > { %v2419_v9 = vld [vmem:[%s3557_s6 + $0x44] ss:$16 sps:$4 sm:$0xff]   ;;  %v2430_v10 = vld [vmem:[%s3557_s6 + $0x88] ss:$16 sps:$4 sm:$0xff]   ;;  %v2433_v21 = vld [vmem:[%s3557_s6 + $0x6c] ss:$16 sps:$4 sm:$0xff]  }
 0x179   : > { %1374 = vmatpush1.bf16.msra.mxu0 %v2403_v26  ;;  %1415 = vmatpush1.bf16.msra.mxu1 %v2418_v1  ;;  %v2423_v22 = vld [vmem:[%s3557_s6 + $0x40] ss:$16 sps:$4 sm:$0xff]   ;;  %v2425_v24 = vld [vmem:[%s3557_s6 + $0x24] ss:$16 sps:$4 sm:$0xff]   ;;  %v2436_v25 = vld [vmem:[%s3557_s6 + $0x68] ss:$16 sps:$4 sm:$0xff]  }
 0x17a   : > { %1375 = vmatprep.subr.bf16.mxu0 %v2404_v38  ;;  %1416 = vmatprep.subr.bf16.mxu1 %v2421_v4  ;;  %v2437_v27 = vld [vmem:[%s3557_s6 + $0x4c] ss:$16 sps:$4 sm:$0xff]   ;;  %v2429_v28 = vld [vmem:[%s3557_s6 + $0x20] ss:$16 sps:$4 sm:$0xff]   ;;  %v2431_v30 = vld [vmem:[%s3557_s6 + $0x4] ss:$16 sps:$4 sm:$0xff]  }
 0x17b   : > { %v2442_v31 = vld [vmem:[%s3557_s6 + $0x48] ss:$16 sps:$4 sm:$0xff]   ;;  %v2443_v33 = vld [vmem:[%s3557_s6 + $0x2c] ss:$16 sps:$4 sm:$0xff]   ;;  %v2435_v34 = vld [vmem:[%s3557_s6] ss:$16 sps:$4 sm:$0xff]  }
 0x17c   : > { %v2441_v35 = vld [vmem:[%s3558_s7 + $0xe4] ss:$16 sps:$4 sm:$0xff]   ;;  %v2448_v36 = vld [vmem:[%s3557_s6 + $0x28] ss:$16 sps:$4 sm:$0xff]   ;;  %v2449_v37 = vld [vmem:[%s3557_s6 + $0xc] ss:$16 sps:$4 sm:$0xff]  }
 0x17d   : > { %1376 = vmatpush1.bf16.msra.mxu0 %v2406_v61  ;;  %1417 = vmatpush1.bf16.msra.mxu1 %v2424_v5  ;;  %v2439_v39 = vld [vmem:[%s3558_s7 + $0xe0] ss:$16 sps:$4 sm:$0xff]   ;;  %v2447_v40 = vld [vmem:[%s3558_s7 + $0xc4] ss:$16 sps:$4 sm:$0xff]   ;;  %v2454_v41 = vld [vmem:[%s3557_s6 + $0x8] ss:$16 sps:$4 sm:$0xff]   ;;  %v1481_v61 = vpack.c.bf16 %v2696_v15, %v2696_v15 }
 0x17e   : > { %1377 = vmatprep.subr.bf16.mxu0 %v2407_v62  ;;  %1418 = vmatprep.subr.bf16.mxu1 %v2427_v6  ;;  %v2460_v20 = vld [vmem:[%s3558_s7 + $0xec] ss:$16 sps:$4 sm:$0xff]   ;;  %v2445_v42 = vld [vmem:[%s3558_s7 + $0xc0] ss:$16 sps:$4 sm:$0xff]   ;;  %v2453_v43 = vld [vmem:[%s3558_s7 + $0xa4] ss:$16 sps:$4 sm:$0xff]  }
 0x17f   : > { %v2458_v44 = vld [vmem:[%s3558_s7 + $0xe8] ss:$16 sps:$4 sm:$0xff]   ;;  %v2466_v46 = vld [vmem:[%s3558_s7 + $0xcc] ss:$16 sps:$4 sm:$0xff]   ;;  %v2451_v47 = vld [vmem:[%s3558_s7 + $0xa0] ss:$16 sps:$4 sm:$0xff]  }
 0x180   : > { %v2457_v12 = vld [vmem:[%s3558_s7 + $0x84] ss:$16 sps:$4 sm:$0xff]   ;;  %v2464_v48 = vld [vmem:[%s3558_s7 + $0xc8] ss:$16 sps:$4 sm:$0xff]   ;;  %v2472_v14 = vld [vmem:[%s3558_s7 + $0xac] ss:$16 sps:$4 sm:$0xff]  }
 0x181   : > { %1378 = vmatpush1.bf16.msra.mxu0 %v2411_v2  ;;  %1419 = vmatpush1.bf16.msra.mxu1 %v2430_v10  ;;  %v2455_v49 = vld [vmem:[%s3558_s7 + $0x80] ss:$16 sps:$4 sm:$0xff]   ;;  %v2463_v0 = vld [vmem:[%s3558_s7 + $0x64] ss:$16 sps:$4 sm:$0xff]   ;;  %v2470_v50 = vld [vmem:[%s3558_s7 + $0xa8] ss:$16 sps:$4 sm:$0xff]  }
 0x182   : > { %1379 = vmatprep.subr.bf16.mxu0 %v2413_v3  ;;  %1420 = vmatprep.subr.bf16.mxu1 %v2433_v21  ;;  %v2478_v51 = vld [vmem:[%s3558_s7 + $0x8c] ss:$16 sps:$4 sm:$0xff]   ;;  %v2461_v17 = vld [vmem:[%s3558_s7 + $0x60] ss:$16 sps:$4 sm:$0xff]   ;;  %v2469_v16 = vld [vmem:[%s3558_s7 + $0x44] ss:$16 sps:$4 sm:$0xff]  }
 0x183   : > { %v2476_v53 = vld [vmem:[%s3558_s7 + $0x88] ss:$16 sps:$4 sm:$0xff]   ;;  %v2484_v8 = vld [vmem:[%s3558_s7 + $0x6c] ss:$16 sps:$4 sm:$0xff]   ;;  %v2467_v54 = vld [vmem:[%s3558_s7 + $0x40] ss:$16 sps:$4 sm:$0xff]  }
 0x184   : > { %v2475_v19 = vld [vmem:[%s3558_s7 + $0x24] ss:$16 sps:$4 sm:$0xff]   ;;  %v2482_v55 = vld [vmem:[%s3558_s7 + $0x68] ss:$16 sps:$4 sm:$0xff]   ;;  %v2487_v29 = vld [vmem:[%s3558_s7 + $0x4c] ss:$16 sps:$4 sm:$0xff]  }
 0x185   : > { %1380 = vmatpush1.bf16.msra.mxu0 %v2417_v7  ;;  %1421 = vmatpush1.bf16.msra.mxu1 %v2436_v25  ;;  %v2473_v52 = vld [vmem:[%s3558_s7 + $0x20] ss:$16 sps:$4 sm:$0xff]   ;;  %v2481_v13 = vld [vmem:[%s3558_s7 + $0x4] ss:$16 sps:$4 sm:$0xff]   ;;  %v2485_v45 = vld [vmem:[%s3558_s7 + $0x48] ss:$16 sps:$4 sm:$0xff]  }
 0x186   : > { %1381 = vmatprep.subr.bf16.mxu0 %v2419_v9  ;;  %1422 = vmatprep.subr.bf16.mxu1 %v2437_v27  ;;  %v2493_v11 = vld [vmem:[%s3558_s7 + $0x2c] ss:$16 sps:$4 sm:$0xff]   ;;  %v2479_v26 = vld [vmem:[%s3558_s7] ss:$16 sps:$4 sm:$0xff]   ;;  %v2490_v38 = vld [vmem:[%s3559_s8 + $0xe4] ss:$16 sps:$4 sm:$0xff]  }
 0x187   : > { %v2491_v59 = vld [vmem:[%s3558_s7 + $0x28] ss:$16 sps:$4 sm:$0xff]   ;;  %v2499_v60 = vld [vmem:[%s3558_s7 + $0xc] ss:$16 sps:$4 sm:$0xff]   ;;  %v2488_v62 = vld [vmem:[%s3559_s8 + $0xe0] ss:$16 sps:$4 sm:$0xff]  }
 0x188   : > { %v2496_v63 = vld [vmem:[%s3559_s8 + $0xc4] ss:$16 sps:$4 sm:$0xff]   ;;  %v2497_v1 = vld [vmem:[%s3558_s7 + $0x8] ss:$16 sps:$4 sm:$0xff]   ;;  %v2508_v15 = vld [vmem:[%s3559_s8 + $0xec] ss:$16 sps:$4 sm:$0xff]  }
 0x189   : > { %1382 = vmatpush1.bf16.msra.mxu0 %v2423_v22  ;;  %1423 = vmatpush1.bf16.msra.mxu1 %v2442_v31  ;;  %v2494_v2 = vld [vmem:[%s3559_s8 + $0xc0] ss:$16 sps:$4 sm:$0xff]   ;;  %v2502_v3 = vld [vmem:[%s3559_s8 + $0xa4] ss:$16 sps:$4 sm:$0xff]   ;;  %v2506_v4 = vld [vmem:[%s3559_s8 + $0xe8] ss:$16 sps:$4 sm:$0xff]  }
 0x18a   : > { %1383 = vmatprep.subr.bf16.mxu0 %v2425_v24  ;;  %1424 = vmatprep.subr.bf16.mxu1 %v2443_v33  ;;  %v2514_v5 = vld [vmem:[%s3559_s8 + $0xcc] ss:$16 sps:$4 sm:$0xff]   ;;  %v2500_v6 = vld [vmem:[%s3559_s8 + $0xa0] ss:$16 sps:$4 sm:$0xff]   ;;  %v2505_v7 = vld [vmem:[%s3559_s8 + $0x84] ss:$16 sps:$4 sm:$0xff]  }
 0x18b   : > { %v2512_v9 = vld [vmem:[%s3559_s8 + $0xc8] ss:$16 sps:$4 sm:$0xff]   ;;  %v2520_v10 = vld [vmem:[%s3559_s8 + $0xac] ss:$16 sps:$4 sm:$0xff]   ;;  %v2503_v21 = vld [vmem:[%s3559_s8 + $0x80] ss:$16 sps:$4 sm:$0xff]  }
 0x18c   : > { %v2511_v22 = vld [vmem:[%s3559_s8 + $0x64] ss:$16 sps:$4 sm:$0xff]   ;;  %v2518_v24 = vld [vmem:[%s3559_s8 + $0xa8] ss:$16 sps:$4 sm:$0xff]   ;;  %v2509_v25 = vld [vmem:[%s3559_s8 + $0x60] ss:$16 sps:$4 sm:$0xff]  }
 0x18d   : > { %1384 = vmatpush1.bf16.msra.mxu0 %v2429_v28  ;;  %1425 = vmatpush1.bf16.msra.mxu1 %v2448_v36  ;;  %v2517_v27 = vld [vmem:[%s3559_s8 + $0x44] ss:$16 sps:$4 sm:$0xff]   ;;  %v2524_v28 = vld [vmem:[%s3559_s8 + $0x88] ss:$16 sps:$4 sm:$0xff]   ;;  %v2515_v31 = vld [vmem:[%s3559_s8 + $0x40] ss:$16 sps:$4 sm:$0xff]  }
 0x18e   : > { %1385 = vmatprep.subr.bf16.mxu0 %v2431_v30  ;;  %1426 = vmatprep.subr.bf16.mxu1 %v2449_v37  ;;  %v2532_v30 = vld [vmem:[%s3559_s8 + $0x6c] ss:$16 sps:$4 sm:$0xff]   ;;  %v2523_v33 = vld [vmem:[%s3559_s8 + $0x24] ss:$16 sps:$4 sm:$0xff]   ;;  %v2521_v36 = vld [vmem:[%s3559_s8 + $0x20] ss:$16 sps:$4 sm:$0xff]  }
 0x18f   : > { %v2529_v37 = vld [vmem:[%s3559_s8 + $0x4] ss:$16 sps:$4 sm:$0xff]   ;;  %s1155_s16 = sshra.s32 %s3486_s15, 3  ;;  %s1147_s1 = sadd.s32 1, %s2708_s1  }
 0x190   : > { %s3489_s17 = sshll.u32 %s1155_s16, 6  ;;  %p1144_p1 = scmp.ge.s32.totalorder %s1147_s1, 8  }
 0x191   : > { %1386 = vmatpush1.bf16.msra.mxu0 %v2435_v34  ;;  %1427 = vmatpush1.bf16.msra.mxu1 %v2454_v41  ;;  %v2530_v34 = vld [vmem:[%s3559_s8 + $0x68] ss:$16 sps:$4 sm:$0xff]   ;;  %s3492_s18 = scalar_lea.vmem [#allocation3], %s3489_s17  ;;  %s3499_s5 = scalar_lea.vmem [#allocation2], %s3489_s17 }
 0x192   : > { %1674 = vmatprep.subr.bf16.mxu0 %v2441_v35  ;;  %1715 = vmatprep.subr.bf16.mxu1 %v2460_v20  ;;  %v2535_v35 = vld [vmem:[%s3559_s8 + $0x4c] ss:$16 sps:$4 sm:$0xff]   ;;  %v2536_v41 = vld [vmem:[%s3559_s8 + $0x28] ss:$16 sps:$4 sm:$0xff]  }
 0x193   : > { %v2541_v20 = vld [vmem:[%s3559_s8 + $0xc] ss:$16 sps:$4 sm:$0xff]  }
 0x194   : > { %1404 = vmatmul.mubr.bf16.vlgmr.msra.gmra.mxu0 %v1178_v18  ;;  %1445 = vmatmul.mubr.bf16.vlgmr.msra.gmra.mxu1 %v1178_v18  ;;  %v2533_v18 = vld [vmem:[%s3559_s8 + $0x48] ss:$16 sps:$4 sm:$0xff]  }
 0x195   : > { %1675 = vmatpush1.bf16.msra.mxu0 %v2439_v39  ;;  %1706 = vmatprep.mubr.bf16.mxu0 %v2716_v58  ;;  %v2538_v39 = vld [vmem:[%s3559_s8 + $0x2c] ss:$16 sps:$4 sm:$0xff]  }
 0x196   : > { %1676 = vmatprep.subr.bf16.mxu0 %v2447_v40  ;;  %1716 = vmatpush1.bf16.msra.mxu1 %v2458_v44  ;;  %v2527_v40 = vld [vmem:[%s3559_s8] ss:$16 sps:$4 sm:$0xff]  }
 0x197   : > { %1717 = vmatprep.subr.bf16.mxu1 %v2466_v46  ;;  %1747 = vmatprep.mubr.bf16.mxu1 %v2716_v58  ;;  %v1171_v46 = vld [vmem:[%s3492_s18 + $0x8] sm:$0xff] }
 0x199   : > { %1677 = vmatpush1.bf16.msra.mxu0 %v2445_v42  ;;  %v1788_v42 = vpack.c.bf16 %v2688_v23, %v2688_v23  ;;  %v1170_v23 = vld [vmem:[%s3492_s18] sm:$0xff] }
 0x19a   : > { %1678 = vmatprep.subr.bf16.mxu0 %v2453_v43  ;;  %1718 = vmatpush1.bf16.msra.mxu1 %v2464_v48  ;;  %v2539_v43 = vld [vmem:[%s3559_s8 + $0x8] ss:$16 sps:$4 sm:$0xff]  }
 0x19b   : > { %1719 = vmatprep.subr.bf16.mxu1 %v2472_v14 }
 0x19d   : > { %1679 = vmatpush1.bf16.msra.mxu0 %v2451_v47 }
 0x19e   : > { %1680 = vmatprep.subr.bf16.mxu0 %v2457_v12  ;;  %1720 = vmatpush1.bf16.msra.mxu1 %v2470_v50 }
 0x19f   : > { %1721 = vmatprep.subr.bf16.mxu1 %v2478_v51 }
 0x1a1   : > { %1681 = vmatpush1.bf16.msra.mxu0 %v2455_v49 }
 0x1a2   : > { %1682 = vmatprep.subr.bf16.mxu0 %v2463_v0  ;;  %1722 = vmatpush1.bf16.msra.mxu1 %v2476_v53 }
 0x1a3   : > { %1723 = vmatprep.subr.bf16.mxu1 %v2484_v8 }
 0x1a5   : > { %1683 = vmatpush1.bf16.msra.mxu0 %v2461_v17  ;;  %v1173_v17 = vld [vmem:[%s3492_s18 + $0x18] sm:$0xff] }
 0x1a6   : > { %1684 = vmatprep.subr.bf16.mxu0 %v2469_v16  ;;  %1724 = vmatpush1.bf16.msra.mxu1 %v2482_v55 }
 0x1a7   : > { %1725 = vmatprep.subr.bf16.mxu1 %v2487_v29 }
 0x1a9   : > { %1685 = vmatpush1.bf16.msra.mxu0 %v2467_v54 }
 0x1aa   : > { %1686 = vmatprep.subr.bf16.mxu0 %v2475_v19  ;;  %1726 = vmatpush1.bf16.msra.mxu1 %v2485_v45  ;;  %v1172_v19 = vld [vmem:[%s3492_s18 + $0x10] sm:$0xff] }
 0x1ab   : > { %1727 = vmatprep.subr.bf16.mxu1 %v2493_v11 }
 0x1ad   : > { %1687 = vmatpush1.bf16.msra.mxu0 %v2473_v52 }
 0x1ae   : > { %1688 = vmatprep.subr.bf16.mxu0 %v2481_v13  ;;  %1728 = vmatpush1.bf16.msra.mxu1 %v2491_v59 }
 0x1af   : > { %1729 = vmatprep.subr.bf16.mxu1 %v2499_v60 }
 0x1b1   : > { %1689 = vmatpush1.bf16.msra.mxu0 %v2479_v26  ;;  %v1160_v26 = vld [vmem:[%s3499_s5] sm:$0xff] }
 0x1b2   : > { %1981 = vmatprep.subr.bf16.mxu0 %v2490_v38  ;;  %1730 = vmatpush1.bf16.msra.mxu1 %v2497_v1 }
 0x1b3   : > { %2022 = vmatprep.subr.bf16.mxu1 %v2508_v15 }
 0x1b4   : > { %1707 = vmatmul.mubr.bf16.vlgmr.msra.gmra.mxu0 %v1481_v61 }
 0x1b5   : > { %1982 = vmatpush1.bf16.msra.mxu0 %v2488_v62  ;;  %2013 = vmatprep.mubr.bf16.mxu0 %v2716_v58 }
 0x1b6   : > { %1983 = vmatprep.subr.bf16.mxu0 %v2496_v63  ;;  %1748 = vmatmul.mubr.bf16.vlgmr.msra.gmra.mxu1 %v1481_v61  ;;  %v1161_v61 = vld [vmem:[%s3499_s5 + $0x8] sm:$0xff] }
 0x1b7   : > { %2023 = vmatpush1.bf16.msra.mxu1 %v2506_v4  ;;  %2054 = vmatprep.mubr.bf16.mxu1 %v2716_v58  ;;  %v2526_v58 = vld [vmem:[%s3559_s8 + $0x8c] ss:$16 sps:$4 sm:$0xff]  }
 0x1b8   : > { %2024 = vmatprep.subr.bf16.mxu1 %v2514_v5 }
 0x1b9   : > { %1984 = vmatpush1.bf16.msra.mxu0 %v2494_v2 }
 0x1ba   : > { %1985 = vmatprep.subr.bf16.mxu0 %v2502_v3 }
 0x1bb   : > { %2025 = vmatpush1.bf16.msra.mxu1 %v2512_v9 }
 0x1bc   : > { %2026 = vmatprep.subr.bf16.mxu1 %v2520_v10 }
 0x1bd   : > { %1986 = vmatpush1.bf16.msra.mxu0 %v2500_v6 }
 0x1be   : > { %1987 = vmatprep.subr.bf16.mxu0 %v2505_v7 }
 0x1bf   : > { %2027 = vmatpush1.bf16.msra.mxu1 %v2518_v24 }
 0x1c0   : > { %2028 = vmatprep.subr.bf16.mxu1 %v2526_v58 }
 0x1c1   : > { %1988 = vmatpush1.bf16.msra.mxu0 %v2503_v21 }
 0x1c2   : > { %1989 = vmatprep.subr.bf16.mxu0 %v2511_v22  ;;  %v1163_v22 = vld [vmem:[%s3499_s5 + $0x18] sm:$0xff] }
 0x1c3   : > { %2029 = vmatpush1.bf16.msra.mxu1 %v2524_v28  ;;  %v1162_v28 = vld [vmem:[%s3499_s5 + $0x10] sm:$0xff] }
 0x1c4   : > { %2030 = vmatprep.subr.bf16.mxu1 %v2532_v30 }
 0x1c5   : > { %1990 = vmatpush1.bf16.msra.mxu0 %v2509_v25 }
 0x1c6   : > { %1991 = vmatprep.subr.bf16.mxu0 %v2517_v27 }
 0x1c7   : > { %2031 = vmatpush1.bf16.msra.mxu1 %v2530_v34 }
 0x1c8   : > { %2032 = vmatprep.subr.bf16.mxu1 %v2535_v35 }
 0x1c9   : > { %1992 = vmatpush1.bf16.msra.mxu0 %v2515_v31 }
 0x1ca   : > { %1993 = vmatprep.subr.bf16.mxu0 %v2523_v33 }
 0x1cb   : > { %2033 = vmatpush1.bf16.msra.mxu1 %v2533_v18 }
 0x1cc   : > { %2034 = vmatprep.subr.bf16.mxu1 %v2538_v39  ;;  %v1164_v39 = vld [vmem:[%s3499_s5 + $0x20] sm:$0xff] }
 0x1cd   : > { %1994 = vmatpush1.bf16.msra.mxu0 %v2521_v36 }
 0x1ce   : > { %1995 = vmatprep.subr.bf16.mxu0 %v2529_v37 }
 0x1cf   : > { %2035 = vmatpush1.bf16.msra.mxu1 %v2536_v41  ;;  %v1165_v41 = vld [vmem:[%s3499_s5 + $0x28] sm:$0xff] }
 0x1d0   : > { %2036 = vmatprep.subr.bf16.mxu1 %v2541_v20  ;;  %v1175_v20 = vld [vmem:[%s3492_s18 + $0x28] sm:$0xff] }
 0x1d1   : > { %1996 = vmatpush1.bf16.msra.mxu0 %v2527_v40  ;;  %v1174_v40 = vld [vmem:[%s3492_s18 + $0x20] sm:$0xff] }
 0x1d3   : > { %2037 = vmatpush1.bf16.msra.mxu1 %v2539_v43 }
 0x1d4   : > { %2014 = vmatmul.mubr.bf16.vlgmr.msra.gmra.mxu0 %v1788_v42 }
 0x1d6   : > { %2055 = vmatmul.mubr.bf16.vlgmr.msra.gmra.mxu1 %v1788_v42  ;;  %v1784_v42 = vadd.f32 %v1174_v40, %v1164_v39 }
 0x254   : > { %v1405_v44 = vpop.f32.mrf.mxu0  ;;  %v1446_v50 = vpop.f32.mrf.mxu1 }
 0x255   : > { %v1453_v47 = vadd.f32 %v1405_v44, %v1170_v23  ;;  %v1455_v29 = vadd.f32 %v1446_v50, %v1172_v19  ;;  %v1785_v23 = vadd.f32 %v1175_v20, %v1165_v41  ;;  %v1177_v19 = vld [vmem:[%s3492_s18 + $0x38] sm:$0xff] }
 0x256   : > { %v1407_v12 = vpop.f32.mrf.mxu0  ;;  %v1448_v16 = vpop.f32.mrf.mxu1 }
 0x257   : > { %v2252_v48 = vmul.f32 -1.442695, %v1453_v47  ;;  %v1454_v14 = vadd.f32 %v1407_v12, %v1171_v46  ;;  %v1456_v8 = vadd.f32 %v1448_v16, %v1173_v17 }
 0x258   : > { %v1409_v49 = vpop.f32.mrf.mxu0  ;;  %v1450_v53 = vpop.f32.mrf.mxu1 }
 0x259   : > { %2542 = vpow2.f32 %v2252_v48  ;;  %v2253_v0 = vmul.f32 -1.442695, %v1454_v14  ;;  %v2254_v55 = vmul.f32 -1.442695, %v1456_v8 }
 0x25a   : > { %v1410_v51 = vpop.f32.mrf.mxu0  ;;  %v1451_v54 = vpop.f32.mrf.mxu1 }
 0x25b   : > { %2544 = vpow2.f32 %v2253_v0  ;;  %v1167_v54 = vld [vmem:[%s3499_s5 + $0x38] sm:$0xff] }
 0x25c   : > { %2546 = vpow2.f32 %v2254_v55 }
 0x25d   : > { %2548 = vtanh.f32 %v1455_v29 }
 0x266   : > { %v2543_v52 = vpop.eup %2542 }
 0x267   : > { %v1460_v13 = vadd.f32 1.0, %v2543_v52 }
 0x268   : > { %v2545_v45 = vpop.eup %2544 }
 0x269   : > { %2550 = vrcp.f32 %v1460_v13  ;;  %v1466_v11 = vadd.f32 1.0, %v2545_v45  ;;  %v2547_v38 = vpop.eup %2546  ;;  %v1166_v13 = vld [vmem:[%s3499_s5 + $0x30] sm:$0xff] }
 0x26a   : > { %v2549_v59 = vpop.eup %2548  ;;  %v1473_v1 = vadd.f32 1.0, %v2547_v38  ;;  %v1176_v45 = vld [vmem:[%s3492_s18 + $0x30] sm:$0xff] }
 0x26b   : > { %2552 = vrcp.f32 %v1466_v11  ;;  %v1787_v11 = vadd.f32 %v1177_v19, %v1167_v54  ;;  %v1786_v38 = vadd.f32 %v1176_v45, %v1166_v13 }
 0x274   : > { %v1708_v60 = vpop.f32.mrf.mxu0 }
 0x275   : > { %v1756_v62 = vadd.f32 %v1708_v60, %v1160_v26 }
 0x276   : > { %v2551_v63 = vpop.eup %2550  ;;  %v1710_v15 = vpop.f32.mrf.mxu0 }
 0x277   : > { %v1477_v2 = vmul.f32 %v2551_v63, %v2549_v59  ;;  %v2287_v3 = vmul.f32 -1.442695, %v1756_v62  ;;  %v1757_v4 = vadd.f32 %v1710_v15, %v1161_v61  ;;  %v1749_v10 = vpop.f32.mrf.mxu1 }
 0x278   : > { %v2553_v5 = vpop.eup %2552  ;;  %v1712_v6 = vpop.f32.mrf.mxu0  ;;  %v1758_v31 = vadd.f32 %v1749_v10, %v1162_v28 }
 0x279   : > { %v1476_v7 = vmul.f32 %v2700_v32, %v2553_v5  ;;  %2554 = vpow2.f32 %v2287_v3  ;;  %v2288_v9 = vmul.f32 -1.442695, %v1757_v4  ;;  %v1751_v24 = vpop.f32.mrf.mxu1 }
 0x27a   : > { %2556 = vrcp.f32 %v1473_v1  ;;  %v1713_v21 = vpop.f32.mrf.mxu0  ;;  %v1759_v25 = vadd.f32 %v1751_v24, %v1163_v22 }
 0x27b   : > { %v3504_v32 = vadd.f32 %v1477_v2, %v1476_v7   ;;  %2558 = vpow2.f32 %v2288_v9  ;;  %v1753_v58 = vpop.f32.mrf.mxu1 }
 0x27c   : > { %v2289_v30 = vmul.f32 -1.442695, %v1759_v25 }
 0x27d   : > { %2560 = vtanh.f32 %v3504_v32  ;;  %v1754_v27 = vpop.f32.mrf.mxu1 }
 0x27e   : > { %2562 = vpow2.f32 %v2289_v30 }
 0x27f   : > { %2564 = vtanh.f32 %v1758_v31 }
 0x286   : > { %v2555_v33 = vpop.eup %2554 }
 0x287   : > { %v2557_v34 = vpop.eup %2556  ;;  %v1763_v35 = vadd.f32 1.0, %v2555_v33 }
 0x288   : > { %v2559_v36 = vpop.eup %2558 }
 0x289   : > { %2566 = vrcp.f32 %v1763_v35  ;;  %v1769_v37 = vadd.f32 1.0, %v2559_v36 }
 0x28a   : > { %v2561_v18 = vpop.eup %2560 }
 0x28b   : > { %v3513_v52 = vmul.f32 %v2561_v18, %v2557_v34   ;;  %2568 = vrcp.f32 %v1769_v37  ;;  %v2563_v43 = vpop.eup %2562 }
 0x28c   : > { %v2565_v44 = vpop.eup %2564  ;;  %v1776_v48 = vadd.f32 1.0, %v2563_v43 }
 0x28d   : > { %2092 = vst [vmem:[%s2091_s21] sm:$0xff] %v3513_v52 }
 0x294   : > { %v2015_v46 = vpop.f32.mrf.mxu0 }
 0x295   : > { %v2063_v47 = vadd.f32 %v2015_v46, %v1784_v42 }
 0x296   : > { %v2567_v12 = vpop.eup %2566  ;;  %v2017_v14 = vpop.f32.mrf.mxu0 }
 0x297   : > { %v1780_v49 = vmul.f32 %v2567_v12, %v2565_v44  ;;  %v2322_v0 = vmul.f32 -1.442695, %v2063_v47  ;;  %v2064_v50 = vadd.f32 %v2017_v14, %v1785_v23  ;;  %v2056_v8 = vpop.f32.mrf.mxu1 }
 0x298   : > { %v2569_v51 = vpop.eup %2568  ;;  %v2019_v17 = vpop.f32.mrf.mxu0  ;;  %v2065_v61 = vadd.f32 %v2056_v8, %v1786_v38 }
 0x299   : > { %v1779_v16 = vmul.f32 %v2692_v57, %v2569_v51  ;;  %2570 = vpow2.f32 %v2322_v0  ;;  %v2323_v53 = vmul.f32 -1.442695, %v2064_v50  ;;  %v2058_v29 = vpop.f32.mrf.mxu1 }
 0x29a   : > { %2572 = vrcp.f32 %v1776_v48  ;;  %v2020_v55 = vpop.f32.mrf.mxu0  ;;  %v2066_v60 = vadd.f32 %v2058_v29, %v1787_v11 }
 0x29b   : > { %v1781_v57 = vadd.f32 %v1780_v49, %v1779_v16   ;;  %2574 = vpow2.f32 %v2323_v53  ;;  %v2060_v26 = vpop.f32.mrf.mxu1 }
 0x29c   : > { %v2324_v62 = vmul.f32 -1.442695, %v2066_v60 }
 0x29d   : > { %2576 = vtanh.f32 %v1781_v57  ;;  %v2061_v59 = vpop.f32.mrf.mxu1 }
 0x29e   : > { %2578 = vtanh.f32 %v2065_v61 }
 0x29f   : > { %2580 = vpow2.f32 %v2324_v62 }
 0x2a6   : > { %v2571_v63 = vpop.eup %2570 }
 0x2a7   : > { %v2573_v1 = vpop.eup %2572  ;;  %v2070_v15 = vadd.f32 1.0, %v2571_v63 }
 0x2a8   : > { %v2575_v2 = vpop.eup %2574 }
 0x2a9   : > { %2582 = vrcp.f32 %v2070_v15  ;;  %v2076_v3 = vadd.f32 1.0, %v2575_v2 }
 0x2aa   : > { %v2577_v4 = vpop.eup %2576 }
 0x2ab   : > { %v1783_v15 = vmul.f32 %v2577_v4, %v2573_v1   ;;  %2584 = vrcp.f32 %v2076_v3  ;;  %v2579_v5 = vpop.eup %2578 }
 0x2ac   : > { %v2581_v6 = vpop.eup %2580 }
 0x2ad   : > { %2094 = vst [vmem:[%s2093_s2] sm:$0xff] %v1783_v15  ;;  %v2083_v10 = vadd.f32 1.0, %v2581_v6 }
 0x2af   : > { %2586 = vrcp.f32 %v2083_v10 }
 0x2b6   : > { %v2583_v7 = vpop.eup %2582 }
 0x2b7   : > { %v2087_v22 = vmul.f32 %v2583_v7, %v2579_v5 }
 0x2b8   : > { %v2585_v9 = vpop.eup %2584 }
 0x2b9   : > { %v2086_v21 = vmul.f32 %v2684_v56, %v2585_v9 }
 0x2bb   : > { %v2088_v56 = vadd.f32 %v2087_v22, %v2086_v21  }
 0x2bc   : > { %v2587_v24 = vpop.eup %2586 }
 0x2bd   : > { %2588 = vtanh.f32 %v2088_v56 }
 0x2c9   :  { %1146 = sbr.rel (!%p1144_p1) target bundleno = 370 (0x172), region = 96 }
 0x2ca   : > { %v2589_v58 = vpop.eup %2588 }
 0x2cb   : > { %v2090_v23 = vmul.f32 %v2589_v58, %v2587_v24  }
 0x2cd   : > { %2096 = vst [vmem:[%s2095_s26] sm:$0xff] %v2090_v23 }
 0x2ce   :  { %2109 = vsyncpa [#allocation5], 1 }
 0x2cf   :  { %2110 = vsyncpa [#allocation7], 1 }

// kernel: module_forward.11
= control target key start
LH: loop header
LB: loop body
LE: loop exit
PB: predicated region body
PF: predicated region fallthrough
CT: control target
= control target key end

     0   :  { %v526_v0 = vmov 0.0   ;;  %vm527_vm0 = vmmov 0   ;;  %vm59_vm1 = vcmask 261120   ;;  %s684_s3 = inlined_call_operand.vmem [shape: bf16[32,128], index: 3, kind: input, shape index: {}]   ;;  %s685_s2 = inlined_call_operand.vmem [shape: bf16[32,128], index: 2, kind: input, shape index: {}]   ;;  %s686_s1 = inlined_call_operand.vmem [shape: bf16[8,32], index: 1, kind: input, shape index: {}]   ;;  %s687_s5 = inlined_call_operand.vmem [shape: bf16[128,128], index: 5, kind: input, shape index: {}]   ;;  %s688_s0 = inlined_call_operand.vmem [shape: bf16[8,32], index: 0, kind: input, shape index: {}]   ;;  %s689_s7 = inlined_call_operand.vmem [shape: bf16[128,128], index: 7, kind: input, shape index: {}]   ;;  %s690_s4 = inlined_call_operand.vmem [shape: f32[1,128], index: 4, kind: input, shape index: {}]   ;;  %s691_s6 = inlined_call_operand.vmem [shape: f32[1,128], index: 6, kind: input, shape index: {}]   ;;  %s692_s8 = inlined_call_operand.vmem [shape: f32[1,128], index: 8, kind: input, shape index: {}]   ;;  %s693_s9 = inlined_call_operand.vmem [shape: f32[8,128], index: 9, kind: output, shape index: {}]  }
   0x1   :  { %448 = vmatprep.subr.bf16.mxu0 %v526_v0  ;;  %456 = vmatprep.subr.bf16.mxu1 %v526_v0  ;;  %v506_v1 = vld [vmem:[%s684_s3 + $0x8] sm:$0xff]   ;;  %v508_v3 = vld [vmem:[%s684_s3] sm:$0xff]   ;;  %v510_v6 = vld [vmem:[%s687_s5 + $0x38] sm:$0xff]  }
   0x2   :  { %v507_v2 = vld [vmem:[%s685_s2 + $0x8] sm:$0xff]   ;;  %452 = vmatprep.mubr.msk.bf16.mxu0 %vm527_vm0, %v526_v0  ;;  %460 = vmatprep.mubr.msk.bf16.mxu1 %vm527_vm0, %v526_v0  ;;  %v509_v4 = vld [vmem:[%s685_s2] sm:$0xff]   ;;  %v511_v8 = vld [vmem:[%s687_s5 + $0x30] sm:$0xff]  }
   0x3   :  { %449 = vmatpush3.bf16.msra.mxu0 %v506_v1  ;;  %457 = vmatpush3.bf16.msra.mxu1 %v507_v2  ;;  %v42_v5 = vld [vmem:[%s686_s1] sm:$0xf]  ;;  %v512_v9 = vld [vmem:[%s687_s5 + $0x28] sm:$0xff]   ;;  %v514_v11 = vld [vmem:[%s687_s5 + $0x18] sm:$0xff]  }
   0x4   :  { %450 = vmatprep.subr.bf16.mxu0 %v526_v0  ;;  %458 = vmatprep.subr.bf16.mxu1 %v526_v0  ;;  %v37_v7 = vld [vmem:[%s688_s0] sm:$0xf]  ;;  %v515_v12 = vld [vmem:[%s687_s5 + $0x10] sm:$0xff]   ;;  %v516_v13 = vld [vmem:[%s687_s5 + $0x8] sm:$0xff]  }
   0x5   :  { %v513_v10 = vld [vmem:[%s687_s5 + $0x20] sm:$0xff]   ;;  %v518_v15 = vld [vmem:[%s689_s7 + $0x38] sm:$0xff]   ;;  %v519_v16 = vld [vmem:[%s689_s7 + $0x30] sm:$0xff]  }
   0x6   :  { %v517_v14 = vld [vmem:[%s687_s5] sm:$0xff]   ;;  %v520_v17 = vld [vmem:[%s689_s7 + $0x28] sm:$0xff]   ;;  %v522_v32 = vld [vmem:[%s689_s7 + $0x18] sm:$0xff]  }
   0x7   :  { %451 = vmatpush3.bf16.msra.mxu0 %v508_v3  ;;  %459 = vmatpush3.bf16.msra.mxu1 %v509_v4  ;;  %v521_v18 = vld [vmem:[%s689_s7 + $0x20] sm:$0xff]   ;;  %v523_v33 = vld [vmem:[%s689_s7 + $0x10] sm:$0xff]   ;;  %v524_v34 = vld [vmem:[%s689_s7 + $0x8] sm:$0xff]  }
   0x8   :  { %464 = vmatprep.subr.bf16.mxu0 %v526_v0  ;;  %484 = vmatprep.subr.bf16.mxu1 %v526_v0  ;;  %v405_v21 = vld [vmem:[%s690_s4] ss:$0 sm:$0xff] }
   0x9   :  { %v525_v35 = vld [vmem:[%s689_s7] sm:$0xff]  }
   0xa   :  { %453 = vmatmul.mubr.msk.bf16.vlgmr.msra.gmra.mxu0 %vm59_vm1, %v42_v5  ;;  %461 = vmatmul.mubr.msk.bf16.vlgmr.msra.gmra.mxu1 %vm59_vm1, %v37_v7  ;;  %v406_v36 = vld [vmem:[%s691_s6] ss:$0 sm:$0xff] }
   0xb   :  { %465 = vmatpush3.bf16.msra.mxu0 %v510_v6  ;;  %480 = vmatprep.mubr.msk.bf16.mxu0 %vm527_vm0, %v526_v0  ;;  %v415_v45 = vld [vmem:[%s692_s8] ss:$0 sm:$0xff] }
   0xc   :  { %466 = vmatprep.subr.bf16.mxu0 %v526_v0  ;;  %500 = vmatprep.mubr.msk.bf16.mxu1 %vm527_vm0, %v526_v0 }
   0xd   :  { %485 = vmatpush3.bf16.msra.mxu1 %v518_v15 }
   0xe   :  { %486 = vmatprep.subr.bf16.mxu1 %v526_v0 }
   0xf   :  { %467 = vmatpush3.bf16.msra.mxu0 %v511_v8 }
  0x10   :  { %468 = vmatprep.subr.bf16.mxu0 %v526_v0 }
  0x11   :  { %487 = vmatpush3.bf16.msra.mxu1 %v519_v16 }
  0x12   :  { %488 = vmatprep.subr.bf16.mxu1 %v526_v0 }
  0x13   :  { %469 = vmatpush3.bf16.msra.mxu0 %v512_v9 }
  0x14   :  { %470 = vmatprep.subr.bf16.mxu0 %v526_v0 }
  0x15   :  { %489 = vmatpush3.bf16.msra.mxu1 %v520_v17 }
  0x16   :  { %490 = vmatprep.subr.bf16.mxu1 %v526_v0 }
  0x17   :  { %471 = vmatpush3.bf16.msra.mxu0 %v513_v10 }
  0x18   :  { %472 = vmatprep.subr.bf16.mxu0 %v526_v0 }
  0x19   :  { %491 = vmatpush3.bf16.msra.mxu1 %v521_v18 }
  0x1a   :  { %492 = vmatprep.subr.bf16.mxu1 %v526_v0 }
  0x1b   :  { %473 = vmatpush3.bf16.msra.mxu0 %v514_v11 }
  0x1c   :  { %474 = vmatprep.subr.bf16.mxu0 %v526_v0 }
  0x1d   :  { %493 = vmatpush3.bf16.msra.mxu1 %v522_v32 }
  0x1e   :  { %494 = vmatprep.subr.bf16.mxu1 %v526_v0 }
  0x1f   :  { %475 = vmatpush3.bf16.msra.mxu0 %v515_v12 }
  0x20   :  { %476 = vmatprep.subr.bf16.mxu0 %v526_v0 }
  0x21   :  { %495 = vmatpush3.bf16.msra.mxu1 %v523_v33 }
  0x22   :  { %496 = vmatprep.subr.bf16.mxu1 %v526_v0 }
  0x23   :  { %477 = vmatpush3.bf16.msra.mxu0 %v516_v13 }
  0x24   :  { %478 = vmatprep.subr.bf16.mxu0 %v526_v0 }
  0x25   :  { %497 = vmatpush3.bf16.msra.mxu1 %v524_v34 }
  0x26   :  { %498 = vmatprep.subr.bf16.mxu1 %v526_v0 }
  0x27   :  { %479 = vmatpush3.bf16.msra.mxu0 %v517_v14 }
  0x29   :  { %499 = vmatpush3.bf16.msra.mxu1 %v525_v35 }
  0xca   :  { %v97_v19 = vpop.f32.mrf.mxu0  ;;  %v152_v20 = vpop.f32.mrf.mxu1 }
  0xcb   :  { %v153_v22 = vadd.f32 %v152_v20, %v97_v19 }
  0xcc   :  { %v454_v23 = vpop.f32.mrf.mxu0  ;;  %v462_v24 = vpop.f32.mrf.mxu1 }
  0xcd   :  { %v165_v25 = vadd.f32 %v405_v21, %v153_v22 }
  0xce   :  { %v100_v26 = vpop.f32.mrf.mxu0  ;;  %v155_v27 = vpop.f32.mrf.mxu1 }
  0xcf   :  { %v166_v28 = vmax.f32 %v165_v25, 0.0 }
  0xd0   :  { %v455_v29 = vpop.f32.mrf.mxu0  ;;  %v463_v30 = vpop.f32.mrf.mxu1 }
  0xd1   :  { %v167_v31 = vpack.c.bf16 %v166_v28, %v166_v28 }
  0xd3   :  { %481 = vmatmul.mubr.bf16.vlgmr.msra.gmra.mxu0 %v167_v31 }
 0x193   :  { %v273_v37 = vpop.f32.mrf.mxu0 }
 0x194   :  { %v274_v38 = vadd.f32 %v406_v36, %v273_v37 }
 0x195   :  { %v482_v39 = vpop.f32.mrf.mxu0 }
 0x196   :  { %v279_v40 = vmax.f32 %v274_v38, 0.0 }
 0x197   :  { %v276_v41 = vpop.f32.mrf.mxu0 }
 0x198   :  { %v280_v42 = vpack.c.bf16 %v279_v40, %v279_v40 }
 0x199   :  { %v483_v43 = vpop.f32.mrf.mxu0 }
 0x19a   :  { %281 = vst [vmem:[#allocation2] sm:$0xf] %v280_v42 }
 0x1a1   :  { %v282_v44 = vld [vmem:[#allocation2] sm:$0xf] }
 0x1a2   :  { %501 = vmatmul.mubr.bf16.vlgmr.msra.gmra.mxu1 %v282_v44 }
 0x262   :  { %v388_v46 = vpop.f32.mrf.mxu1 }
 0x263   :  { %v389_v47 = vadd.f32 %v415_v45, %v388_v46 }
 0x264   :  { %v502_v48 = vpop.f32.mrf.mxu1 }
 0x265   :  { %394 = vst [vmem:[%s693_s9] sm:$0xff] %v389_v47 }
 0x266   :  { %v391_v49 = vpop.f32.mrf.mxu1 }
 0x268   :  { %v503_v50 = vpop.f32.mrf.mxu1 }

// kernel: module_forward.10
= control target key start
LH: loop header
LB: loop body
LE: loop exit
PB: predicated region body
PF: predicated region fallthrough
CT: control target
= control target key end

     0   :  { %v576_v0 = vmov 0.0   ;;  %vm577_vm0 = vmmov 0   ;;  %vm66_vm1 = vcmask 261120   ;;  %s737_s3 = inlined_call_operand.vmem [shape: bf16[32,128], index: 3, kind: input, shape index: {}]   ;;  %s738_s2 = inlined_call_operand.vmem [shape: bf16[32,128], index: 2, kind: input, shape index: {}]   ;;  %s739_s1 = inlined_call_operand.vmem [shape: bf16[16,32], index: 1, kind: input, shape index: {}]   ;;  %s740_s0 = inlined_call_operand.vmem [shape: bf16[16,32], index: 0, kind: input, shape index: {}]   ;;  %s741_s5 = inlined_call_operand.vmem [shape: bf16[128,128], index: 5, kind: input, shape index: {}]   ;;  %s742_s7 = inlined_call_operand.vmem [shape: bf16[128,128], index: 7, kind: input, shape index: {}]   ;;  %s743_s4 = inlined_call_operand.vmem [shape: f32[1,128], index: 4, kind: input, shape index: {}]   ;;  %s744_s6 = inlined_call_operand.vmem [shape: f32[1,128], index: 6, kind: input, shape index: {}]   ;;  %s745_s8 = inlined_call_operand.vmem [shape: f32[1,128], index: 8, kind: input, shape index: {}]   ;;  %s746_s9 = inlined_call_operand.vmem [shape: f32[16,128], index: 9, kind: output, shape index: {}]  }
   0x1   :  { %495 = vmatprep.subr.bf16.mxu0 %v576_v0  ;;  %503 = vmatprep.subr.bf16.mxu1 %v576_v0  ;;  %v553_v1 = vld [vmem:[%s737_s3 + $0x8] sm:$0xff]   ;;  %v555_v3 = vld [vmem:[%s737_s3] sm:$0xff]   ;;  %v559_v7 = vld [vmem:[%s741_s5 + $0x38] sm:$0xff]  }
   0x2   :  { %v554_v2 = vld [vmem:[%s738_s2 + $0x8] sm:$0xff]   ;;  %499 = vmatprep.mubr.msk.bf16.mxu0 %vm577_vm0, %v576_v0  ;;  %507 = vmatprep.mubr.msk.bf16.mxu1 %vm577_vm0, %v576_v0  ;;  %v556_v4 = vld [vmem:[%s738_s2] sm:$0xff]   ;;  %v560_v8 = vld [vmem:[%s741_s5 + $0x30] sm:$0xff]  }
   0x3   :  { %496 = vmatpush3.bf16.msra.mxu0 %v553_v1  ;;  %504 = vmatpush3.bf16.msra.mxu1 %v554_v2  ;;  %v557_v5 = vld [vmem:[%s739_s1] sm:$0xff]   ;;  %v561_v9 = vld [vmem:[%s741_s5 + $0x28] sm:$0xff]   ;;  %v563_v11 = vld [vmem:[%s741_s5 + $0x18] sm:$0xff]  }
   0x4   :  { %497 = vmatprep.subr.bf16.mxu0 %v576_v0  ;;  %505 = vmatprep.subr.bf16.mxu1 %v576_v0  ;;  %v558_v6 = vld [vmem:[%s740_s0] sm:$0xff]   ;;  %v564_v12 = vld [vmem:[%s741_s5 + $0x10] sm:$0xff]   ;;  %v565_v13 = vld [vmem:[%s741_s5 + $0x8] sm:$0xff]  }
   0x5   :  { %v562_v10 = vld [vmem:[%s741_s5 + $0x20] sm:$0xff]   ;;  %v567_v15 = vld [vmem:[%s742_s7 + $0x38] sm:$0xff]   ;;  %v568_v16 = vld [vmem:[%s742_s7 + $0x30] sm:$0xff]  }
   0x6   :  { %v566_v14 = vld [vmem:[%s741_s5] sm:$0xff]   ;;  %v569_v17 = vld [vmem:[%s742_s7 + $0x28] sm:$0xff]   ;;  %v571_v35 = vld [vmem:[%s742_s7 + $0x18] sm:$0xff]  }
   0x7   :  { %498 = vmatpush3.bf16.msra.mxu0 %v555_v3  ;;  %506 = vmatpush3.bf16.msra.mxu1 %v556_v4  ;;  %v442_v22 = vld [vmem:[%s743_s4] ss:$0 sm:$0xff]  ;;  %v572_v36 = vld [vmem:[%s742_s7 + $0x10] sm:$0xff]   ;;  %v573_v37 = vld [vmem:[%s742_s7 + $0x8] sm:$0xff]  }
   0x8   :  { %511 = vmatprep.subr.bf16.mxu0 %v576_v0  ;;  %531 = vmatprep.subr.bf16.mxu1 %v576_v0  ;;  %v570_v34 = vld [vmem:[%s742_s7 + $0x20] sm:$0xff]  }
   0x9   :  { %v574_v38 = vld [vmem:[%s742_s7] sm:$0xff]  }
   0xa   :  { %500 = vmatmul.mubr.msk.bf16.vlgmr.msra.gmra.mxu0 %vm66_vm1, %v557_v5  ;;  %508 = vmatmul.mubr.msk.bf16.vlgmr.msra.gmra.mxu1 %vm66_vm1, %v558_v6  ;;  %v443_v39 = vld [vmem:[%s744_s6] ss:$0 sm:$0xff] }
   0xb   :  { %512 = vmatpush3.bf16.msra.mxu0 %v559_v7  ;;  %527 = vmatprep.mubr.msk.bf16.mxu0 %vm577_vm0, %v576_v0  ;;  %v454_v50 = vld [vmem:[%s745_s8] ss:$0 sm:$0xff] }
   0xc   :  { %513 = vmatprep.subr.bf16.mxu0 %v576_v0  ;;  %547 = vmatprep.mubr.msk.bf16.mxu1 %vm577_vm0, %v576_v0 }
   0xd   :  { %532 = vmatpush3.bf16.msra.mxu1 %v567_v15 }
   0xe   :  { %533 = vmatprep.subr.bf16.mxu1 %v576_v0 }
   0xf   :  { %514 = vmatpush3.bf16.msra.mxu0 %v560_v8 }
  0x10   :  { %515 = vmatprep.subr.bf16.mxu0 %v576_v0 }
  0x11   :  { %534 = vmatpush3.bf16.msra.mxu1 %v568_v16 }
  0x12   :  { %535 = vmatprep.subr.bf16.mxu1 %v576_v0 }
  0x13   :  { %516 = vmatpush3.bf16.msra.mxu0 %v561_v9 }
  0x14   :  { %517 = vmatprep.subr.bf16.mxu0 %v576_v0 }
  0x15   :  { %536 = vmatpush3.bf16.msra.mxu1 %v569_v17 }
  0x16   :  { %537 = vmatprep.subr.bf16.mxu1 %v576_v0 }
  0x17   :  { %518 = vmatpush3.bf16.msra.mxu0 %v562_v10 }
  0x18   :  { %519 = vmatprep.subr.bf16.mxu0 %v576_v0 }
  0x19   :  { %538 = vmatpush3.bf16.msra.mxu1 %v570_v34 }
  0x1a   :  { %539 = vmatprep.subr.bf16.mxu1 %v576_v0 }
  0x1b   :  { %520 = vmatpush3.bf16.msra.mxu0 %v563_v11 }
  0x1c   :  { %521 = vmatprep.subr.bf16.mxu0 %v576_v0 }
  0x1d   :  { %540 = vmatpush3.bf16.msra.mxu1 %v571_v35 }
  0x1e   :  { %541 = vmatprep.subr.bf16.mxu1 %v576_v0 }
  0x1f   :  { %522 = vmatpush3.bf16.msra.mxu0 %v564_v12 }
  0x20   :  { %523 = vmatprep.subr.bf16.mxu0 %v576_v0 }
  0x21   :  { %542 = vmatpush3.bf16.msra.mxu1 %v572_v36 }
  0x22   :  { %543 = vmatprep.subr.bf16.mxu1 %v576_v0 }
  0x23   :  { %524 = vmatpush3.bf16.msra.mxu0 %v565_v13 }
  0x24   :  { %525 = vmatprep.subr.bf16.mxu0 %v576_v0 }
  0x25   :  { %544 = vmatpush3.bf16.msra.mxu1 %v573_v37 }
  0x26   :  { %545 = vmatprep.subr.bf16.mxu1 %v576_v0 }
  0x27   :  { %526 = vmatpush3.bf16.msra.mxu0 %v566_v14 }
  0x29   :  { %546 = vmatpush3.bf16.msra.mxu1 %v574_v38 }
  0xca   :  { %v104_v18 = vpop.f32.mrf.mxu0  ;;  %v165_v19 = vpop.f32.mrf.mxu1 }
  0xcb   :  { %v166_v20 = vadd.f32 %v165_v19, %v104_v18 }
  0xcc   :  { %v501_v21 = vpop.f32.mrf.mxu0  ;;  %v509_v23 = vpop.f32.mrf.mxu1 }
  0xcd   :  { %v179_v26 = vadd.f32 %v442_v22, %v166_v20 }
  0xce   :  { %v107_v24 = vpop.f32.mrf.mxu0  ;;  %v168_v25 = vpop.f32.mrf.mxu1 }
  0xcf   :  { %v169_v27 = vadd.f32 %v168_v25, %v107_v24  ;;  %v181_v31 = vmax.f32 %v179_v26, 0.0 }
  0xd0   :  { %v502_v28 = vpop.f32.mrf.mxu0  ;;  %v510_v29 = vpop.f32.mrf.mxu1 }
  0xd1   :  { %v180_v30 = vadd.f32 %v442_v22, %v169_v27 }
  0xd3   :  { %v182_v32 = vmax.f32 %v180_v30, 0.0 }
  0xd5   :  { %v183_v33 = vpack.c.bf16 %v182_v32, %v181_v31 }
  0xd7   :  { %528 = vmatmul.mubr.bf16.vlgmr.msra.gmra.mxu0 %v183_v33 }
 0x197   :  { %v289_v40 = vpop.f32.mrf.mxu0 }
 0x198   :  { %v290_v42 = vadd.f32 %v443_v39, %v289_v40 }
 0x199   :  { %v529_v41 = vpop.f32.mrf.mxu0 }
 0x19a   :  { %v296_v46 = vmax.f32 %v290_v42, 0.0 }
 0x19b   :  { %v292_v43 = vpop.f32.mrf.mxu0 }
 0x19c   :  { %v293_v44 = vadd.f32 %v443_v39, %v292_v43 }
 0x19d   :  { %v530_v45 = vpop.f32.mrf.mxu0 }
 0x19e   :  { %v297_v47 = vmax.f32 %v293_v44, 0.0 }
 0x1a0   :  { %v469_v48 = vpack.c.bf16 %v297_v47, %v296_v46 }
 0x1a2   :  { %470 = vst [vmem:[#allocation2] sm:$0xff] %v469_v48  }
 0x1a9   :  { %v575_v49 = vld [vmem:[#allocation2] sm:$0xff]  }
 0x1aa   :  { %548 = vmatmul.mubr.bf16.vlgmr.msra.gmra.mxu1 %v575_v49 }
 0x26a   :  { %v421_v51 = vpop.f32.mrf.mxu1 }
 0x26b   :  { %v422_v52 = vadd.f32 %v454_v50, %v421_v51 }
 0x26c   :  { %v549_v53 = vpop.f32.mrf.mxu1 }
 0x26d   :  { %428 = vst [vmem:[%s746_s9] sm:$0xff] %v422_v52 }
 0x26e   :  { %v424_v54 = vpop.f32.mrf.mxu1 }
 0x26f   :  { %v425_v55 = vadd.f32 %v454_v50, %v424_v54 }
 0x270   :  { %v550_v56 = vpop.f32.mrf.mxu1 }
 0x271   :  { %429 = vst [vmem:[%s746_s9 + $0x8] sm:$0xff] %v425_v55 }

</bundles_post_ra>
